<compile_context>
chip_gen: v7x
topology: tpu7x:2x2x1
jax: 0.10.0
libtpu: 0.0.40
codegen_flags: <defaults>
</compile_context>

<pallas_src>
import functools
import math

import jax
import jax.numpy as jnp
from jax import lax
from jax.experimental import pallas as pl
from jax.experimental.pallas import tpu as pltpu


def _ignn_fixed_point_kernel(w_ref, x0_ref, a_ref, b_ref, x_out_ref,
                             *, fw_mitr, tol, coarse_tol, unroll, phi):
    """Hot path: fixed-point iteration  X <- phi(W @ X @ A + b_Omega).

    Two phases sharing one iteration budget (fw_mitr):
      phase 1: bf16 operands / f32 accumulation until block residual < coarse_tol,
      phase 2: f32 operands until block residual < tol.
    The residual compares X across an `unroll`-step block (not per step) and the
    counter may overshoot fw_mitr by < unroll iterations; both are benign for the
    contraction map this layer is built around.
    """
    w_f32 = w_ref[...]            # (m, m) loop-invariant, stays resident
    a_f32 = a_ref[...]            # (n, n) loop-invariant
    b = b_ref[...]                # (m, n) loop-invariant (precomputed b_Omega)

    # One-time bf16 copies of the loop invariants for the bulk phase.
    w_bf16 = w_f32.astype(jnp.bfloat16)
    a_bf16 = a_f32.astype(jnp.bfloat16)

    def make_phase(w_op, a_op, op_dtype, it_cap, phase_tol):
        def step(x):
            wx = jnp.dot(w_op, x.astype(op_dtype),
                         preferred_element_type=jnp.float32)      # W @ X
            wxa = jnp.dot(wx.astype(op_dtype), a_op,
                          preferred_element_type=jnp.float32)     # (W X) @ A
            return phi(wxa + b)

        def cond(carry):
            it, resid, _ = carry
            return jnp.logical_and(it < it_cap, resid >= phase_tol)

        def body(carry):
            it, _, x = carry
            x_new = x
            for _ in range(unroll):            # static unroll: bigger basic block
                x_new = step(x_new)
            # Single XLU full reduce per block; residual carried as f32 scalar.
            resid = jnp.max(jnp.abs(x_new - x))
            return (it + unroll, resid, x_new)

        return cond, body

    x = x0_ref[...].astype(jnp.float32)
    big = jnp.array(jnp.inf, dtype=jnp.float32)

    # Phase 1: bf16 bulk.  Reserve at least 4*unroll iterations for the f32 polish.
    bulk_cap = max(0, fw_mitr - 4 * unroll)
    if bulk_cap > 0:
        cond1, body1 = make_phase(w_bf16, a_bf16, jnp.bfloat16, bulk_cap,
                                  max(coarse_tol, tol))
        it, _, x = lax.while_loop(cond1, body1, (jnp.int32(0), big, x))
    else:
        it = jnp.int32(0)

    # Phase 2: f32 polish to the full tolerance (runs at least one block whenever
    # the budget allows, so the returned X is an f32-accurate fixed point).
    cond2, body2 = make_phase(w_f32, a_f32, jnp.float32, fw_mitr, tol)
    _, _, x = lax.while_loop(cond2, body2, (it, big, x))

    x_out_ref[...] = x


def projection_norm_inf(W, kappa):
    """Project every row of W onto the L1 ball of radius kappa => ||W||_inf <= kappa.
    Vectorized equivalent of the sequential numpy loop in the torch module
    (parameter setup / glue, kept in plain JAX)."""
    v = jnp.float32(kappa)
    m = W.shape[1]

    def project_row(row):
        abs_r = jnp.abs(row)
        needs = jnp.sum(abs_r) > v
        u = jnp.sort(abs_r)[::-1]                       # descending
        css = jnp.cumsum(u)
        j = jnp.arange(1, m + 1, dtype=W.dtype)
        rho = jnp.maximum(jnp.sum(u > (css - v) / j), 1)
        theta = (css[rho - 1] - v) / rho.astype(W.dtype)
        proj = jnp.sign(row) * jnp.maximum(abs_r - theta, 0.0)
        return jnp.where(needs, proj, row)

    return jax.vmap(project_row)(W)


def _vmem_limit_bytes(working_set_bytes):
    """Generation-aware VMEM limit: leave headroom below physical VMEM (v7x has only
    64 MiB per TensorCore), while allowing up to ~112 MiB on v5e/v6e (128 MiB
    physical) so a large A can stay VMEM-resident across the serial loop."""
    phys = 64 * 1024 * 1024                      # conservative fallback (v7x per-TC)
    try:
        phys = int(getattr(pltpu.get_tpu_info(), "vmem_capacity_bytes", phys))
    except Exception:
        pass
    ceiling = max(32 * 1024 * 1024, phys - 16 * 1024 * 1024)
    want = max(32 * 1024 * 1024, 6 * int(working_set_bytes))
    return int(min(ceiling, want))


def implicit_layer_forward(params, X_0, A, U, *, kappa=0.99, A_rho=1.0,
                           fw_mitr=300, tol=3e-6, coarse_tol=5e-3, unroll=16,
                           phi=lambda x: jnp.maximum(x, 0.0)):
    """JAX/Pallas equivalent of ImplicitLayer.forward (phi = relu)."""
    W = params["W"].astype(jnp.float32)
    Omega_1 = params["Omega_1"].astype(jnp.float32)
    X_0 = X_0.astype(jnp.float32)
    A = A.astype(jnp.float32)
    U = U.astype(jnp.float32)
    m, n = X_0.shape

    if kappa is not None:
        W = projection_norm_inf(W, kappa / A_rho)

    # b_Omega = Omega_1 @ U @ A  (torch: support_1 = ((U^T @ Omega_1^T)^T); then @ A)
    # Precomputed once in plain XLA so the kernel only carries W/X_0/A/b_Omega.
    b_Omega = jnp.dot(Omega_1, U, preferred_element_type=jnp.float32)
    b_Omega = jnp.dot(b_Omega, A, preferred_element_type=jnp.float32)

    kernel = functools.partial(_ignn_fixed_point_kernel, fw_mitr=fw_mitr, tol=tol,
                               coarse_tol=coarse_tol, unroll=unroll, phi=phi)

    # Scheduler hint: the kernel is (up to) fw_mitr serial iterations of two matmuls.
    flops = 2 * fw_mitr * (m * m * n + m * n * n)
    io_bytes = 4 * (m * m + 3 * m * n + n * n)
    # Working set: f32 W/A/b/X/out + bf16 copies of W and A (loop-phase-1 operands).
    working_set = 4 * (m * m + n * n + 3 * m * n) + 2 * (m * m + n * n)
    vmem_limit = _vmem_limit_bytes(working_set)

    vmem = pl.BlockSpec(memory_space=pltpu.MemorySpace.VMEM)
    return pl.pallas_call(
        kernel,
        out_shape=jax.ShapeDtypeStruct((m, n), jnp.float32),
        in_specs=[vmem, vmem, vmem, vmem],
        out_specs=vmem,
        cost_estimate=pl.CostEstimate(flops=flops, transcendentals=0,
                                      bytes_accessed=io_bytes),
        compiler_params=pltpu.CompilerParams(vmem_limit_bytes=vmem_limit),
    )(W, X_0, A, b_Omega)


if __name__ == "__main__":
    # in_features p, out_features m, num_node n  (small, TPU-tile-friendly)
    p, m, n = 16, 32, 128

    key = jax.random.PRNGKey(0)
    k_w, k_o1, k_o2, k_b, k_x, k_a, k_u = jax.random.split(key, 7)

    stdv = 1.0 / math.sqrt(m)  # stdv = 1/sqrt(W.size(1)) in the torch init
    params = {
        "W":       jax.random.uniform(k_w,  (m, m), jnp.float32, -stdv, stdv),
        "Omega_1": jax.random.uniform(k_o1, (m, p), jnp.float32, -stdv, stdv),
        "Omega_2": jax.random.uniform(k_o2, (m, p), jnp.float32, -stdv, stdv),
        "bias":    jax.random.uniform(k_b,  (m, 1), jnp.float32, -stdv, stdv),
    }

    X_0 = jax.random.uniform(k_x, (m, n), jnp.float32)
    # Row-normalized random non-negative adjacency => Perron-Frobenius eigenvalue 1
    # (A_rho=1.0), so the projected W (||W||_inf <= 0.99) gives a convergent map.
    A_raw = jax.random.uniform(k_a, (n, n), jnp.float32)
    A = A_raw / jnp.sum(A_raw, axis=1, keepdims=True)
    U = jax.random.uniform(k_u, (p, n), jnp.float32)

    X = implicit_layer_forward(params, X_0, A, U, kappa=0.99, A_rho=1.0,
                               fw_mitr=300, tol=3e-6, coarse_tol=5e-3, unroll=16)
    X = jax.block_until_ready(X)

    assert X.shape == (m, n)
    assert bool(jnp.all(jnp.isfinite(X)))

    # Fixed-point residual check against a plain-JAX reference of one update step.
    W_proj = projection_norm_inf(params["W"], 0.99)
    b_ref = params["Omega_1"] @ U @ A
    X_next = jnp.maximum(W_proj @ X @ A + b_ref, 0.0)
    residual = float(jnp.max(jnp.abs(X_next - X)))
    assert residual < 1e-3, f"fixed point not reached, residual={residual}"

    print("KERNEL_OK")
</pallas_src>

<mosaic_0001>
module attributes {stable_mosaic.version = 11 : i64} {
  func.func @_ignn_fixed_point_kernel(%arg0: memref<32x32xf32, #tpu.memory_space<vmem>>, %arg1: memref<32x128xf32, #tpu.memory_space<vmem>>, %arg2: memref<128x128xf32, #tpu.memory_space<vmem>>, %arg3: memref<32x128xf32, #tpu.memory_space<vmem>>, %arg4: memref<32x128xf32, #tpu.memory_space<vmem>>) attributes {dimension_semantics = [], scalar_prefetch = 0 : i64, scratch_operands = 0 : i64, tpu.core_type = #tpu.core_type<tc>} {
    %c0 = arith.constant 0 : index
    %c0_0 = arith.constant 0 : index
    %0 = vector.load %arg0[%c0, %c0_0] : memref<32x32xf32, #tpu.memory_space<vmem>>, vector<32x32xf32>
    %c0_1 = arith.constant 0 : index
    %c0_2 = arith.constant 0 : index
    %1 = vector.load %arg2[%c0_1, %c0_2] : memref<128x128xf32, #tpu.memory_space<vmem>>, vector<128x128xf32>
    %c0_3 = arith.constant 0 : index
    %c0_4 = arith.constant 0 : index
    %2 = vector.load %arg3[%c0_3, %c0_4] : memref<32x128xf32, #tpu.memory_space<vmem>>, vector<32x128xf32>
    %3 = arith.truncf %0 : vector<32x32xf32> to vector<32x32xbf16>
    %4 = arith.truncf %1 : vector<128x128xf32> to vector<128x128xbf16>
    %c0_5 = arith.constant 0 : index
    %c0_6 = arith.constant 0 : index
    %5 = vector.load %arg1[%c0_5, %c0_6] : memref<32x128xf32, #tpu.memory_space<vmem>>, vector<32x128xf32>
    %c0_i32 = arith.constant 0 : i32
    %cst = arith.constant 0x7F800000 : f32
    %6:3 = scf.while (%arg5 = %c0_i32, %arg6 = %cst, %arg7 = %5) : (i32, f32, vector<32x128xf32>) -> (i32, f32, vector<32x128xf32>) {
      %c236_i32 = arith.constant 236 : i32
      %9 = arith.cmpi slt, %arg5, %c236_i32 : i32
      %cst_10 = arith.constant 5.000000e-03 : f32
      %10 = arith.cmpf oge, %arg6, %cst_10 : f32
      %11 = arith.andi %9, %10 : i1
      scf.condition(%11) %arg5, %arg6, %arg7 : i32, f32, vector<32x128xf32>
    } do {
    ^bb0(%arg5: i32, %arg6: f32, %arg7: vector<32x128xf32>):
      %9 = arith.truncf %arg7 : vector<32x128xf32> to vector<32x128xbf16>
      %cst_10 = arith.constant dense<0.000000e+00> : vector<32x128xf32>
      %10 = tpu.matmul %3, %9, %cst_10 {dimension_numbers = #tpu.dot_dimension_numbers<[1], [0], [0], [1], [0, 0, 1, 1], [], []>} : vector<32x32xbf16>, vector<32x128xbf16>, vector<32x128xf32> -> vector<32x128xf32>
      %11 = arith.truncf %10 : vector<32x128xf32> to vector<32x128xbf16>
      %cst_11 = arith.constant dense<0.000000e+00> : vector<32x128xf32>
      %12 = tpu.matmul %11, %4, %cst_11 {dimension_numbers = #tpu.dot_dimension_numbers<[1], [0], [0], [1], [0, 0, 1, 1], [], []>} : vector<32x128xbf16>, vector<128x128xbf16>, vector<32x128xf32> -> vector<32x128xf32>
      %13 = arith.addf %12, %2 : vector<32x128xf32>
      %cst_12 = arith.constant 0.000000e+00 : f32
      %14 = vector.broadcast %cst_12 : f32 to vector<32x128xf32>
      %15 = arith.maximumf %13, %14 : vector<32x128xf32>
      %16 = arith.truncf %15 : vector<32x128xf32> to vector<32x128xbf16>
      %cst_13 = arith.constant dense<0.000000e+00> : vector<32x128xf32>
      %17 = tpu.matmul %3, %16, %cst_13 {dimension_numbers = #tpu.dot_dimension_numbers<[1], [0], [0], [1], [0, 0, 1, 1], [], []>} : vector<32x32xbf16>, vector<32x128xbf16>, vector<32x128xf32> -> vector<32x128xf32>
      %18 = arith.truncf %17 : vector<32x128xf32> to vector<32x128xbf16>
      %cst_14 = arith.constant dense<0.000000e+00> : vector<32x128xf32>
      %19 = tpu.matmul %18, %4, %cst_14 {dimension_numbers = #tpu.dot_dimension_numbers<[1], [0], [0], [1], [0, 0, 1, 1], [], []>} : vector<32x128xbf16>, vector<128x128xbf16>, vector<32x128xf32> -> vector<32x128xf32>
      %20 = arith.addf %19, %2 : vector<32x128xf32>
      %cst_15 = arith.constant 0.000000e+00 : f32
      %21 = vector.broadcast %cst_15 : f32 to vector<32x128xf32>
      %22 = arith.maximumf %20, %21 : vector<32x128xf32>
      %23 = arith.truncf %22 : vector<32x128xf32> to vector<32x128xbf16>
      %cst_16 = arith.constant dense<0.000000e+00> : vector<32x128xf32>
      %24 = tpu.matmul %3, %23, %cst_16 {dimension_numbers = #tpu.dot_dimension_numbers<[1], [0], [0], [1], [0, 0, 1, 1], [], []>} : vector<32x32xbf16>, vector<32x128xbf16>, vector<32x128xf32> -> vector<32x128xf32>
      %25 = arith.truncf %24 : vector<32x128xf32> to vector<32x128xbf16>
      %cst_17 = arith.constant dense<0.000000e+00> : vector<32x128xf32>
      %26 = tpu.matmul %25, %4, %cst_17 {dimension_numbers = #tpu.dot_dimension_numbers<[1], [0], [0], [1], [0, 0, 1, 1], [], []>} : vector<32x128xbf16>, vector<128x128xbf16>, vector<32x128xf32> -> vector<32x128xf32>
      %27 = arith.addf %26, %2 : vector<32x128xf32>
      %cst_18 = arith.constant 0.000000e+00 : f32
      %28 = vector.broadcast %cst_18 : f32 to vector<32x128xf32>
      %29 = arith.maximumf %27, %28 : vector<32x128xf32>
      %30 = arith.truncf %29 : vector<32x128xf32> to vector<32x128xbf16>
      %cst_19 = arith.constant dense<0.000000e+00> : vector<32x128xf32>
      %31 = tpu.matmul %3, %30, %cst_19 {dimension_numbers = #tpu.dot_dimension_numbers<[1], [0], [0], [1], [0, 0, 1, 1], [], []>} : vector<32x32xbf16>, vector<32x128xbf16>, vector<32x128xf32> -> vector<32x128xf32>
      %32 = arith.truncf %31 : vector<32x128xf32> to vector<32x128xbf16>
      %cst_20 = arith.constant dense<0.000000e+00> : vector<32x128xf32>
      %33 = tpu.matmul %32, %4, %cst_20 {dimension_numbers = #tpu.dot_dimension_numbers<[1], [0], [0], [1], [0, 0, 1, 1], [], []>} : vector<32x128xbf16>, vector<128x128xbf16>, vector<32x128xf32> -> vector<32x128xf32>
      %34 = arith.addf %33, %2 : vector<32x128xf32>
      %cst_21 = arith.constant 0.000000e+00 : f32
      %35 = vector.broadcast %cst_21 : f32 to vector<32x128xf32>
      %36 = arith.maximumf %34, %35 : vector<32x128xf32>
      %37 = arith.truncf %36 : vector<32x128xf32> to vector<32x128xbf16>
      %cst_22 = arith.constant dense<0.000000e+00> : vector<32x128xf32>
      %38 = tpu.matmul %3, %37, %cst_22 {dimension_numbers = #tpu.dot_dimension_numbers<[1], [0], [0], [1], [0, 0, 1, 1], [], []>} : vector<32x32xbf16>, vector<32x128xbf16>, vector<32x128xf32> -> vector<32x128xf32>
      %39 = arith.truncf %38 : vector<32x128xf32> to vector<32x128xbf16>
      %cst_23 = arith.constant dense<0.000000e+00> : vector<32x128xf32>
      %40 = tpu.matmul %39, %4, %cst_23 {dimension_numbers = #tpu.dot_dimension_numbers<[1], [0], [0], [1], [0, 0, 1, 1], [], []>} : vector<32x128xbf16>, vector<128x128xbf16>, vector<32x128xf32> -> vector<32x128xf32>
      %41 = arith.addf %40, %2 : vector<32x128xf32>
      %cst_24 = arith.constant 0.000000e+00 : f32
      %42 = vector.broadcast %cst_24 : f32 to vector<32x128xf32>
      %43 = arith.maximumf %41, %42 : vector<32x128xf32>
      %44 = arith.truncf %43 : vector<32x128xf32> to vector<32x128xbf16>
      %cst_25 = arith.constant dense<0.000000e+00> : vector<32x128xf32>
      %45 = tpu.matmul %3, %44, %cst_25 {dimension_numbers = #tpu.dot_dimension_numbers<[1], [0], [0], [1], [0, 0, 1, 1], [], []>} : vector<32x32xbf16>, vector<32x128xbf16>, vector<32x128xf32> -> vector<32x128xf32>
      %46 = arith.truncf %45 : vector<32x128xf32> to vector<32x128xbf16>
      %cst_26 = arith.constant dense<0.000000e+00> : vector<32x128xf32>
      %47 = tpu.matmul %46, %4, %cst_26 {dimension_numbers = #tpu.dot_dimension_numbers<[1], [0], [0], [1], [0, 0, 1, 1], [], []>} : vector<32x128xbf16>, vector<128x128xbf16>, vector<32x128xf32> -> vector<32x128xf32>
      %48 = arith.addf %47, %2 : vector<32x128xf32>
      %cst_27 = arith.constant 0.000000e+00 : f32
      %49 = vector.broadcast %cst_27 : f32 to vector<32x128xf32>
      %50 = arith.maximumf %48, %49 : vector<32x128xf32>
      %51 = arith.truncf %50 : vector<32x128xf32> to vector<32x128xbf16>
      %cst_28 = arith.constant dense<0.000000e+00> : vector<32x128xf32>
      %52 = tpu.matmul %3, %51, %cst_28 {dimension_numbers = #tpu.dot_dimension_numbers<[1], [0], [0], [1], [0, 0, 1, 1], [], []>} : vector<32x32xbf16>, vector<32x128xbf16>, vector<32x128xf32> -> vector<32x128xf32>
      %53 = arith.truncf %52 : vector<32x128xf32> to vector<32x128xbf16>
      %cst_29 = arith.constant dense<0.000000e+00> : vector<32x128xf32>
      %54 = tpu.matmul %53, %4, %cst_29 {dimension_numbers = #tpu.dot_dimension_numbers<[1], [0], [0], [1], [0, 0, 1, 1], [], []>} : vector<32x128xbf16>, vector<128x128xbf16>, vector<32x128xf32> -> vector<32x128xf32>
      %55 = arith.addf %54, %2 : vector<32x128xf32>
      %cst_30 = arith.constant 0.000000e+00 : f32
      %56 = vector.broadcast %cst_30 : f32 to vector<32x128xf32>
      %57 = arith.maximumf %55, %56 : vector<32x128xf32>
      %58 = arith.truncf %57 : vector<32x128xf32> to vector<32x128xbf16>
      %cst_31 = arith.constant dense<0.000000e+00> : vector<32x128xf32>
      %59 = tpu.matmul %3, %58, %cst_31 {dimension_numbers = #tpu.dot_dimension_numbers<[1], [0], [0], [1], [0, 0, 1, 1], [], []>} : vector<32x32xbf16>, vector<32x128xbf16>, vector<32x128xf32> -> vector<32x128xf32>
      %60 = arith.truncf %59 : vector<32x128xf32> to vector<32x128xbf16>
      %cst_32 = arith.constant dense<0.000000e+00> : vector<32x128xf32>
      %61 = tpu.matmul %60, %4, %cst_32 {dimension_numbers = #tpu.dot_dimension_numbers<[1], [0], [0], [1], [0, 0, 1, 1], [], []>} : vector<32x128xbf16>, vector<128x128xbf16>, vector<32x128xf32> -> vector<32x128xf32>
      %62 = arith.addf %61, %2 : vector<32x128xf32>
      %cst_33 = arith.constant 0.000000e+00 : f32
      %63 = vector.broadcast %cst_33 : f32 to vector<32x128xf32>
      %64 = arith.maximumf %62, %63 : vector<32x128xf32>
      %65 = arith.truncf %64 : vector<32x128xf32> to vector<32x128xbf16>
      %cst_34 = arith.constant dense<0.000000e+00> : vector<32x128xf32>
      %66 = tpu.matmul %3, %65, %cst_34 {dimension_numbers = #tpu.dot_dimension_numbers<[1], [0], [0], [1], [0, 0, 1, 1], [], []>} : vector<32x32xbf16>, vector<32x128xbf16>, vector<32x128xf32> -> vector<32x128xf32>
      %67 = arith.truncf %66 : vector<32x128xf32> to vector<32x128xbf16>
      %cst_35 = arith.constant dense<0.000000e+00> : vector<32x128xf32>
      %68 = tpu.matmul %67, %4, %cst_35 {dimension_numbers = #tpu.dot_dimension_numbers<[1], [0], [0], [1], [0, 0, 1, 1], [], []>} : vector<32x128xbf16>, vector<128x128xbf16>, vector<32x128xf32> -> vector<32x128xf32>
      %69 = arith.addf %68, %2 : vector<32x128xf32>
      %cst_36 = arith.constant 0.000000e+00 : f32
      %70 = vector.broadcast %cst_36 : f32 to vector<32x128xf32>
      %71 = arith.maximumf %69, %70 : vector<32x128xf32>
      %72 = arith.truncf %71 : vector<32x128xf32> to vector<32x128xbf16>
      %cst_37 = arith.constant dense<0.000000e+00> : vector<32x128xf32>
      %73 = tpu.matmul %3, %72, %cst_37 {dimension_numbers = #tpu.dot_dimension_numbers<[1], [0], [0], [1], [0, 0, 1, 1], [], []>} : vector<32x32xbf16>, vector<32x128xbf16>, vector<32x128xf32> -> vector<32x128xf32>
      %74 = arith.truncf %73 : vector<32x128xf32> to vector<32x128xbf16>
      %cst_38 = arith.constant dense<0.000000e+00> : vector<32x128xf32>
      %75 = tpu.matmul %74, %4, %cst_38 {dimension_numbers = #tpu.dot_dimension_numbers<[1], [0], [0], [1], [0, 0, 1, 1], [], []>} : vector<32x128xbf16>, vector<128x128xbf16>, vector<32x128xf32> -> vector<32x128xf32>
      %76 = arith.addf %75, %2 : vector<32x128xf32>
      %cst_39 = arith.constant 0.000000e+00 : f32
      %77 = vector.broadcast %cst_39 : f32 to vector<32x128xf32>
      %78 = arith.maximumf %76, %77 : vector<32x128xf32>
      %79 = arith.truncf %78 : vector<32x128xf32> to vector<32x128xbf16>
      %cst_40 = arith.constant dense<0.000000e+00> : vector<32x128xf32>
      %80 = tpu.matmul %3, %79, %cst_40 {dimension_numbers = #tpu.dot_dimension_numbers<[1], [0], [0], [1], [0, 0, 1, 1], [], []>} : vector<32x32xbf16>, vector<32x128xbf16>, vector<32x128xf32> -> vector<32x128xf32>
      %81 = arith.truncf %80 : vector<32x128xf32> to vector<32x128xbf16>
      %cst_41 = arith.constant dense<0.000000e+00> : vector<32x128xf32>
      %82 = tpu.matmul %81, %4, %cst_41 {dimension_numbers = #tpu.dot_dimension_numbers<[1], [0], [0], [1], [0, 0, 1, 1], [], []>} : vector<32x128xbf16>, vector<128x128xbf16>, vector<32x128xf32> -> vector<32x128xf32>
      %83 = arith.addf %82, %2 : vector<32x128xf32>
      %cst_42 = arith.constant 0.000000e+00 : f32
      %84 = vector.broadcast %cst_42 : f32 to vector<32x128xf32>
      %85 = arith.maximumf %83, %84 : vector<32x128xf32>
      %86 = arith.truncf %85 : vector<32x128xf32> to vector<32x128xbf16>
      %cst_43 = arith.constant dense<0.000000e+00> : vector<32x128xf32>
      %87 = tpu.matmul %3, %86, %cst_43 {dimension_numbers = #tpu.dot_dimension_numbers<[1], [0], [0], [1], [0, 0, 1, 1], [], []>} : vector<32x32xbf16>, vector<32x128xbf16>, vector<32x128xf32> -> vector<32x128xf32>
      %88 = arith.truncf %87 : vector<32x128xf32> to vector<32x128xbf16>
      %cst_44 = arith.constant dense<0.000000e+00> : vector<32x128xf32>
      %89 = tpu.matmul %88, %4, %cst_44 {dimension_numbers = #tpu.dot_dimension_numbers<[1], [0], [0], [1], [0, 0, 1, 1], [], []>} : vector<32x128xbf16>, vector<128x128xbf16>, vector<32x128xf32> -> vector<32x128xf32>
      %90 = arith.addf %89, %2 : vector<32x128xf32>
      %cst_45 = arith.constant 0.000000e+00 : f32
      %91 = vector.broadcast %cst_45 : f32 to vector<32x128xf32>
      %92 = arith.maximumf %90, %91 : vector<32x128xf32>
      %93 = arith.truncf %92 : vector<32x128xf32> to vector<32x128xbf16>
      %cst_46 = arith.constant dense<0.000000e+00> : vector<32x128xf32>
      %94 = tpu.matmul %3, %93, %cst_46 {dimension_numbers = #tpu.dot_dimension_numbers<[1], [0], [0], [1], [0, 0, 1, 1], [], []>} : vector<32x32xbf16>, vector<32x128xbf16>, vector<32x128xf32> -> vector<32x128xf32>
      %95 = arith.truncf %94 : vector<32x128xf32> to vector<32x128xbf16>
      %cst_47 = arith.constant dense<0.000000e+00> : vector<32x128xf32>
      %96 = tpu.matmul %95, %4, %cst_47 {dimension_numbers = #tpu.dot_dimension_numbers<[1], [0], [0], [1], [0, 0, 1, 1], [], []>} : vector<32x128xbf16>, vector<128x128xbf16>, vector<32x128xf32> -> vector<32x128xf32>
      %97 = arith.addf %96, %2 : vector<32x128xf32>
      %cst_48 = arith.constant 0.000000e+00 : f32
      %98 = vector.broadcast %cst_48 : f32 to vector<32x128xf32>
      %99 = arith.maximumf %97, %98 : vector<32x128xf32>
      %100 = arith.truncf %99 : vector<32x128xf32> to vector<32x128xbf16>
      %cst_49 = arith.constant dense<0.000000e+00> : vector<32x128xf32>
      %101 = tpu.matmul %3, %100, %cst_49 {dimension_numbers = #tpu.dot_dimension_numbers<[1], [0], [0], [1], [0, 0, 1, 1], [], []>} : vector<32x32xbf16>, vector<32x128xbf16>, vector<32x128xf32> -> vector<32x128xf32>
      %102 = arith.truncf %101 : vector<32x128xf32> to vector<32x128xbf16>
      %cst_50 = arith.constant dense<0.000000e+00> : vector<32x128xf32>
      %103 = tpu.matmul %102, %4, %cst_50 {dimension_numbers = #tpu.dot_dimension_numbers<[1], [0], [0], [1], [0, 0, 1, 1], [], []>} : vector<32x128xbf16>, vector<128x128xbf16>, vector<32x128xf32> -> vector<32x128xf32>
      %104 = arith.addf %103, %2 : vector<32x128xf32>
      %cst_51 = arith.constant 0.000000e+00 : f32
      %105 = vector.broadcast %cst_51 : f32 to vector<32x128xf32>
      %106 = arith.maximumf %104, %105 : vector<32x128xf32>
      %107 = arith.truncf %106 : vector<32x128xf32> to vector<32x128xbf16>
      %cst_52 = arith.constant dense<0.000000e+00> : vector<32x128xf32>
      %108 = tpu.matmul %3, %107, %cst_52 {dimension_numbers = #tpu.dot_dimension_numbers<[1], [0], [0], [1], [0, 0, 1, 1], [], []>} : vector<32x32xbf16>, vector<32x128xbf16>, vector<32x128xf32> -> vector<32x128xf32>
      %109 = arith.truncf %108 : vector<32x128xf32> to vector<32x128xbf16>
      %cst_53 = arith.constant dense<0.000000e+00> : vector<32x128xf32>
      %110 = tpu.matmul %109, %4, %cst_53 {dimension_numbers = #tpu.dot_dimension_numbers<[1], [0], [0], [1], [0, 0, 1, 1], [], []>} : vector<32x128xbf16>, vector<128x128xbf16>, vector<32x128xf32> -> vector<32x128xf32>
      %111 = arith.addf %110, %2 : vector<32x128xf32>
      %cst_54 = arith.constant 0.000000e+00 : f32
      %112 = vector.broadcast %cst_54 : f32 to vector<32x128xf32>
      %113 = arith.maximumf %111, %112 : vector<32x128xf32>
      %114 = arith.truncf %113 : vector<32x128xf32> to vector<32x128xbf16>
      %cst_55 = arith.constant dense<0.000000e+00> : vector<32x128xf32>
      %115 = tpu.matmul %3, %114, %cst_55 {dimension_numbers = #tpu.dot_dimension_numbers<[1], [0], [0], [1], [0, 0, 1, 1], [], []>} : vector<32x32xbf16>, vector<32x128xbf16>, vector<32x128xf32> -> vector<32x128xf32>
      %116 = arith.truncf %115 : vector<32x128xf32> to vector<32x128xbf16>
      %cst_56 = arith.constant dense<0.000000e+00> : vector<32x128xf32>
      %117 = tpu.matmul %116, %4, %cst_56 {dimension_numbers = #tpu.dot_dimension_numbers<[1], [0], [0], [1], [0, 0, 1, 1], [], []>} : vector<32x128xbf16>, vector<128x128xbf16>, vector<32x128xf32> -> vector<32x128xf32>
      %118 = arith.addf %117, %2 : vector<32x128xf32>
      %cst_57 = arith.constant 0.000000e+00 : f32
      %119 = vector.broadcast %cst_57 : f32 to vector<32x128xf32>
      %120 = arith.maximumf %118, %119 : vector<32x128xf32>
      %121 = arith.subf %120, %arg7 : vector<32x128xf32>
      %122 = math.absf %121 : vector<32x128xf32>
      %123 = vector.shape_cast %122 : vector<32x128xf32> to vector<1x32x128xf32>
      %cst_58 = arith.constant dense<0xFF800000> : vector<1xf32>
      %124 = vector.multi_reduction <maximumf>, %123, %cst_58 [1, 2] : vector<1x32x128xf32> to vector<1xf32>
      %125 = vector.shape_cast %124 : vector<1xf32> to vector<1x1x1xf32>
      %126 = vector.extract %125[0, 0, 0] : f32 from vector<1x1x1xf32>
      %c16_i32 = arith.constant 16 : i32
      %127 = arith.addi %arg5, %c16_i32 : i32
      scf.yield %127, %126, %120 : i32, f32, vector<32x128xf32>
    }
    %cst_7 = arith.constant 0x7F800000 : f32
    %7:3 = scf.while (%arg5 = %6#0, %arg6 = %cst_7, %arg7 = %6#2) : (i32, f32, vector<32x128xf32>) -> (i32, f32, vector<32x128xf32>) {
      %c300_i32 = arith.constant 300 : i32
      %9 = arith.cmpi slt, %arg5, %c300_i32 : i32
      %cst_10 = arith.constant 3.000000e-06 : f32
      %10 = arith.cmpf oge, %arg6, %cst_10 : f32
      %11 = arith.andi %9, %10 : i1
      scf.condition(%11) %arg5, %arg6, %arg7 : i32, f32, vector<32x128xf32>
    } do {
    ^bb0(%arg5: i32, %arg6: f32, %arg7: vector<32x128xf32>):
      %cst_10 = arith.constant dense<0.000000e+00> : vector<32x128xf32>
      %9 = tpu.matmul %0, %arg7, %cst_10 {dimension_numbers = #tpu.dot_dimension_numbers<[1], [0], [0], [1], [0, 0, 1, 1], [], []>} : vector<32x32xf32>, vector<32x128xf32>, vector<32x128xf32> -> vector<32x128xf32>
      %cst_11 = arith.constant dense<0.000000e+00> : vector<32x128xf32>
      %10 = tpu.matmul %9, %1, %cst_11 {dimension_numbers = #tpu.dot_dimension_numbers<[1], [0], [0], [1], [0, 0, 1, 1], [], []>} : vector<32x128xf32>, vector<128x128xf32>, vector<32x128xf32> -> vector<32x128xf32>
      %11 = arith.addf %10, %2 : vector<32x128xf32>
      %cst_12 = arith.constant 0.000000e+00 : f32
      %12 = vector.broadcast %cst_12 : f32 to vector<32x128xf32>
      %13 = arith.maximumf %11, %12 : vector<32x128xf32>
      %cst_13 = arith.constant dense<0.000000e+00> : vector<32x128xf32>
      %14 = tpu.matmul %0, %13, %cst_13 {dimension_numbers = #tpu.dot_dimension_numbers<[1], [0], [0], [1], [0, 0, 1, 1], [], []>} : vector<32x32xf32>, vector<32x128xf32>, vector<32x128xf32> -> vector<32x128xf32>
      %cst_14 = arith.constant dense<0.000000e+00> : vector<32x128xf32>
      %15 = tpu.matmul %14, %1, %cst_14 {dimension_numbers = #tpu.dot_dimension_numbers<[1], [0], [0], [1], [0, 0, 1, 1], [], []>} : vector<32x128xf32>, vector<128x128xf32>, vector<32x128xf32> -> vector<32x128xf32>
      %16 = arith.addf %15, %2 : vector<32x128xf32>
      %cst_15 = arith.constant 0.000000e+00 : f32
      %17 = vector.broadcast %cst_15 : f32 to vector<32x128xf32>
      %18 = arith.maximumf %16, %17 : vector<32x128xf32>
      %cst_16 = arith.constant dense<0.000000e+00> : vector<32x128xf32>
      %19 = tpu.matmul %0, %18, %cst_16 {dimension_numbers = #tpu.dot_dimension_numbers<[1], [0], [0], [1], [0, 0, 1, 1], [], []>} : vector<32x32xf32>, vector<32x128xf32>, vector<32x128xf32> -> vector<32x128xf32>
      %cst_17 = arith.constant dense<0.000000e+00> : vector<32x128xf32>
      %20 = tpu.matmul %19, %1, %cst_17 {dimension_numbers = #tpu.dot_dimension_numbers<[1], [0], [0], [1], [0, 0, 1, 1], [], []>} : vector<32x128xf32>, vector<128x128xf32>, vector<32x128xf32> -> vector<32x128xf32>
      %21 = arith.addf %20, %2 : vector<32x128xf32>
      %cst_18 = arith.constant 0.000000e+00 : f32
      %22 = vector.broadcast %cst_18 : f32 to vector<32x128xf32>
      %23 = arith.maximumf %21, %22 : vector<32x128xf32>
      %cst_19 = arith.constant dense<0.000000e+00> : vector<32x128xf32>
      %24 = tpu.matmul %0, %23, %cst_19 {dimension_numbers = #tpu.dot_dimension_numbers<[1], [0], [0], [1], [0, 0, 1, 1], [], []>} : vector<32x32xf32>, vector<32x128xf32>, vector<32x128xf32> -> vector<32x128xf32>
      %cst_20 = arith.constant dense<0.000000e+00> : vector<32x128xf32>
      %25 = tpu.matmul %24, %1, %cst_20 {dimension_numbers = #tpu.dot_dimension_numbers<[1], [0], [0], [1], [0, 0, 1, 1], [], []>} : vector<32x128xf32>, vector<128x128xf32>, vector<32x128xf32> -> vector<32x128xf32>
      %26 = arith.addf %25, %2 : vector<32x128xf32>
      %cst_21 = arith.constant 0.000000e+00 : f32
      %27 = vector.broadcast %cst_21 : f32 to vector<32x128xf32>
      %28 = arith.maximumf %26, %27 : vector<32x128xf32>
      %cst_22 = arith.constant dense<0.000000e+00> : vector<32x128xf32>
      %29 = tpu.matmul %0, %28, %cst_22 {dimension_numbers = #tpu.dot_dimension_numbers<[1], [0], [0], [1], [0, 0, 1, 1], [], []>} : vector<32x32xf32>, vector<32x128xf32>, vector<32x128xf32> -> vector<32x128xf32>
      %cst_23 = arith.constant dense<0.000000e+00> : vector<32x128xf32>
      %30 = tpu.matmul %29, %1, %cst_23 {dimension_numbers = #tpu.dot_dimension_numbers<[1], [0], [0], [1], [0, 0, 1, 1], [], []>} : vector<32x128xf32>, vector<128x128xf32>, vector<32x128xf32> -> vector<32x128xf32>
      %31 = arith.addf %30, %2 : vector<32x128xf32>
      %cst_24 = arith.constant 0.000000e+00 : f32
      %32 = vector.broadcast %cst_24 : f32 to vector<32x128xf32>
      %33 = arith.maximumf %31, %32 : vector<32x128xf32>
      %cst_25 = arith.constant dense<0.000000e+00> : vector<32x128xf32>
      %34 = tpu.matmul %0, %33, %cst_25 {dimension_numbers = #tpu.dot_dimension_numbers<[1], [0], [0], [1], [0, 0, 1, 1], [], []>} : vector<32x32xf32>, vector<32x128xf32>, vector<32x128xf32> -> vector<32x128xf32>
      %cst_26 = arith.constant dense<0.000000e+00> : vector<32x128xf32>
      %35 = tpu.matmul %34, %1, %cst_26 {dimension_numbers = #tpu.dot_dimension_numbers<[1], [0], [0], [1], [0, 0, 1, 1], [], []>} : vector<32x128xf32>, vector<128x128xf32>, vector<32x128xf32> -> vector<32x128xf32>
      %36 = arith.addf %35, %2 : vector<32x128xf32>
      %cst_27 = arith.constant 0.000000e+00 : f32
      %37 = vector.broadcast %cst_27 : f32 to vector<32x128xf32>
      %38 = arith.maximumf %36, %37 : vector<32x128xf32>
      %cst_28 = arith.constant dense<0.000000e+00> : vector<32x128xf32>
      %39 = tpu.matmul %0, %38, %cst_28 {dimension_numbers = #tpu.dot_dimension_numbers<[1], [0], [0], [1], [0, 0, 1, 1], [], []>} : vector<32x32xf32>, vector<32x128xf32>, vector<32x128xf32> -> vector<32x128xf32>
      %cst_29 = arith.constant dense<0.000000e+00> : vector<32x128xf32>
      %40 = tpu.matmul %39, %1, %cst_29 {dimension_numbers = #tpu.dot_dimension_numbers<[1], [0], [0], [1], [0, 0, 1, 1], [], []>} : vector<32x128xf32>, vector<128x128xf32>, vector<32x128xf32> -> vector<32x128xf32>
      %41 = arith.addf %40, %2 : vector<32x128xf32>
      %cst_30 = arith.constant 0.000000e+00 : f32
      %42 = vector.broadcast %cst_30 : f32 to vector<32x128xf32>
      %43 = arith.maximumf %41, %42 : vector<32x128xf32>
      %cst_31 = arith.constant dense<0.000000e+00> : vector<32x128xf32>
      %44 = tpu.matmul %0, %43, %cst_31 {dimension_numbers = #tpu.dot_dimension_numbers<[1], [0], [0], [1], [0, 0, 1, 1], [], []>} : vector<32x32xf32>, vector<32x128xf32>, vector<32x128xf32> -> vector<32x128xf32>
      %cst_32 = arith.constant dense<0.000000e+00> : vector<32x128xf32>
      %45 = tpu.matmul %44, %1, %cst_32 {dimension_numbers = #tpu.dot_dimension_numbers<[1], [0], [0], [1], [0, 0, 1, 1], [], []>} : vector<32x128xf32>, vector<128x128xf32>, vector<32x128xf32> -> vector<32x128xf32>
      %46 = arith.addf %45, %2 : vector<32x128xf32>
      %cst_33 = arith.constant 0.000000e+00 : f32
      %47 = vector.broadcast %cst_33 : f32 to vector<32x128xf32>
      %48 = arith.maximumf %46, %47 : vector<32x128xf32>
      %cst_34 = arith.constant dense<0.000000e+00> : vector<32x128xf32>
      %49 = tpu.matmul %0, %48, %cst_34 {dimension_numbers = #tpu.dot_dimension_numbers<[1], [0], [0], [1], [0, 0, 1, 1], [], []>} : vector<32x32xf32>, vector<32x128xf32>, vector<32x128xf32> -> vector<32x128xf32>
      %cst_35 = arith.constant dense<0.000000e+00> : vector<32x128xf32>
      %50 = tpu.matmul %49, %1, %cst_35 {dimension_numbers = #tpu.dot_dimension_numbers<[1], [0], [0], [1], [0, 0, 1, 1], [], []>} : vector<32x128xf32>, vector<128x128xf32>, vector<32x128xf32> -> vector<32x128xf32>
      %51 = arith.addf %50, %2 : vector<32x128xf32>
      %cst_36 = arith.constant 0.000000e+00 : f32
      %52 = vector.broadcast %cst_36 : f32 to vector<32x128xf32>
      %53 = arith.maximumf %51, %52 : vector<32x128xf32>
      %cst_37 = arith.constant dense<0.000000e+00> : vector<32x128xf32>
      %54 = tpu.matmul %0, %53, %cst_37 {dimension_numbers = #tpu.dot_dimension_numbers<[1], [0], [0], [1], [0, 0, 1, 1], [], []>} : vector<32x32xf32>, vector<32x128xf32>, vector<32x128xf32> -> vector<32x128xf32>
      %cst_38 = arith.constant dense<0.000000e+00> : vector<32x128xf32>
      %55 = tpu.matmul %54, %1, %cst_38 {dimension_numbers = #tpu.dot_dimension_numbers<[1], [0], [0], [1], [0, 0, 1, 1], [], []>} : vector<32x128xf32>, vector<128x128xf32>, vector<32x128xf32> -> vector<32x128xf32>
      %56 = arith.addf %55, %2 : vector<32x128xf32>
      %cst_39 = arith.constant 0.000000e+00 : f32
      %57 = vector.broadcast %cst_39 : f32 to vector<32x128xf32>
      %58 = arith.maximumf %56, %57 : vector<32x128xf32>
      %cst_40 = arith.constant dense<0.000000e+00> : vector<32x128xf32>
      %59 = tpu.matmul %0, %58, %cst_40 {dimension_numbers = #tpu.dot_dimension_numbers<[1], [0], [0], [1], [0, 0, 1, 1], [], []>} : vector<32x32xf32>, vector<32x128xf32>, vector<32x128xf32> -> vector<32x128xf32>
      %cst_41 = arith.constant dense<0.000000e+00> : vector<32x128xf32>
      %60 = tpu.matmul %59, %1, %cst_41 {dimension_numbers = #tpu.dot_dimension_numbers<[1], [0], [0], [1], [0, 0, 1, 1], [], []>} : vector<32x128xf32>, vector<128x128xf32>, vector<32x128xf32> -> vector<32x128xf32>
      %61 = arith.addf %60, %2 : vector<32x128xf32>
      %cst_42 = arith.constant 0.000000e+00 : f32
      %62 = vector.broadcast %cst_42 : f32 to vector<32x128xf32>
      %63 = arith.maximumf %61, %62 : vector<32x128xf32>
      %cst_43 = arith.constant dense<0.000000e+00> : vector<32x128xf32>
      %64 = tpu.matmul %0, %63, %cst_43 {dimension_numbers = #tpu.dot_dimension_numbers<[1], [0], [0], [1], [0, 0, 1, 1], [], []>} : vector<32x32xf32>, vector<32x128xf32>, vector<32x128xf32> -> vector<32x128xf32>
      %cst_44 = arith.constant dense<0.000000e+00> : vector<32x128xf32>
      %65 = tpu.matmul %64, %1, %cst_44 {dimension_numbers = #tpu.dot_dimension_numbers<[1], [0], [0], [1], [0, 0, 1, 1], [], []>} : vector<32x128xf32>, vector<128x128xf32>, vector<32x128xf32> -> vector<32x128xf32>
      %66 = arith.addf %65, %2 : vector<32x128xf32>
      %cst_45 = arith.constant 0.000000e+00 : f32
      %67 = vector.broadcast %cst_45 : f32 to vector<32x128xf32>
      %68 = arith.maximumf %66, %67 : vector<32x128xf32>
      %cst_46 = arith.constant dense<0.000000e+00> : vector<32x128xf32>
      %69 = tpu.matmul %0, %68, %cst_46 {dimension_numbers = #tpu.dot_dimension_numbers<[1], [0], [0], [1], [0, 0, 1, 1], [], []>} : vector<32x32xf32>, vector<32x128xf32>, vector<32x128xf32> -> vector<32x128xf32>
      %cst_47 = arith.constant dense<0.000000e+00> : vector<32x128xf32>
      %70 = tpu.matmul %69, %1, %cst_47 {dimension_numbers = #tpu.dot_dimension_numbers<[1], [0], [0], [1], [0, 0, 1, 1], [], []>} : vector<32x128xf32>, vector<128x128xf32>, vector<32x128xf32> -> vector<32x128xf32>
      %71 = arith.addf %70, %2 : vector<32x128xf32>
      %cst_48 = arith.constant 0.000000e+00 : f32
      %72 = vector.broadcast %cst_48 : f32 to vector<32x128xf32>
      %73 = arith.maximumf %71, %72 : vector<32x128xf32>
      %cst_49 = arith.constant dense<0.000000e+00> : vector<32x128xf32>
      %74 = tpu.matmul %0, %73, %cst_49 {dimension_numbers = #tpu.dot_dimension_numbers<[1], [0], [0], [1], [0, 0, 1, 1], [], []>} : vector<32x32xf32>, vector<32x128xf32>, vector<32x128xf32> -> vector<32x128xf32>
      %cst_50 = arith.constant dense<0.000000e+00> : vector<32x128xf32>
      %75 = tpu.matmul %74, %1, %cst_50 {dimension_numbers = #tpu.dot_dimension_numbers<[1], [0], [0], [1], [0, 0, 1, 1], [], []>} : vector<32x128xf32>, vector<128x128xf32>, vector<32x128xf32> -> vector<32x128xf32>
      %76 = arith.addf %75, %2 : vector<32x128xf32>
      %cst_51 = arith.constant 0.000000e+00 : f32
      %77 = vector.broadcast %cst_51 : f32 to vector<32x128xf32>
      %78 = arith.maximumf %76, %77 : vector<32x128xf32>
      %cst_52 = arith.constant dense<0.000000e+00> : vector<32x128xf32>
      %79 = tpu.matmul %0, %78, %cst_52 {dimension_numbers = #tpu.dot_dimension_numbers<[1], [0], [0], [1], [0, 0, 1, 1], [], []>} : vector<32x32xf32>, vector<32x128xf32>, vector<32x128xf32> -> vector<32x128xf32>
      %cst_53 = arith.constant dense<0.000000e+00> : vector<32x128xf32>
      %80 = tpu.matmul %79, %1, %cst_53 {dimension_numbers = #tpu.dot_dimension_numbers<[1], [0], [0], [1], [0, 0, 1, 1], [], []>} : vector<32x128xf32>, vector<128x128xf32>, vector<32x128xf32> -> vector<32x128xf32>
      %81 = arith.addf %80, %2 : vector<32x128xf32>
      %cst_54 = arith.constant 0.000000e+00 : f32
      %82 = vector.broadcast %cst_54 : f32 to vector<32x128xf32>
      %83 = arith.maximumf %81, %82 : vector<32x128xf32>
      %cst_55 = arith.constant dense<0.000000e+00> : vector<32x128xf32>
      %84 = tpu.matmul %0, %83, %cst_55 {dimension_numbers = #tpu.dot_dimension_numbers<[1], [0], [0], [1], [0, 0, 1, 1], [], []>} : vector<32x32xf32>, vector<32x128xf32>, vector<32x128xf32> -> vector<32x128xf32>
      %cst_56 = arith.constant dense<0.000000e+00> : vector<32x128xf32>
      %85 = tpu.matmul %84, %1, %cst_56 {dimension_numbers = #tpu.dot_dimension_numbers<[1], [0], [0], [1], [0, 0, 1, 1], [], []>} : vector<32x128xf32>, vector<128x128xf32>, vector<32x128xf32> -> vector<32x128xf32>
      %86 = arith.addf %85, %2 : vector<32x128xf32>
      %cst_57 = arith.constant 0.000000e+00 : f32
      %87 = vector.broadcast %cst_57 : f32 to vector<32x128xf32>
      %88 = arith.maximumf %86, %87 : vector<32x128xf32>
      %89 = arith.subf %88, %arg7 : vector<32x128xf32>
      %90 = math.absf %89 : vector<32x128xf32>
      %91 = vector.shape_cast %90 : vector<32x128xf32> to vector<1x32x128xf32>
      %cst_58 = arith.constant dense<0xFF800000> : vector<1xf32>
      %92 = vector.multi_reduction <maximumf>, %91, %cst_58 [1, 2] : vector<1x32x128xf32> to vector<1xf32>
      %93 = vector.shape_cast %92 : vector<1xf32> to vector<1x1x1xf32>
      %94 = vector.extract %93[0, 0, 0] : f32 from vector<1x1x1xf32>
      %c16_i32 = arith.constant 16 : i32
      %95 = arith.addi %arg5, %c16_i32 : i32
      scf.yield %95, %94, %88 : i32, f32, vector<32x128xf32>
    }
    %c0_8 = arith.constant 0 : index
    %c0_9 = arith.constant 0 : index
    %8 = vector.load %arg4[%c0_8, %c0_9] : memref<32x128xf32, #tpu.memory_space<vmem>>, vector<32x128xf32>
    tpu.vector_store %arg4[%c0_8, %c0_9], %7#2 {strides = array<i32>} : memref<32x128xf32, #tpu.memory_space<vmem>>, vector<32x128xf32>,
    return
  }
}

</mosaic_0001>

<bundles_post_ra>
// kernel: tpu_custom_call.1
= control target key start
LH: loop header
LB: loop body
LE: loop exit
PB: predicated region body
PF: predicated region fallthrough
CT: control target
= control target key end

     0   :  { %9 = vsyncpa [#allocation3], 0  ;;  %s8893_s0 = inlined_call_operand.hbm [shape: f32[32,32], index: 0, kind: input, shape index: {}]   ;;  %s8894_s1 = inlined_call_operand.hbm [shape: f32[32,128], index: 1, kind: input, shape index: {}]   ;;  %s8895_s2 = inlined_call_operand.hbm [shape: f32[128,128], index: 2, kind: input, shape index: {}]   ;;  %s8896_s3 = inlined_call_operand.hbm [shape: f32[32,128], index: 3, kind: input, shape index: {}]   ;;  %s8897_s4 = inlined_call_operand.hbm [shape: f32[32,128], index: 4, kind: output, shape index: {}]  }
   0x1   :  { %10 = vsyncpa [#allocation6], 0 }
   0x2   :  { %11 = vsyncpa [#allocation9], 0 }
   0x3   :  { %12 = vsyncpa [#allocation4], 0  ;;  %s7792_s15 = smov [#allocation5]   ;;  %s7793_s17 = smov [#allocation2]  }
   0x4   :  { %s30_s16 = sshll.u32 %s7792_s15, 4  ;;  %s18_s18 = sshll.u32 %s7793_s17, 4  ;;  %s31_s16 = int_to_ptr.vmem [resolvable:$true] %s30_s16  ;;  %s7824_s18 = int_to_ptr.vmem [resolvable:$true] %s18_s18 }
   0x5   :  { %s7556_s21 = scalar_lea.hbm %s8894_s1, 512 }
   0x6   :  { %p7557_p0 = scmp.ne.s32.totalorder %s8894_s1, %s7556_s21  ;;  %p7560_p1 = scmp.lt.u32.totalorder %s7556_s21, %s8894_s1 }
   0x8   :  { %p7562_p2 = pnand %p7560_p1, %p7557_p0 }
   0xa   :  { %7565 = shalt.err (!%p7562_p2)
}
   0xb   :  { %s7566_s26 = scalar_lea.vmem %s31_s16, 512  ;;  %p7571_p4 = scmp.lt.s32.totalorder %s31_s16, %s31_s16 }
   0xc   :  { %p7567_p3 = scmp.ne.s32.totalorder %s31_s16, %s7566_s26  ;;  %p7572_p5 = scmp.lt.s32.totalorder %s7566_s26, %s7566_s26 }
   0xe   :  { %p7573_p6 = por %p7572_p5, %p7571_p4 }
  0x10   :  { %p7574_p7 = pnand %p7573_p6, %p7567_p3 }
  0x12   :  { %7577 = shalt.err (!%p7574_p7)
}
  0x13   :  { %s7794_s27 = smov 128   ;;  %s7795_s28 = smov 8  }
  0x14   :  { %36 = dma.hbm_to_vmem [thread:$0]  %s8894_s1, 512, %s31_s16, [#allocation6], %s7794_s27, %s7794_s27, %s7795_s28  }
  0x15   :  { %s7578_s7 = scalar_lea.hbm %s8893_s0, 512 }
  0x16   :  { %p7579_p8 = scmp.ne.s32.totalorder %s8893_s0, %s7578_s7  ;;  %p7582_p9 = scmp.lt.u32.totalorder %s7578_s7, %s8893_s0 }
  0x18   :  { %p7584_p10 = pnand %p7582_p9, %p7579_p8 }
  0x1a   :  { %7587 = shalt.err (!%p7584_p10)
}
  0x1b   :  { %s7588_s12 = scalar_lea.vmem %s7824_s18, 512  ;;  %p7593_p12 = scmp.lt.s32.totalorder %s7824_s18, %s7824_s18 }
  0x1c   :  { %p7589_p11 = scmp.ne.s32.totalorder %s7824_s18, %s7588_s12  ;;  %p7594_p13 = scmp.lt.s32.totalorder %s7588_s12, %s7588_s12 }
  0x1e   :  { %p7595_p0 = por %p7594_p13, %p7593_p12 }
  0x20   :  { %p7596_p1 = pnand %p7595_p0, %p7589_p11 }
  0x22   :  { %7599 = shalt.err (!%p7596_p1)
}
  0x23   :  { %24 = dma.hbm_to_vmem [thread:$0]  %s8893_s0, 512, %s7824_s18, [#allocation3], %s7794_s27, %s7794_s27, %s7795_s28  }
  0x24   :  { %s7796_s14 = smov [#allocation7]   ;;  %s7797_s16 = smov [#allocation8]  }
  0x25   :  { %s42_s15 = sshll.u32 %s7796_s14, 4  ;;  %s54_s17 = sshll.u32 %s7797_s16, 4  ;;  %s43_s15 = int_to_ptr.vmem [resolvable:$true] %s42_s15  ;;  %s7861_s17 = int_to_ptr.vmem [resolvable:$true] %s54_s17 }
  0x26   :  { %s7600_s21 = scalar_lea.hbm %s8895_s2, 2048 }
  0x27   :  { %p7601_p2 = scmp.ne.s32.totalorder %s8895_s2, %s7600_s21  ;;  %p7604_p3 = scmp.lt.u32.totalorder %s7600_s21, %s8895_s2 }
  0x29   :  { %p7606_p4 = pnand %p7604_p3, %p7601_p2 }
  0x2b   :  { %7609 = shalt.err (!%p7606_p4)
}
  0x2c   :  { %s7610_s0 = scalar_lea.vmem %s43_s15, 2048  ;;  %p7615_p6 = scmp.lt.s32.totalorder %s43_s15, %s43_s15 }
  0x2d   :  { %p7611_p5 = scmp.ne.s32.totalorder %s43_s15, %s7610_s0  ;;  %p7616_p7 = scmp.lt.s32.totalorder %s7610_s0, %s7610_s0 }
  0x2f   :  { %p7617_p8 = por %p7616_p7, %p7615_p6 }
  0x31   :  { %p7618_p9 = pnand %p7617_p8, %p7611_p5 }
  0x33   :  { %7621 = shalt.err (!%p7618_p9)
}
  0x34   :  { %48 = dma.hbm_to_vmem [thread:$0]  %s8895_s2, 2048, %s43_s15, [#allocation6], %s7794_s27, %s7794_s27, %s7795_s28  }
  0x35   :  { %s7622_s5 = scalar_lea.hbm %s8896_s3, 512 }
  0x36   :  { %p7623_p10 = scmp.ne.s32.totalorder %s8896_s3, %s7622_s5  ;;  %p7626_p11 = scmp.lt.u32.totalorder %s7622_s5, %s8896_s3 }
  0x38   :  { %p7628_p12 = pnand %p7626_p11, %p7623_p10 }
  0x3a   :  { %7631 = shalt.err (!%p7628_p12)
}
  0x3b   :  { %s7632_s10 = scalar_lea.vmem %s7861_s17, 512  ;;  %p7637_p0 = scmp.lt.s32.totalorder %s7861_s17, %s7861_s17 }
  0x3c   :  { %p7633_p13 = scmp.ne.s32.totalorder %s7861_s17, %s7632_s10  ;;  %p7638_p1 = scmp.lt.s32.totalorder %s7632_s10, %s7632_s10 }
  0x3e   :  { %p7639_p2 = por %p7638_p1, %p7637_p0 }
  0x40   :  { %p7640_p3 = pnand %p7639_p2, %p7633_p13 }
  0x42   :  { %7643 = shalt.err (!%p7640_p3)
}
  0x43   :  { %60 = dma.hbm_to_vmem [thread:$0]  %s8896_s3, 512, %s7861_s17, [#allocation9], %s7794_s27, %s7794_s27, %s7795_s28  }
  0x44   :  { %7722 = dma.done.wait [#allocation3], 512  }
  0x45   :  { %7723 = vsyncadd [#allocation3], 4294966784 }
  0x46   :  { %7724 = dma.done.wait [#allocation6], 2560  }
  0x47   :  { %7725 = vsyncadd [#allocation6], 4294964736 }
  0x48   :  { %7726 = dma.done.wait [#allocation9], 512  }
  0x49   :  { %7727 = vsyncadd [#allocation9], 4294966784  ;;  %v7898_v0 = vld [vmem:[#allocation2] sm:$0xff]  ;;  %v7900_v1 = vld [vmem:[#allocation2 + $0x8] sm:$0xff]  ;;  %s7946_s3 = smov 0  }
  0x4a   :  { %v7902_v2 = vld [vmem:[#allocation2 + $0x10] sm:$0xff]  ;;  %v7904_v3 = vld [vmem:[#allocation2 + $0x18] sm:$0xff]  ;;  %v78_v4 = vld [vmem:[#allocation7] sm:$0xff]  ;;  %v7908_v6 = vpack.c.bf16 %v7900_v1, %v7898_v0 }
  0x4b   :  { %v79_v5 = vld [vmem:[#allocation7 + $0x8] sm:$0xff]  ;;  %v80_v7 = vld [vmem:[#allocation7 + $0x10] sm:$0xff]  ;;  %v81_v8 = vld [vmem:[#allocation7 + $0x18] sm:$0xff]  ;;  %v7912_v10 = vpack.c.bf16 %v7904_v3, %v7902_v2 }
  0x4c   :  { %v82_v9 = vld [vmem:[#allocation7 + $0x20] sm:$0xff]  ;;  %v7914_v11 = vpack.c.bf16 %v79_v5, %v78_v4  ;;  %v83_v12 = vld [vmem:[#allocation7 + $0x28] sm:$0xff]  ;;  %v84_v13 = vld [vmem:[#allocation7 + $0x30] sm:$0xff]  ;;  %v7916_v15 = vpack.c.bf16 %v81_v8, %v80_v7 }
  0x4d   :  { %v85_v14 = vld [vmem:[#allocation7 + $0x38] sm:$0xff]  ;;  %v86_v16 = vld [vmem:[#allocation7 + $0x40] sm:$0xff]  ;;  %v87_v17 = vld [vmem:[#allocation7 + $0x48] sm:$0xff]  ;;  %v7918_v19 = vpack.c.bf16 %v83_v12, %v82_v9 }
  0x4e   :  { %v88_v18 = vld [vmem:[#allocation7 + $0x50] sm:$0xff]  ;;  %v7920_v20 = vpack.c.bf16 %v85_v14, %v84_v13  ;;  %v89_v21 = vld [vmem:[#allocation7 + $0x58] sm:$0xff]  ;;  %v90_v22 = vld [vmem:[#allocation7 + $0x60] sm:$0xff]  ;;  %v7922_v24 = vpack.c.bf16 %v87_v17, %v86_v16 }
  0x4f   :  { %v91_v23 = vld [vmem:[#allocation7 + $0x68] sm:$0xff]  ;;  %v92_v25 = vld [vmem:[#allocation7 + $0x70] sm:$0xff]  ;;  %v93_v26 = vld [vmem:[#allocation7 + $0x78] sm:$0xff]  ;;  %v7926_v28 = vpack.c.bf16 %v89_v21, %v88_v18 }
  0x50   :  { %v7924_v27 = vld [vmem:[#allocation8] sm:$0xff]  ;;  %v7928_v29 = vpack.c.bf16 %v91_v23, %v90_v22  ;;  %v7930_v30 = vld [vmem:[#allocation8 + $0x8] sm:$0xff]  ;;  %v7932_v31 = vld [vmem:[#allocation8 + $0x10] sm:$0xff]  ;;  %v7936_v33 = vpack.c.bf16 %v93_v26, %v92_v25 }
  0x51   :  { %v7934_v32 = vld [vmem:[#allocation8 + $0x18] sm:$0xff]  ;;  %v108_v34 = vld [vmem:[#allocation5] sm:$0xff]   ;;  %v109_v35 = vld [vmem:[#allocation5 + $0x8] sm:$0xff]  }
  0x52   :  { %v110_v36 = vld [vmem:[#allocation5 + $0x10] sm:$0xff]   ;;  %v111_v37 = vld [vmem:[#allocation5 + $0x18] sm:$0xff]  }
  0x53 LB: > { %v125_v38 = vpack.c.bf16 %v7746_v35, %v7750_v34  ;;  %v126_v39 = vpack.c.bf16 %v7738_v37, %v7742_v36  ;;  %vm127_vm0 = vcmask 261120   ;;  %s1848_s12 = sadd.s32 16, %s7754_s3   ;;  %s7754_s3 = sphi %s7946_s3, %s8902_s3   ;;  %v7750_v34 = vphi %v108_v34, %v8901_v34   ;;  %v7746_v35 = vphi %v109_v35, %v8900_v35   ;;  %v7742_v36 = vphi %v110_v36, %v8899_v36   ;;  %v7738_v37 = vphi %v111_v37, %v8898_v37  }
  0x54   : > { %5517 = vmatprep.mubr.msk.bf16.mxu1 %vm127_vm0, %v7908_v6  ;;  %5545 = vmatprep.mubr.msk.bf16.mxu0 %vm127_vm0, %v7908_v6  ;;  %p119_p4 = scmp.lt.s32.totalorder %s1848_s12, 236  ;;  %s8902_s3 = smov %s1848_s12 }
  0x55   : > { %5513 = vmatprep.subr.bf16.mxu1 %v125_v38 }
  0x56   : > { %5514 = vmatpush3.bf16.msra.mxu1 %v125_v38 }
  0x57   : > { %5515 = vmatprep.subr.bf16.mxu1 %v126_v39 }
  0x5a   : > { %5516 = vmatpush3.bf16.msra.mxu1 %v126_v39 }
  0x5b   : > { %5521 = vmatprep.subr.bf16.mxu1 %v7914_v11 }
  0x5d   : > { %5518 = vmatmul.mubr.msk.bf16.vlgmr.msra.gmra.mrb[0].mxu1 %vm127_vm0, %v7912_v10 }
  0x5e   : > { %5522 = vmatpush3.bf16.msra.mxu1 %v7914_v11 }
  0x5f   : > { %5523 = vmatprep.subr.bf16.mxu1 %v7916_v15 }
  0x62   : > { %5524 = vmatpush3.bf16.msra.mxu1 %v7916_v15 }
  0x63   : > { %5525 = vmatprep.subr.bf16.mxu1 %v7918_v19 }
  0x66   : > { %5526 = vmatpush3.bf16.msra.mxu1 %v7918_v19 }
  0x67   : > { %5527 = vmatprep.subr.bf16.mxu1 %v7920_v20 }
  0x6a   : > { %5528 = vmatpush3.bf16.msra.mxu1 %v7920_v20 }
  0x6b   : > { %5529 = vmatprep.subr.bf16.mxu1 %v7922_v24 }
  0x6e   : > { %5530 = vmatpush3.bf16.msra.mxu1 %v7922_v24 }
  0x6f   : > { %5531 = vmatprep.subr.bf16.mxu1 %v7926_v28 }
  0x72   : > { %5532 = vmatpush3.bf16.msra.mxu1 %v7926_v28 }
  0x73   : > { %5533 = vmatprep.subr.bf16.mxu1 %v7928_v29 }
  0x76   : > { %5534 = vmatpush3.bf16.msra.mxu1 %v7928_v29 }
  0x77   : > { %5535 = vmatprep.subr.bf16.mxu1 %v7936_v33 }
  0x7a   : > { %5536 = vmatpush3.bf16.msra.mxu1 %v7936_v33 }
 0x130   : > { %v5519_v40 = vpop.f32.mrb[0].mxu1 }
 0x131   : > { %v168_v41 = vpop.f32.mrb[1].mxu1 }
 0x132   : > { %v5520_v42 = vpop.f32.mrb[2].mxu1 }
 0x133   : > { %v184_v43 = vpack.c.bf16 %v5520_v42, %v5519_v40  ;;  %v171_v44 = vpop.f32.mrb[3].mxu1 }
 0x134   : > { %v183_v45 = vpack.c.bf16 %v171_v44, %v168_v41 }
 0x136   : > { %5537 = vmatprep.mubr.bf16.mxu1 %v183_v45 }
 0x137   : > { %5538 = vmatmul.mubr.bf16.vlgmr.msra.gmra.mrb[4].mxu1 %v184_v43 }
 0x138   : > { %5573 = vmatprep.mubr.msk.bf16.mxu1 %vm127_vm0, %v7908_v6 }
 0x20a   : > { %v5539_v46 = vpop.f32.mrb[4].mxu1 }
 0x20b   : > { %v228_v47 = vadd.f32 %v5539_v46, %v7932_v31  ;;  %v219_v48 = vpop.f32.mrb[5].mxu1 }
 0x20c   : > { %v220_v49 = vadd.f32 %v219_v48, %v7924_v27  ;;  %v5540_v50 = vpop.f32.mrb[6].mxu1 }
 0x20d   : > { %v231_v51 = vadd.f32 %v5540_v50, %v7934_v32  ;;  %v222_v52 = vpop.f32.mrb[7].mxu1  ;;  %v236_v54 = vmax.f32 %v228_v47, 0.0 }
 0x20e   : > { %v223_v53 = vadd.f32 %v222_v52, %v7930_v30  ;;  %v234_v56 = vmax.f32 %v220_v49, 0.0 }
 0x20f   : > { %v237_v55 = vmax.f32 %v231_v51, 0.0 }
 0x210   : > { %v235_v57 = vmax.f32 %v223_v53, 0.0 }
 0x211   : > { %v239_v58 = vpack.c.bf16 %v237_v55, %v236_v54 }
 0x212   : > { %v238_v59 = vpack.c.bf16 %v235_v57, %v234_v56 }
 0x214   : > { %5541 = vmatprep.subr.bf16.mxu0 %v238_v59 }
 0x215   : > { %5542 = vmatpush3.bf16.msra.mxu0 %v238_v59 }
 0x216   : > { %5543 = vmatprep.subr.bf16.mxu0 %v239_v58 }
 0x219   : > { %5544 = vmatpush3.bf16.msra.mxu0 %v239_v58 }
 0x21a   : > { %5549 = vmatprep.subr.bf16.mxu0 %v7914_v11 }
 0x21c   : > { %5546 = vmatmul.mubr.msk.bf16.vlgmr.msra.gmra.mrb[0].mxu0 %vm127_vm0, %v7912_v10 }
 0x21d   : > { %5550 = vmatpush3.bf16.msra.mxu0 %v7914_v11 }
 0x21e   : > { %5551 = vmatprep.subr.bf16.mxu0 %v7916_v15 }
 0x221   : > { %5552 = vmatpush3.bf16.msra.mxu0 %v7916_v15 }
 0x222   : > { %5553 = vmatprep.subr.bf16.mxu0 %v7918_v19 }
 0x225   : > { %5554 = vmatpush3.bf16.msra.mxu0 %v7918_v19 }
 0x226   : > { %5555 = vmatprep.subr.bf16.mxu0 %v7920_v20 }
 0x229   : > { %5556 = vmatpush3.bf16.msra.mxu0 %v7920_v20 }
 0x22a   : > { %5557 = vmatprep.subr.bf16.mxu0 %v7922_v24 }
 0x22d   : > { %5558 = vmatpush3.bf16.msra.mxu0 %v7922_v24 }
 0x22e   : > { %5559 = vmatprep.subr.bf16.mxu0 %v7926_v28 }
 0x231   : > { %5560 = vmatpush3.bf16.msra.mxu0 %v7926_v28 }
 0x232   : > { %5561 = vmatprep.subr.bf16.mxu0 %v7928_v29 }
 0x235   : > { %5562 = vmatpush3.bf16.msra.mxu0 %v7928_v29 }
 0x236   : > { %5563 = vmatprep.subr.bf16.mxu0 %v7936_v33 }
 0x239   : > { %5564 = vmatpush3.bf16.msra.mxu0 %v7936_v33 }
 0x2ef   : > { %v5547_v60 = vpop.f32.mrb[0].mxu0 }
 0x2f0   : > { %v274_v61 = vpop.f32.mrb[1].mxu0 }
 0x2f1   : > { %v5548_v62 = vpop.f32.mrb[2].mxu0 }
 0x2f2   : > { %v290_v63 = vpack.c.bf16 %v5548_v62, %v5547_v60  ;;  %v277_v4 = vpop.f32.mrb[3].mxu0 }
 0x2f3   : > { %v289_v5 = vpack.c.bf16 %v277_v4, %v274_v61 }
 0x2f5   : > { %5565 = vmatprep.mubr.bf16.mxu0 %v289_v5 }
 0x2f6   : > { %5566 = vmatmul.mubr.bf16.vlgmr.msra.gmra.mrb[4].mxu0 %v290_v63 }
 0x2f7   : > { %5601 = vmatprep.mubr.msk.bf16.mxu0 %vm127_vm0, %v7908_v6 }
 0x3c9   : > { %v5567_v7 = vpop.f32.mrb[4].mxu0 }
 0x3ca   : > { %v334_v8 = vadd.f32 %v5567_v7, %v7932_v31  ;;  %v325_v9 = vpop.f32.mrb[5].mxu0 }
 0x3cb   : > { %v326_v12 = vadd.f32 %v325_v9, %v7924_v27  ;;  %v5568_v13 = vpop.f32.mrb[6].mxu0 }
 0x3cc   : > { %v337_v14 = vadd.f32 %v5568_v13, %v7934_v32  ;;  %v328_v16 = vpop.f32.mrb[7].mxu0  ;;  %v342_v18 = vmax.f32 %v334_v8, 0.0 }
 0x3cd   : > { %v329_v17 = vadd.f32 %v328_v16, %v7930_v30  ;;  %v340_v22 = vmax.f32 %v326_v12, 0.0 }
 0x3ce   : > { %v343_v21 = vmax.f32 %v337_v14, 0.0 }
 0x3cf   : > { %v341_v23 = vmax.f32 %v329_v17, 0.0 }
 0x3d0   : > { %v345_v25 = vpack.c.bf16 %v343_v21, %v342_v18 }
 0x3d1   : > { %v344_v26 = vpack.c.bf16 %v341_v23, %v340_v22 }
 0x3d3   : > { %5569 = vmatprep.subr.bf16.mxu1 %v344_v26 }
 0x3d4   : > { %5570 = vmatpush3.bf16.msra.mxu1 %v344_v26 }
 0x3d5   : > { %5571 = vmatprep.subr.bf16.mxu1 %v345_v25 }
 0x3d8   : > { %5572 = vmatpush3.bf16.msra.mxu1 %v345_v25 }
 0x3d9   : > { %5577 = vmatprep.subr.bf16.mxu1 %v7914_v11 }
 0x3db   : > { %5574 = vmatmul.mubr.msk.bf16.vlgmr.msra.gmra.mrb[8].mxu1 %vm127_vm0, %v7912_v10 }
 0x3dc   : > { %5578 = vmatpush3.bf16.msra.mxu1 %v7914_v11 }
 0x3dd   : > { %5579 = vmatprep.subr.bf16.mxu1 %v7916_v15 }
 0x3e0   : > { %5580 = vmatpush3.bf16.msra.mxu1 %v7916_v15 }
 0x3e1   : > { %5581 = vmatprep.subr.bf16.mxu1 %v7918_v19 }
 0x3e4   : > { %5582 = vmatpush3.bf16.msra.mxu1 %v7918_v19 }
 0x3e5   : > { %5583 = vmatprep.subr.bf16.mxu1 %v7920_v20 }
 0x3e8   : > { %5584 = vmatpush3.bf16.msra.mxu1 %v7920_v20 }
 0x3e9   : > { %5585 = vmatprep.subr.bf16.mxu1 %v7922_v24 }
 0x3ec   : > { %5586 = vmatpush3.bf16.msra.mxu1 %v7922_v24 }
 0x3ed   : > { %5587 = vmatprep.subr.bf16.mxu1 %v7926_v28 }
 0x3f0   : > { %5588 = vmatpush3.bf16.msra.mxu1 %v7926_v28 }
 0x3f1   : > { %5589 = vmatprep.subr.bf16.mxu1 %v7928_v29 }
 0x3f4   : > { %5590 = vmatpush3.bf16.msra.mxu1 %v7928_v29 }
 0x3f5   : > { %5591 = vmatprep.subr.bf16.mxu1 %v7936_v33 }
 0x3f8   : > { %5592 = vmatpush3.bf16.msra.mxu1 %v7936_v33 }
 0x4ae   : > { %v5575_v38 = vpop.f32.mrb[8].mxu1 }
 0x4af   : > { %v380_v39 = vpop.f32.mrb[9].mxu1 }
 0x4b0   : > { %v5576_v40 = vpop.f32.mrb[10].mxu1 }
 0x4b1   : > { %v396_v41 = vpack.c.bf16 %v5576_v40, %v5575_v38  ;;  %v383_v42 = vpop.f32.mrb[11].mxu1 }
 0x4b2   : > { %v395_v43 = vpack.c.bf16 %v383_v42, %v380_v39 }
 0x4b4   : > { %5593 = vmatprep.mubr.bf16.mxu1 %v395_v43 }
 0x4b5   : > { %5594 = vmatmul.mubr.bf16.vlgmr.msra.gmra.mrb[12].mxu1 %v396_v41 }
 0x4b6   : > { %5629 = vmatprep.mubr.msk.bf16.mxu1 %vm127_vm0, %v7908_v6 }
 0x588   : > { %v5595_v44 = vpop.f32.mrb[12].mxu1 }
 0x589   : > { %v440_v45 = vadd.f32 %v5595_v44, %v7932_v31  ;;  %v431_v46 = vpop.f32.mrb[13].mxu1 }
 0x58a   : > { %v432_v47 = vadd.f32 %v431_v46, %v7924_v27  ;;  %v5596_v48 = vpop.f32.mrb[14].mxu1 }
 0x58b   : > { %v443_v49 = vadd.f32 %v5596_v48, %v7934_v32  ;;  %v434_v50 = vpop.f32.mrb[15].mxu1  ;;  %v448_v52 = vmax.f32 %v440_v45, 0.0 }
 0x58c   : > { %v435_v51 = vadd.f32 %v434_v50, %v7930_v30  ;;  %v446_v54 = vmax.f32 %v432_v47, 0.0 }
 0x58d   : > { %v449_v53 = vmax.f32 %v443_v49, 0.0 }
 0x58e   : > { %v447_v55 = vmax.f32 %v435_v51, 0.0 }
 0x58f   : > { %v451_v56 = vpack.c.bf16 %v449_v53, %v448_v52 }
 0x590   : > { %v450_v57 = vpack.c.bf16 %v447_v55, %v446_v54 }
 0x592   : > { %5597 = vmatprep.subr.bf16.mxu0 %v450_v57 }
 0x593   : > { %5598 = vmatpush3.bf16.msra.mxu0 %v450_v57 }
 0x594   : > { %5599 = vmatprep.subr.bf16.mxu0 %v451_v56 }
 0x597   : > { %5600 = vmatpush3.bf16.msra.mxu0 %v451_v56 }
 0x598   : > { %5605 = vmatprep.subr.bf16.mxu0 %v7914_v11 }
 0x59a   : > { %5602 = vmatmul.mubr.msk.bf16.vlgmr.msra.gmra.mrb[8].mxu0 %vm127_vm0, %v7912_v10 }
 0x59b   : > { %5606 = vmatpush3.bf16.msra.mxu0 %v7914_v11 }
 0x59c   : > { %5607 = vmatprep.subr.bf16.mxu0 %v7916_v15 }
 0x59f   : > { %5608 = vmatpush3.bf16.msra.mxu0 %v7916_v15 }
 0x5a0   : > { %5609 = vmatprep.subr.bf16.mxu0 %v7918_v19 }
 0x5a3   : > { %5610 = vmatpush3.bf16.msra.mxu0 %v7918_v19 }
 0x5a4   : > { %5611 = vmatprep.subr.bf16.mxu0 %v7920_v20 }
 0x5a7   : > { %5612 = vmatpush3.bf16.msra.mxu0 %v7920_v20 }
 0x5a8   : > { %5613 = vmatprep.subr.bf16.mxu0 %v7922_v24 }
 0x5ab   : > { %5614 = vmatpush3.bf16.msra.mxu0 %v7922_v24 }
 0x5ac   : > { %5615 = vmatprep.subr.bf16.mxu0 %v7926_v28 }
 0x5af   : > { %5616 = vmatpush3.bf16.msra.mxu0 %v7926_v28 }
 0x5b0   : > { %5617 = vmatprep.subr.bf16.mxu0 %v7928_v29 }
 0x5b3   : > { %5618 = vmatpush3.bf16.msra.mxu0 %v7928_v29 }
 0x5b4   : > { %5619 = vmatprep.subr.bf16.mxu0 %v7936_v33 }
 0x5b7   : > { %5620 = vmatpush3.bf16.msra.mxu0 %v7936_v33 }
 0x66d   : > { %v5603_v58 = vpop.f32.mrb[8].mxu0 }
 0x66e   : > { %v486_v59 = vpop.f32.mrb[9].mxu0 }
 0x66f   : > { %v5604_v60 = vpop.f32.mrb[10].mxu0 }
 0x670   : > { %v502_v61 = vpack.c.bf16 %v5604_v60, %v5603_v58  ;;  %v489_v62 = vpop.f32.mrb[11].mxu0 }
 0x671   : > { %v501_v63 = vpack.c.bf16 %v489_v62, %v486_v59 }
 0x673   : > { %5621 = vmatprep.mubr.bf16.mxu0 %v501_v63 }
 0x674   : > { %5622 = vmatmul.mubr.bf16.vlgmr.msra.gmra.mrb[12].mxu0 %v502_v61 }
 0x675   : > { %5657 = vmatprep.mubr.msk.bf16.mxu0 %vm127_vm0, %v7908_v6 }
 0x747   : > { %v5623_v4 = vpop.f32.mrb[12].mxu0 }
 0x748   : > { %v546_v5 = vadd.f32 %v5623_v4, %v7932_v31  ;;  %v537_v7 = vpop.f32.mrb[13].mxu0 }
 0x749   : > { %v538_v8 = vadd.f32 %v537_v7, %v7924_v27  ;;  %v5624_v9 = vpop.f32.mrb[14].mxu0 }
 0x74a   : > { %v549_v12 = vadd.f32 %v5624_v9, %v7934_v32  ;;  %v540_v13 = vpop.f32.mrb[15].mxu0  ;;  %v554_v16 = vmax.f32 %v546_v5, 0.0 }
 0x74b   : > { %v541_v14 = vadd.f32 %v540_v13, %v7930_v30  ;;  %v552_v18 = vmax.f32 %v538_v8, 0.0 }
 0x74c   : > { %v555_v17 = vmax.f32 %v549_v12, 0.0 }
 0x74d   : > { %v553_v21 = vmax.f32 %v541_v14, 0.0 }
 0x74e   : > { %v557_v22 = vpack.c.bf16 %v555_v17, %v554_v16 }
 0x74f   : > { %v556_v23 = vpack.c.bf16 %v553_v21, %v552_v18 }
 0x751   : > { %5625 = vmatprep.subr.bf16.mxu1 %v556_v23 }
 0x752   : > { %5626 = vmatpush3.bf16.msra.mxu1 %v556_v23 }
 0x753   : > { %5627 = vmatprep.subr.bf16.mxu1 %v557_v22 }
 0x756   : > { %5628 = vmatpush3.bf16.msra.mxu1 %v557_v22 }
 0x757   : > { %5633 = vmatprep.subr.bf16.mxu1 %v7914_v11 }
 0x759   : > { %5630 = vmatmul.mubr.msk.bf16.vlgmr.msra.gmra.mrb[16].mxu1 %vm127_vm0, %v7912_v10 }
 0x75a   : > { %5634 = vmatpush3.bf16.msra.mxu1 %v7914_v11 }
 0x75b   : > { %5635 = vmatprep.subr.bf16.mxu1 %v7916_v15 }
 0x75e   : > { %5636 = vmatpush3.bf16.msra.mxu1 %v7916_v15 }
 0x75f   : > { %5637 = vmatprep.subr.bf16.mxu1 %v7918_v19 }
 0x762   : > { %5638 = vmatpush3.bf16.msra.mxu1 %v7918_v19 }
 0x763   : > { %5639 = vmatprep.subr.bf16.mxu1 %v7920_v20 }
 0x766   : > { %5640 = vmatpush3.bf16.msra.mxu1 %v7920_v20 }
 0x767   : > { %5641 = vmatprep.subr.bf16.mxu1 %v7922_v24 }
 0x76a   : > { %5642 = vmatpush3.bf16.msra.mxu1 %v7922_v24 }
 0x76b   : > { %5643 = vmatprep.subr.bf16.mxu1 %v7926_v28 }
 0x76e   : > { %5644 = vmatpush3.bf16.msra.mxu1 %v7926_v28 }
 0x76f   : > { %5645 = vmatprep.subr.bf16.mxu1 %v7928_v29 }
 0x772   : > { %5646 = vmatpush3.bf16.msra.mxu1 %v7928_v29 }
 0x773   : > { %5647 = vmatprep.subr.bf16.mxu1 %v7936_v33 }
 0x776   : > { %5648 = vmatpush3.bf16.msra.mxu1 %v7936_v33 }
 0x82c   : > { %v5631_v25 = vpop.f32.mrb[16].mxu1 }
 0x82d   : > { %v592_v26 = vpop.f32.mrb[17].mxu1 }
 0x82e   : > { %v5632_v38 = vpop.f32.mrb[18].mxu1 }
 0x82f   : > { %v608_v39 = vpack.c.bf16 %v5632_v38, %v5631_v25  ;;  %v595_v40 = vpop.f32.mrb[19].mxu1 }
 0x830   : > { %v607_v41 = vpack.c.bf16 %v595_v40, %v592_v26 }
 0x832   : > { %5649 = vmatprep.mubr.bf16.mxu1 %v607_v41 }
 0x833   : > { %5650 = vmatmul.mubr.bf16.vlgmr.msra.gmra.mrb[20].mxu1 %v608_v39 }
 0x834   : > { %5685 = vmatprep.mubr.msk.bf16.mxu1 %vm127_vm0, %v7908_v6 }
 0x906   : > { %v5651_v42 = vpop.f32.mrb[20].mxu1 }
 0x907   : > { %v652_v43 = vadd.f32 %v5651_v42, %v7932_v31  ;;  %v643_v44 = vpop.f32.mrb[21].mxu1 }
 0x908   : > { %v644_v45 = vadd.f32 %v643_v44, %v7924_v27  ;;  %v5652_v46 = vpop.f32.mrb[22].mxu1 }
 0x909   : > { %v655_v47 = vadd.f32 %v5652_v46, %v7934_v32  ;;  %v646_v48 = vpop.f32.mrb[23].mxu1  ;;  %v660_v50 = vmax.f32 %v652_v43, 0.0 }
 0x90a   : > { %v647_v49 = vadd.f32 %v646_v48, %v7930_v30  ;;  %v658_v52 = vmax.f32 %v644_v45, 0.0 }
 0x90b   : > { %v661_v51 = vmax.f32 %v655_v47, 0.0 }
 0x90c   : > { %v659_v53 = vmax.f32 %v647_v49, 0.0 }
 0x90d   : > { %v663_v54 = vpack.c.bf16 %v661_v51, %v660_v50 }
 0x90e   : > { %v662_v55 = vpack.c.bf16 %v659_v53, %v658_v52 }
 0x910   : > { %5653 = vmatprep.subr.bf16.mxu0 %v662_v55 }
 0x911   : > { %5654 = vmatpush3.bf16.msra.mxu0 %v662_v55 }
 0x912   : > { %5655 = vmatprep.subr.bf16.mxu0 %v663_v54 }
 0x915   : > { %5656 = vmatpush3.bf16.msra.mxu0 %v663_v54 }
 0x916   : > { %5661 = vmatprep.subr.bf16.mxu0 %v7914_v11 }
 0x918   : > { %5658 = vmatmul.mubr.msk.bf16.vlgmr.msra.gmra.mrb[16].mxu0 %vm127_vm0, %v7912_v10 }
 0x919   : > { %5662 = vmatpush3.bf16.msra.mxu0 %v7914_v11 }
 0x91a   : > { %5663 = vmatprep.subr.bf16.mxu0 %v7916_v15 }
 0x91d   : > { %5664 = vmatpush3.bf16.msra.mxu0 %v7916_v15 }
 0x91e   : > { %5665 = vmatprep.subr.bf16.mxu0 %v7918_v19 }
 0x921   : > { %5666 = vmatpush3.bf16.msra.mxu0 %v7918_v19 }
 0x922   : > { %5667 = vmatprep.subr.bf16.mxu0 %v7920_v20 }
 0x925   : > { %5668 = vmatpush3.bf16.msra.mxu0 %v7920_v20 }
 0x926   : > { %5669 = vmatprep.subr.bf16.mxu0 %v7922_v24 }
 0x929   : > { %5670 = vmatpush3.bf16.msra.mxu0 %v7922_v24 }
 0x92a   : > { %5671 = vmatprep.subr.bf16.mxu0 %v7926_v28 }
 0x92d   : > { %5672 = vmatpush3.bf16.msra.mxu0 %v7926_v28 }
 0x92e   : > { %5673 = vmatprep.subr.bf16.mxu0 %v7928_v29 }
 0x931   : > { %5674 = vmatpush3.bf16.msra.mxu0 %v7928_v29 }
 0x932   : > { %5675 = vmatprep.subr.bf16.mxu0 %v7936_v33 }
 0x935   : > { %5676 = vmatpush3.bf16.msra.mxu0 %v7936_v33 }
 0x9eb   : > { %v5659_v56 = vpop.f32.mrb[16].mxu0 }
 0x9ec   : > { %v698_v57 = vpop.f32.mrb[17].mxu0 }
 0x9ed   : > { %v5660_v58 = vpop.f32.mrb[18].mxu0 }
 0x9ee   : > { %v714_v59 = vpack.c.bf16 %v5660_v58, %v5659_v56  ;;  %v701_v60 = vpop.f32.mrb[19].mxu0 }
 0x9ef   : > { %v713_v61 = vpack.c.bf16 %v701_v60, %v698_v57 }
 0x9f1   : > { %5677 = vmatprep.mubr.bf16.mxu0 %v713_v61 }
 0x9f2   : > { %5678 = vmatmul.mubr.bf16.vlgmr.msra.gmra.mrb[20].mxu0 %v714_v59 }
 0x9f3   : > { %5713 = vmatprep.mubr.msk.bf16.mxu0 %vm127_vm0, %v7908_v6 }
 0xac5   : > { %v5679_v62 = vpop.f32.mrb[20].mxu0 }
 0xac6   : > { %v758_v63 = vadd.f32 %v5679_v62, %v7932_v31  ;;  %v749_v4 = vpop.f32.mrb[21].mxu0 }
 0xac7   : > { %v750_v5 = vadd.f32 %v749_v4, %v7924_v27  ;;  %v5680_v7 = vpop.f32.mrb[22].mxu0 }
 0xac8   : > { %v761_v8 = vadd.f32 %v5680_v7, %v7934_v32  ;;  %v752_v9 = vpop.f32.mrb[23].mxu0  ;;  %v766_v13 = vmax.f32 %v758_v63, 0.0 }
 0xac9   : > { %v753_v12 = vadd.f32 %v752_v9, %v7930_v30  ;;  %v764_v16 = vmax.f32 %v750_v5, 0.0 }
 0xaca   : > { %v767_v14 = vmax.f32 %v761_v8, 0.0 }
 0xacb   : > { %v765_v17 = vmax.f32 %v753_v12, 0.0 }
 0xacc   : > { %v769_v18 = vpack.c.bf16 %v767_v14, %v766_v13 }
 0xacd   : > { %v768_v21 = vpack.c.bf16 %v765_v17, %v764_v16 }
 0xacf   : > { %5681 = vmatprep.subr.bf16.mxu1 %v768_v21 }
 0xad0   : > { %5682 = vmatpush3.bf16.msra.mxu1 %v768_v21 }
 0xad1   : > { %5683 = vmatprep.subr.bf16.mxu1 %v769_v18 }
 0xad4   : > { %5684 = vmatpush3.bf16.msra.mxu1 %v769_v18 }
 0xad5   : > { %5689 = vmatprep.subr.bf16.mxu1 %v7914_v11 }
 0xad7   : > { %5686 = vmatmul.mubr.msk.bf16.vlgmr.msra.gmra.mrb[24].mxu1 %vm127_vm0, %v7912_v10 }
 0xad8   : > { %5690 = vmatpush3.bf16.msra.mxu1 %v7914_v11 }
 0xad9   : > { %5691 = vmatprep.subr.bf16.mxu1 %v7916_v15 }
 0xadc   : > { %5692 = vmatpush3.bf16.msra.mxu1 %v7916_v15 }
 0xadd   : > { %5693 = vmatprep.subr.bf16.mxu1 %v7918_v19 }
 0xae0   : > { %5694 = vmatpush3.bf16.msra.mxu1 %v7918_v19 }
 0xae1   : > { %5695 = vmatprep.subr.bf16.mxu1 %v7920_v20 }
 0xae4   : > { %5696 = vmatpush3.bf16.msra.mxu1 %v7920_v20 }
 0xae5   : > { %5697 = vmatprep.subr.bf16.mxu1 %v7922_v24 }
 0xae8   : > { %5698 = vmatpush3.bf16.msra.mxu1 %v7922_v24 }
 0xae9   : > { %5699 = vmatprep.subr.bf16.mxu1 %v7926_v28 }
 0xaec   : > { %5700 = vmatpush3.bf16.msra.mxu1 %v7926_v28 }
 0xaed   : > { %5701 = vmatprep.subr.bf16.mxu1 %v7928_v29 }
 0xaf0   : > { %5702 = vmatpush3.bf16.msra.mxu1 %v7928_v29 }
 0xaf1   : > { %5703 = vmatprep.subr.bf16.mxu1 %v7936_v33 }
 0xaf4   : > { %5704 = vmatpush3.bf16.msra.mxu1 %v7936_v33 }
 0xbaa   : > { %v5687_v22 = vpop.f32.mrb[24].mxu1 }
 0xbab   : > { %v804_v23 = vpop.f32.mrb[25].mxu1 }
 0xbac   : > { %v5688_v25 = vpop.f32.mrb[26].mxu1 }
 0xbad   : > { %v820_v26 = vpack.c.bf16 %v5688_v25, %v5687_v22  ;;  %v807_v38 = vpop.f32.mrb[27].mxu1 }
 0xbae   : > { %v819_v39 = vpack.c.bf16 %v807_v38, %v804_v23 }
 0xbb0   : > { %5705 = vmatprep.mubr.bf16.mxu1 %v819_v39 }
 0xbb1   : > { %5706 = vmatmul.mubr.bf16.vlgmr.msra.gmra.mrb[28].mxu1 %v820_v26 }
 0xbb2   : > { %5741 = vmatprep.mubr.msk.bf16.mxu1 %vm127_vm0, %v7908_v6 }
 0xc84   : > { %v5707_v40 = vpop.f32.mrb[28].mxu1 }
 0xc85   : > { %v864_v41 = vadd.f32 %v5707_v40, %v7932_v31  ;;  %v855_v42 = vpop.f32.mrb[29].mxu1 }
 0xc86   : > { %v856_v43 = vadd.f32 %v855_v42, %v7924_v27  ;;  %v5708_v44 = vpop.f32.mrb[30].mxu1 }
 0xc87   : > { %v867_v45 = vadd.f32 %v5708_v44, %v7934_v32  ;;  %v858_v46 = vpop.f32.mrb[31].mxu1  ;;  %v872_v48 = vmax.f32 %v864_v41, 0.0 }
 0xc88   : > { %v859_v47 = vadd.f32 %v858_v46, %v7930_v30  ;;  %v870_v50 = vmax.f32 %v856_v43, 0.0 }
 0xc89   : > { %v873_v49 = vmax.f32 %v867_v45, 0.0 }
 0xc8a   : > { %v871_v51 = vmax.f32 %v859_v47, 0.0 }
 0xc8b   : > { %v875_v52 = vpack.c.bf16 %v873_v49, %v872_v48 }
 0xc8c   : > { %v874_v53 = vpack.c.bf16 %v871_v51, %v870_v50 }
 0xc8e   : > { %5709 = vmatprep.subr.bf16.mxu0 %v874_v53 }
 0xc8f   : > { %5710 = vmatpush3.bf16.msra.mxu0 %v874_v53 }
 0xc90   : > { %5711 = vmatprep.subr.bf16.mxu0 %v875_v52 }
 0xc93   : > { %5712 = vmatpush3.bf16.msra.mxu0 %v875_v52 }
 0xc94   : > { %5717 = vmatprep.subr.bf16.mxu0 %v7914_v11 }
 0xc96   : > { %5714 = vmatmul.mubr.msk.bf16.vlgmr.msra.gmra.mrb[24].mxu0 %vm127_vm0, %v7912_v10 }
 0xc97   : > { %5718 = vmatpush3.bf16.msra.mxu0 %v7914_v11 }
 0xc98   : > { %5719 = vmatprep.subr.bf16.mxu0 %v7916_v15 }
 0xc9b   : > { %5720 = vmatpush3.bf16.msra.mxu0 %v7916_v15 }
 0xc9c   : > { %5721 = vmatprep.subr.bf16.mxu0 %v7918_v19 }
 0xc9f   : > { %5722 = vmatpush3.bf16.msra.mxu0 %v7918_v19 }
 0xca0   : > { %5723 = vmatprep.subr.bf16.mxu0 %v7920_v20 }
 0xca3   : > { %5724 = vmatpush3.bf16.msra.mxu0 %v7920_v20 }
 0xca4   : > { %5725 = vmatprep.subr.bf16.mxu0 %v7922_v24 }
 0xca7   : > { %5726 = vmatpush3.bf16.msra.mxu0 %v7922_v24 }
 0xca8   : > { %5727 = vmatprep.subr.bf16.mxu0 %v7926_v28 }
 0xcab   : > { %5728 = vmatpush3.bf16.msra.mxu0 %v7926_v28 }
 0xcac   : > { %5729 = vmatprep.subr.bf16.mxu0 %v7928_v29 }
 0xcaf   : > { %5730 = vmatpush3.bf16.msra.mxu0 %v7928_v29 }
 0xcb0   : > { %5731 = vmatprep.subr.bf16.mxu0 %v7936_v33 }
 0xcb3   : > { %5732 = vmatpush3.bf16.msra.mxu0 %v7936_v33 }
 0xd69   : > { %v5715_v54 = vpop.f32.mrb[24].mxu0 }
 0xd6a   : > { %v910_v55 = vpop.f32.mrb[25].mxu0 }
 0xd6b   : > { %v5716_v56 = vpop.f32.mrb[26].mxu0 }
 0xd6c   : > { %v926_v57 = vpack.c.bf16 %v5716_v56, %v5715_v54  ;;  %v913_v58 = vpop.f32.mrb[27].mxu0 }
 0xd6d   : > { %v925_v59 = vpack.c.bf16 %v913_v58, %v910_v55 }
 0xd6f   : > { %5733 = vmatprep.mubr.bf16.mxu0 %v925_v59 }
 0xd70   : > { %5734 = vmatmul.mubr.bf16.vlgmr.msra.gmra.mrb[28].mxu0 %v926_v57 }
 0xd71   : > { %5769 = vmatprep.mubr.msk.bf16.mxu0 %vm127_vm0, %v7908_v6 }
 0xe43   : > { %v5735_v60 = vpop.f32.mrb[28].mxu0 }
 0xe44   : > { %v970_v61 = vadd.f32 %v5735_v60, %v7932_v31  ;;  %v961_v62 = vpop.f32.mrb[29].mxu0 }
 0xe45   : > { %v962_v63 = vadd.f32 %v961_v62, %v7924_v27  ;;  %v5736_v4 = vpop.f32.mrb[30].mxu0 }
 0xe46   : > { %v973_v5 = vadd.f32 %v5736_v4, %v7934_v32  ;;  %v964_v7 = vpop.f32.mrb[31].mxu0  ;;  %v978_v9 = vmax.f32 %v970_v61, 0.0 }
 0xe47   : > { %v965_v8 = vadd.f32 %v964_v7, %v7930_v30  ;;  %v976_v13 = vmax.f32 %v962_v63, 0.0 }
 0xe48   : > { %v979_v12 = vmax.f32 %v973_v5, 0.0 }
 0xe49   : > { %v977_v14 = vmax.f32 %v965_v8, 0.0 }
 0xe4a   : > { %v981_v16 = vpack.c.bf16 %v979_v12, %v978_v9 }
 0xe4b   : > { %v980_v17 = vpack.c.bf16 %v977_v14, %v976_v13 }
 0xe4d   : > { %5737 = vmatprep.subr.bf16.mxu1 %v980_v17 }
 0xe4e   : > { %5738 = vmatpush3.bf16.msra.mxu1 %v980_v17 }
 0xe4f   : > { %5739 = vmatprep.subr.bf16.mxu1 %v981_v16 }
 0xe52   : > { %5740 = vmatpush3.bf16.msra.mxu1 %v981_v16 }
 0xe53   : > { %5745 = vmatprep.subr.bf16.mxu1 %v7914_v11 }
 0xe55   : > { %5742 = vmatmul.mubr.msk.bf16.vlgmr.msra.gmra.mrb[32].mxu1 %vm127_vm0, %v7912_v10 }
 0xe56   : > { %5746 = vmatpush3.bf16.msra.mxu1 %v7914_v11 }
 0xe57   : > { %5747 = vmatprep.subr.bf16.mxu1 %v7916_v15 }
 0xe5a   : > { %5748 = vmatpush3.bf16.msra.mxu1 %v7916_v15 }
 0xe5b   : > { %5749 = vmatprep.subr.bf16.mxu1 %v7918_v19 }
 0xe5e   : > { %5750 = vmatpush3.bf16.msra.mxu1 %v7918_v19 }
 0xe5f   : > { %5751 = vmatprep.subr.bf16.mxu1 %v7920_v20 }
 0xe62   : > { %5752 = vmatpush3.bf16.msra.mxu1 %v7920_v20 }
 0xe63   : > { %5753 = vmatprep.subr.bf16.mxu1 %v7922_v24 }
 0xe66   : > { %5754 = vmatpush3.bf16.msra.mxu1 %v7922_v24 }
 0xe67   : > { %5755 = vmatprep.subr.bf16.mxu1 %v7926_v28 }
 0xe6a   : > { %5756 = vmatpush3.bf16.msra.mxu1 %v7926_v28 }
 0xe6b   : > { %5757 = vmatprep.subr.bf16.mxu1 %v7928_v29 }
 0xe6e   : > { %5758 = vmatpush3.bf16.msra.mxu1 %v7928_v29 }
 0xe6f   : > { %5759 = vmatprep.subr.bf16.mxu1 %v7936_v33 }
 0xe72   : > { %5760 = vmatpush3.bf16.msra.mxu1 %v7936_v33 }
 0xf28   : > { %v5743_v18 = vpop.f32.mrb[32].mxu1 }
 0xf29   : > { %v1016_v21 = vpop.f32.mrb[33].mxu1 }
 0xf2a   : > { %v5744_v22 = vpop.f32.mrb[34].mxu1 }
 0xf2b   : > { %v1032_v23 = vpack.c.bf16 %v5744_v22, %v5743_v18  ;;  %v1019_v25 = vpop.f32.mrb[35].mxu1 }
 0xf2c   : > { %v1031_v26 = vpack.c.bf16 %v1019_v25, %v1016_v21 }
 0xf2e   : > { %5761 = vmatprep.mubr.bf16.mxu1 %v1031_v26 }
 0xf2f   : > { %5762 = vmatmul.mubr.bf16.vlgmr.msra.gmra.mrb[36].mxu1 %v1032_v23 }
 0xf30   : > { %5797 = vmatprep.mubr.msk.bf16.mxu1 %vm127_vm0, %v7908_v6 }
0x1002   : > { %v5763_v38 = vpop.f32.mrb[36].mxu1 }
0x1003   : > { %v1076_v39 = vadd.f32 %v5763_v38, %v7932_v31  ;;  %v1067_v40 = vpop.f32.mrb[37].mxu1 }
0x1004   : > { %v1068_v41 = vadd.f32 %v1067_v40, %v7924_v27  ;;  %v5764_v42 = vpop.f32.mrb[38].mxu1 }
0x1005   : > { %v1079_v43 = vadd.f32 %v5764_v42, %v7934_v32  ;;  %v1070_v44 = vpop.f32.mrb[39].mxu1  ;;  %v1084_v46 = vmax.f32 %v1076_v39, 0.0 }
0x1006   : > { %v1071_v45 = vadd.f32 %v1070_v44, %v7930_v30  ;;  %v1082_v48 = vmax.f32 %v1068_v41, 0.0 }
0x1007   : > { %v1085_v47 = vmax.f32 %v1079_v43, 0.0 }
0x1008   : > { %v1083_v49 = vmax.f32 %v1071_v45, 0.0 }
0x1009   : > { %v1087_v50 = vpack.c.bf16 %v1085_v47, %v1084_v46 }
0x100a   : > { %v1086_v51 = vpack.c.bf16 %v1083_v49, %v1082_v48 }
0x100c   : > { %5765 = vmatprep.subr.bf16.mxu0 %v1086_v51 }
0x100d   : > { %5766 = vmatpush3.bf16.msra.mxu0 %v1086_v51 }
0x100e   : > { %5767 = vmatprep.subr.bf16.mxu0 %v1087_v50 }
0x1011   : > { %5768 = vmatpush3.bf16.msra.mxu0 %v1087_v50 }
0x1012   : > { %5773 = vmatprep.subr.bf16.mxu0 %v7914_v11 }
0x1014   : > { %5770 = vmatmul.mubr.msk.bf16.vlgmr.msra.gmra.mrb[32].mxu0 %vm127_vm0, %v7912_v10 }
0x1015   : > { %5774 = vmatpush3.bf16.msra.mxu0 %v7914_v11 }
0x1016   : > { %5775 = vmatprep.subr.bf16.mxu0 %v7916_v15 }
0x1019   : > { %5776 = vmatpush3.bf16.msra.mxu0 %v7916_v15 }
0x101a   : > { %5777 = vmatprep.subr.bf16.mxu0 %v7918_v19 }
0x101d   : > { %5778 = vmatpush3.bf16.msra.mxu0 %v7918_v19 }
0x101e   : > { %5779 = vmatprep.subr.bf16.mxu0 %v7920_v20 }
0x1021   : > { %5780 = vmatpush3.bf16.msra.mxu0 %v7920_v20 }
0x1022   : > { %5781 = vmatprep.subr.bf16.mxu0 %v7922_v24 }
0x1025   : > { %5782 = vmatpush3.bf16.msra.mxu0 %v7922_v24 }
0x1026   : > { %5783 = vmatprep.subr.bf16.mxu0 %v7926_v28 }
0x1029   : > { %5784 = vmatpush3.bf16.msra.mxu0 %v7926_v28 }
0x102a   : > { %5785 = vmatprep.subr.bf16.mxu0 %v7928_v29 }
0x102d   : > { %5786 = vmatpush3.bf16.msra.mxu0 %v7928_v29 }
0x102e   : > { %5787 = vmatprep.subr.bf16.mxu0 %v7936_v33 }
0x1031   : > { %5788 = vmatpush3.bf16.msra.mxu0 %v7936_v33 }
0x10e7   : > { %v5771_v52 = vpop.f32.mrb[32].mxu0 }
0x10e8   : > { %v1122_v53 = vpop.f32.mrb[33].mxu0 }
0x10e9   : > { %v5772_v54 = vpop.f32.mrb[34].mxu0 }
0x10ea   : > { %v1138_v55 = vpack.c.bf16 %v5772_v54, %v5771_v52  ;;  %v1125_v56 = vpop.f32.mrb[35].mxu0 }
0x10eb   : > { %v1137_v57 = vpack.c.bf16 %v1125_v56, %v1122_v53 }
0x10ed   : > { %5789 = vmatprep.mubr.bf16.mxu0 %v1137_v57 }
0x10ee   : > { %5790 = vmatmul.mubr.bf16.vlgmr.msra.gmra.mrb[36].mxu0 %v1138_v55 }
0x10ef   : > { %5825 = vmatprep.mubr.msk.bf16.mxu0 %vm127_vm0, %v7908_v6 }
0x11c1   : > { %v5791_v58 = vpop.f32.mrb[36].mxu0 }
0x11c2   : > { %v1182_v59 = vadd.f32 %v5791_v58, %v7932_v31  ;;  %v1173_v60 = vpop.f32.mrb[37].mxu0 }
0x11c3   : > { %v1174_v61 = vadd.f32 %v1173_v60, %v7924_v27  ;;  %v5792_v62 = vpop.f32.mrb[38].mxu0 }
0x11c4   : > { %v1185_v63 = vadd.f32 %v5792_v62, %v7934_v32  ;;  %v1176_v4 = vpop.f32.mrb[39].mxu0  ;;  %v1190_v7 = vmax.f32 %v1182_v59, 0.0 }
0x11c5   : > { %v1177_v5 = vadd.f32 %v1176_v4, %v7930_v30  ;;  %v1188_v9 = vmax.f32 %v1174_v61, 0.0 }
0x11c6   : > { %v1191_v8 = vmax.f32 %v1185_v63, 0.0 }
0x11c7   : > { %v1189_v12 = vmax.f32 %v1177_v5, 0.0 }
0x11c8   : > { %v1193_v13 = vpack.c.bf16 %v1191_v8, %v1190_v7 }
0x11c9   : > { %v1192_v14 = vpack.c.bf16 %v1189_v12, %v1188_v9 }
0x11cb   : > { %5793 = vmatprep.subr.bf16.mxu1 %v1192_v14 }
0x11cc   : > { %5794 = vmatpush3.bf16.msra.mxu1 %v1192_v14 }
0x11cd   : > { %5795 = vmatprep.subr.bf16.mxu1 %v1193_v13 }
0x11d0   : > { %5796 = vmatpush3.bf16.msra.mxu1 %v1193_v13 }
0x11d1   : > { %5801 = vmatprep.subr.bf16.mxu1 %v7914_v11 }
0x11d3   : > { %5798 = vmatmul.mubr.msk.bf16.vlgmr.msra.gmra.mrb[40].mxu1 %vm127_vm0, %v7912_v10 }
0x11d4   : > { %5802 = vmatpush3.bf16.msra.mxu1 %v7914_v11 }
0x11d5   : > { %5803 = vmatprep.subr.bf16.mxu1 %v7916_v15 }
0x11d8   : > { %5804 = vmatpush3.bf16.msra.mxu1 %v7916_v15 }
0x11d9   : > { %5805 = vmatprep.subr.bf16.mxu1 %v7918_v19 }
0x11dc   : > { %5806 = vmatpush3.bf16.msra.mxu1 %v7918_v19 }
0x11dd   : > { %5807 = vmatprep.subr.bf16.mxu1 %v7920_v20 }
0x11e0   : > { %5808 = vmatpush3.bf16.msra.mxu1 %v7920_v20 }
0x11e1   : > { %5809 = vmatprep.subr.bf16.mxu1 %v7922_v24 }
0x11e4   : > { %5810 = vmatpush3.bf16.msra.mxu1 %v7922_v24 }
0x11e5   : > { %5811 = vmatprep.subr.bf16.mxu1 %v7926_v28 }
0x11e8   : > { %5812 = vmatpush3.bf16.msra.mxu1 %v7926_v28 }
0x11e9   : > { %5813 = vmatprep.subr.bf16.mxu1 %v7928_v29 }
0x11ec   : > { %5814 = vmatpush3.bf16.msra.mxu1 %v7928_v29 }
0x11ed   : > { %5815 = vmatprep.subr.bf16.mxu1 %v7936_v33 }
0x11f0   : > { %5816 = vmatpush3.bf16.msra.mxu1 %v7936_v33 }
0x12a6   : > { %v5799_v16 = vpop.f32.mrb[40].mxu1 }
0x12a7   : > { %v1228_v17 = vpop.f32.mrb[41].mxu1 }
0x12a8   : > { %v5800_v18 = vpop.f32.mrb[42].mxu1 }
0x12a9   : > { %v1244_v21 = vpack.c.bf16 %v5800_v18, %v5799_v16  ;;  %v1231_v22 = vpop.f32.mrb[43].mxu1 }
0x12aa   : > { %v1243_v23 = vpack.c.bf16 %v1231_v22, %v1228_v17 }
0x12ac   : > { %5817 = vmatprep.mubr.bf16.mxu1 %v1243_v23 }
0x12ad   : > { %5818 = vmatmul.mubr.bf16.vlgmr.msra.gmra.mrb[44].mxu1 %v1244_v21 }
0x12ae   : > { %5853 = vmatprep.mubr.msk.bf16.mxu1 %vm127_vm0, %v7908_v6 }
0x1380   : > { %v5819_v25 = vpop.f32.mrb[44].mxu1 }
0x1381   : > { %v1288_v26 = vadd.f32 %v5819_v25, %v7932_v31  ;;  %v1279_v38 = vpop.f32.mrb[45].mxu1 }
0x1382   : > { %v1280_v39 = vadd.f32 %v1279_v38, %v7924_v27  ;;  %v5820_v40 = vpop.f32.mrb[46].mxu1 }
0x1383   : > { %v1291_v41 = vadd.f32 %v5820_v40, %v7934_v32  ;;  %v1282_v42 = vpop.f32.mrb[47].mxu1  ;;  %v1296_v44 = vmax.f32 %v1288_v26, 0.0 }
0x1384   : > { %v1283_v43 = vadd.f32 %v1282_v42, %v7930_v30  ;;  %v1294_v46 = vmax.f32 %v1280_v39, 0.0 }
0x1385   : > { %v1297_v45 = vmax.f32 %v1291_v41, 0.0 }
0x1386   : > { %v1295_v47 = vmax.f32 %v1283_v43, 0.0 }
0x1387   : > { %v1299_v48 = vpack.c.bf16 %v1297_v45, %v1296_v44 }
0x1388   : > { %v1298_v49 = vpack.c.bf16 %v1295_v47, %v1294_v46 }
0x138a   : > { %5821 = vmatprep.subr.bf16.mxu0 %v1298_v49 }
0x138b   : > { %5822 = vmatpush3.bf16.msra.mxu0 %v1298_v49 }
0x138c   : > { %5823 = vmatprep.subr.bf16.mxu0 %v1299_v48 }
0x138f   : > { %5824 = vmatpush3.bf16.msra.mxu0 %v1299_v48 }
0x1390   : > { %5829 = vmatprep.subr.bf16.mxu0 %v7914_v11 }
0x1392   : > { %5826 = vmatmul.mubr.msk.bf16.vlgmr.msra.gmra.mrb[40].mxu0 %vm127_vm0, %v7912_v10 }
0x1393   : > { %5830 = vmatpush3.bf16.msra.mxu0 %v7914_v11 }
0x1394   : > { %5831 = vmatprep.subr.bf16.mxu0 %v7916_v15 }
0x1397   : > { %5832 = vmatpush3.bf16.msra.mxu0 %v7916_v15 }
0x1398   : > { %5833 = vmatprep.subr.bf16.mxu0 %v7918_v19 }
0x139b   : > { %5834 = vmatpush3.bf16.msra.mxu0 %v7918_v19 }
0x139c   : > { %5835 = vmatprep.subr.bf16.mxu0 %v7920_v20 }
0x139f   : > { %5836 = vmatpush3.bf16.msra.mxu0 %v7920_v20 }
0x13a0   : > { %5837 = vmatprep.subr.bf16.mxu0 %v7922_v24 }
0x13a3   : > { %5838 = vmatpush3.bf16.msra.mxu0 %v7922_v24 }
0x13a4   : > { %5839 = vmatprep.subr.bf16.mxu0 %v7926_v28 }
0x13a7   : > { %5840 = vmatpush3.bf16.msra.mxu0 %v7926_v28 }
0x13a8   : > { %5841 = vmatprep.subr.bf16.mxu0 %v7928_v29 }
0x13ab   : > { %5842 = vmatpush3.bf16.msra.mxu0 %v7928_v29 }
0x13ac   : > { %5843 = vmatprep.subr.bf16.mxu0 %v7936_v33 }
0x13af   : > { %5844 = vmatpush3.bf16.msra.mxu0 %v7936_v33 }
0x1465   : > { %v5827_v50 = vpop.f32.mrb[40].mxu0 }
0x1466   : > { %v1334_v51 = vpop.f32.mrb[41].mxu0 }
0x1467   : > { %v5828_v52 = vpop.f32.mrb[42].mxu0 }
0x1468   : > { %v1350_v53 = vpack.c.bf16 %v5828_v52, %v5827_v50  ;;  %v1337_v54 = vpop.f32.mrb[43].mxu0 }
0x1469   : > { %v1349_v55 = vpack.c.bf16 %v1337_v54, %v1334_v51 }
0x146b   : > { %5845 = vmatprep.mubr.bf16.mxu0 %v1349_v55 }
0x146c   : > { %5846 = vmatmul.mubr.bf16.vlgmr.msra.gmra.mrb[44].mxu0 %v1350_v53 }
0x146d   : > { %5881 = vmatprep.mubr.msk.bf16.mxu0 %vm127_vm0, %v7908_v6 }
0x153f   : > { %v5847_v56 = vpop.f32.mrb[44].mxu0 }
0x1540   : > { %v1394_v57 = vadd.f32 %v5847_v56, %v7932_v31  ;;  %v1385_v58 = vpop.f32.mrb[45].mxu0 }
0x1541   : > { %v1386_v59 = vadd.f32 %v1385_v58, %v7924_v27  ;;  %v5848_v60 = vpop.f32.mrb[46].mxu0 }
0x1542   : > { %v1397_v61 = vadd.f32 %v5848_v60, %v7934_v32  ;;  %v1388_v62 = vpop.f32.mrb[47].mxu0  ;;  %v1402_v4 = vmax.f32 %v1394_v57, 0.0 }
0x1543   : > { %v1389_v63 = vadd.f32 %v1388_v62, %v7930_v30  ;;  %v1400_v7 = vmax.f32 %v1386_v59, 0.0 }
0x1544   : > { %v1403_v5 = vmax.f32 %v1397_v61, 0.0 }
0x1545   : > { %v1401_v8 = vmax.f32 %v1389_v63, 0.0 }
0x1546   : > { %v1405_v9 = vpack.c.bf16 %v1403_v5, %v1402_v4 }
0x1547   : > { %v1404_v12 = vpack.c.bf16 %v1401_v8, %v1400_v7 }
0x1549   : > { %5849 = vmatprep.subr.bf16.mxu1 %v1404_v12 }
0x154a   : > { %5850 = vmatpush3.bf16.msra.mxu1 %v1404_v12 }
0x154b   : > { %5851 = vmatprep.subr.bf16.mxu1 %v1405_v9 }
0x154e   : > { %5852 = vmatpush3.bf16.msra.mxu1 %v1405_v9 }
0x154f   : > { %5857 = vmatprep.subr.bf16.mxu1 %v7914_v11 }
0x1551   : > { %5854 = vmatmul.mubr.msk.bf16.vlgmr.msra.gmra.mrb[48].mxu1 %vm127_vm0, %v7912_v10 }
0x1552   : > { %5858 = vmatpush3.bf16.msra.mxu1 %v7914_v11 }
0x1553   : > { %5859 = vmatprep.subr.bf16.mxu1 %v7916_v15 }
0x1556   : > { %5860 = vmatpush3.bf16.msra.mxu1 %v7916_v15 }
0x1557   : > { %5861 = vmatprep.subr.bf16.mxu1 %v7918_v19 }
0x155a   : > { %5862 = vmatpush3.bf16.msra.mxu1 %v7918_v19 }
0x155b   : > { %5863 = vmatprep.subr.bf16.mxu1 %v7920_v20 }
0x155e   : > { %5864 = vmatpush3.bf16.msra.mxu1 %v7920_v20 }
0x155f   : > { %5865 = vmatprep.subr.bf16.mxu1 %v7922_v24 }
0x1562   : > { %5866 = vmatpush3.bf16.msra.mxu1 %v7922_v24 }
0x1563   : > { %5867 = vmatprep.subr.bf16.mxu1 %v7926_v28 }
0x1566   : > { %5868 = vmatpush3.bf16.msra.mxu1 %v7926_v28 }
0x1567   : > { %5869 = vmatprep.subr.bf16.mxu1 %v7928_v29 }
0x156a   : > { %5870 = vmatpush3.bf16.msra.mxu1 %v7928_v29 }
0x156b   : > { %5871 = vmatprep.subr.bf16.mxu1 %v7936_v33 }
0x156e   : > { %5872 = vmatpush3.bf16.msra.mxu1 %v7936_v33 }
0x1624   : > { %v5855_v13 = vpop.f32.mrb[48].mxu1 }
0x1625   : > { %v1440_v14 = vpop.f32.mrb[49].mxu1 }
0x1626   : > { %v5856_v16 = vpop.f32.mrb[50].mxu1 }
0x1627   : > { %v1456_v17 = vpack.c.bf16 %v5856_v16, %v5855_v13  ;;  %v1443_v18 = vpop.f32.mrb[51].mxu1 }
0x1628   : > { %v1455_v21 = vpack.c.bf16 %v1443_v18, %v1440_v14 }
0x162a   : > { %5873 = vmatprep.mubr.bf16.mxu1 %v1455_v21 }
0x162b   : > { %5874 = vmatmul.mubr.bf16.vlgmr.msra.gmra.mrb[52].mxu1 %v1456_v17 }
0x162c   : > { %5909 = vmatprep.mubr.msk.bf16.mxu1 %vm127_vm0, %v7908_v6 }
0x16fe   : > { %v5875_v22 = vpop.f32.mrb[52].mxu1 }
0x16ff   : > { %v1500_v23 = vadd.f32 %v5875_v22, %v7932_v31  ;;  %v1491_v25 = vpop.f32.mrb[53].mxu1 }
0x1700   : > { %v1492_v26 = vadd.f32 %v1491_v25, %v7924_v27  ;;  %v5876_v38 = vpop.f32.mrb[54].mxu1 }
0x1701   : > { %v1503_v39 = vadd.f32 %v5876_v38, %v7934_v32  ;;  %v1494_v40 = vpop.f32.mrb[55].mxu1  ;;  %v1508_v42 = vmax.f32 %v1500_v23, 0.0 }
0x1702   : > { %v1495_v41 = vadd.f32 %v1494_v40, %v7930_v30  ;;  %v1506_v44 = vmax.f32 %v1492_v26, 0.0 }
0x1703   : > { %v1509_v43 = vmax.f32 %v1503_v39, 0.0 }
0x1704   : > { %v1507_v45 = vmax.f32 %v1495_v41, 0.0 }
0x1705   : > { %v1511_v46 = vpack.c.bf16 %v1509_v43, %v1508_v42 }
0x1706   : > { %v1510_v47 = vpack.c.bf16 %v1507_v45, %v1506_v44 }
0x1708   : > { %5877 = vmatprep.subr.bf16.mxu0 %v1510_v47 }
0x1709   : > { %5878 = vmatpush3.bf16.msra.mxu0 %v1510_v47 }
0x170a   : > { %5879 = vmatprep.subr.bf16.mxu0 %v1511_v46 }
0x170d   : > { %5880 = vmatpush3.bf16.msra.mxu0 %v1511_v46 }
0x170e   : > { %5885 = vmatprep.subr.bf16.mxu0 %v7914_v11 }
0x1710   : > { %5882 = vmatmul.mubr.msk.bf16.vlgmr.msra.gmra.mrb[48].mxu0 %vm127_vm0, %v7912_v10 }
0x1711   : > { %5886 = vmatpush3.bf16.msra.mxu0 %v7914_v11 }
0x1712   : > { %5887 = vmatprep.subr.bf16.mxu0 %v7916_v15 }
0x1715   : > { %5888 = vmatpush3.bf16.msra.mxu0 %v7916_v15 }
0x1716   : > { %5889 = vmatprep.subr.bf16.mxu0 %v7918_v19 }
0x1719   : > { %5890 = vmatpush3.bf16.msra.mxu0 %v7918_v19 }
0x171a   : > { %5891 = vmatprep.subr.bf16.mxu0 %v7920_v20 }
0x171d   : > { %5892 = vmatpush3.bf16.msra.mxu0 %v7920_v20 }
0x171e   : > { %5893 = vmatprep.subr.bf16.mxu0 %v7922_v24 }
0x1721   : > { %5894 = vmatpush3.bf16.msra.mxu0 %v7922_v24 }
0x1722   : > { %5895 = vmatprep.subr.bf16.mxu0 %v7926_v28 }
0x1725   : > { %5896 = vmatpush3.bf16.msra.mxu0 %v7926_v28 }
0x1726   : > { %5897 = vmatprep.subr.bf16.mxu0 %v7928_v29 }
0x1729   : > { %5898 = vmatpush3.bf16.msra.mxu0 %v7928_v29 }
0x172a   : > { %5899 = vmatprep.subr.bf16.mxu0 %v7936_v33 }
0x172d   : > { %5900 = vmatpush3.bf16.msra.mxu0 %v7936_v33 }
0x17e3   : > { %v5883_v48 = vpop.f32.mrb[48].mxu0 }
0x17e4   : > { %v1546_v49 = vpop.f32.mrb[49].mxu0 }
0x17e5   : > { %v5884_v50 = vpop.f32.mrb[50].mxu0 }
0x17e6   : > { %v1562_v51 = vpack.c.bf16 %v5884_v50, %v5883_v48  ;;  %v1549_v52 = vpop.f32.mrb[51].mxu0 }
0x17e7   : > { %v1561_v53 = vpack.c.bf16 %v1549_v52, %v1546_v49 }
0x17e9   : > { %5901 = vmatprep.mubr.bf16.mxu0 %v1561_v53 }
0x17ea   : > { %5902 = vmatmul.mubr.bf16.vlgmr.msra.gmra.mrb[52].mxu0 %v1562_v51 }
0x17eb   : > { %5937 = vmatprep.mubr.msk.bf16.mxu0 %vm127_vm0, %v7908_v6 }
0x18bd   : > { %v5903_v54 = vpop.f32.mrb[52].mxu0 }
0x18be   : > { %v1606_v55 = vadd.f32 %v5903_v54, %v7932_v31  ;;  %v1597_v56 = vpop.f32.mrb[53].mxu0 }
0x18bf   : > { %v1598_v57 = vadd.f32 %v1597_v56, %v7924_v27  ;;  %v5904_v58 = vpop.f32.mrb[54].mxu0 }
0x18c0   : > { %v1609_v59 = vadd.f32 %v5904_v58, %v7934_v32  ;;  %v1600_v60 = vpop.f32.mrb[55].mxu0  ;;  %v1614_v62 = vmax.f32 %v1606_v55, 0.0 }
0x18c1   : > { %v1601_v61 = vadd.f32 %v1600_v60, %v7930_v30  ;;  %v1612_v4 = vmax.f32 %v1598_v57, 0.0 }
0x18c2   : > { %v1615_v63 = vmax.f32 %v1609_v59, 0.0 }
0x18c3   : > { %v1613_v5 = vmax.f32 %v1601_v61, 0.0 }
0x18c4   : > { %v1617_v7 = vpack.c.bf16 %v1615_v63, %v1614_v62 }
0x18c5   : > { %v1616_v8 = vpack.c.bf16 %v1613_v5, %v1612_v4 }
0x18c7   : > { %5905 = vmatprep.subr.bf16.mxu1 %v1616_v8 }
0x18c8   : > { %5906 = vmatpush3.bf16.msra.mxu1 %v1616_v8 }
0x18c9   : > { %5907 = vmatprep.subr.bf16.mxu1 %v1617_v7 }
0x18cc   : > { %5908 = vmatpush3.bf16.msra.mxu1 %v1617_v7 }
0x18cd   : > { %5913 = vmatprep.subr.bf16.mxu1 %v7914_v11 }
0x18cf   : > { %5910 = vmatmul.mubr.msk.bf16.vlgmr.msra.gmra.mrb[56].mxu1 %vm127_vm0, %v7912_v10 }
0x18d0   : > { %5914 = vmatpush3.bf16.msra.mxu1 %v7914_v11 }
0x18d1   : > { %5915 = vmatprep.subr.bf16.mxu1 %v7916_v15 }
0x18d4   : > { %5916 = vmatpush3.bf16.msra.mxu1 %v7916_v15 }
0x18d5   : > { %5917 = vmatprep.subr.bf16.mxu1 %v7918_v19 }
0x18d8   : > { %5918 = vmatpush3.bf16.msra.mxu1 %v7918_v19 }
0x18d9   : > { %5919 = vmatprep.subr.bf16.mxu1 %v7920_v20 }
0x18dc   : > { %5920 = vmatpush3.bf16.msra.mxu1 %v7920_v20 }
0x18dd   : > { %5921 = vmatprep.subr.bf16.mxu1 %v7922_v24 }
0x18e0   : > { %5922 = vmatpush3.bf16.msra.mxu1 %v7922_v24 }
0x18e1   : > { %5923 = vmatprep.subr.bf16.mxu1 %v7926_v28 }
0x18e4   : > { %5924 = vmatpush3.bf16.msra.mxu1 %v7926_v28 }
0x18e5   : > { %5925 = vmatprep.subr.bf16.mxu1 %v7928_v29 }
0x18e8   : > { %5926 = vmatpush3.bf16.msra.mxu1 %v7928_v29 }
0x18e9   : > { %5927 = vmatprep.subr.bf16.mxu1 %v7936_v33 }
0x18ec   : > { %5928 = vmatpush3.bf16.msra.mxu1 %v7936_v33 }
0x19a2   : > { %v5911_v9 = vpop.f32.mrb[56].mxu1 }
0x19a3   : > { %v1652_v12 = vpop.f32.mrb[57].mxu1 }
0x19a4   : > { %v5912_v13 = vpop.f32.mrb[58].mxu1 }
0x19a5   : > { %v1668_v14 = vpack.c.bf16 %v5912_v13, %v5911_v9  ;;  %v1655_v16 = vpop.f32.mrb[59].mxu1 }
0x19a6   : > { %v1667_v17 = vpack.c.bf16 %v1655_v16, %v1652_v12 }
0x19a8   : > { %5929 = vmatprep.mubr.bf16.mxu1 %v1667_v17 }
0x19a9   : > { %5930 = vmatmul.mubr.bf16.vlgmr.msra.gmra.mrb[60].mxu1 %v1668_v14 }
0x1a7c   : > { %v5931_v18 = vpop.f32.mrb[60].mxu1 }
0x1a7d   : > { %v1712_v21 = vadd.f32 %v5931_v18, %v7932_v31  ;;  %v1703_v22 = vpop.f32.mrb[61].mxu1 }
0x1a7e   : > { %v1704_v23 = vadd.f32 %v1703_v22, %v7924_v27  ;;  %v5932_v25 = vpop.f32.mrb[62].mxu1 }
0x1a7f   : > { %v1715_v26 = vadd.f32 %v5932_v25, %v7934_v32  ;;  %v1706_v38 = vpop.f32.mrb[63].mxu1  ;;  %v1720_v40 = vmax.f32 %v1712_v21, 0.0 }
0x1a80   : > { %v1707_v39 = vadd.f32 %v1706_v38, %v7930_v30  ;;  %v1718_v42 = vmax.f32 %v1704_v23, 0.0 }
0x1a81   : > { %v1721_v41 = vmax.f32 %v1715_v26, 0.0 }
0x1a82   : > { %v1719_v43 = vmax.f32 %v1707_v39, 0.0 }
0x1a83   : > { %v1723_v44 = vpack.c.bf16 %v1721_v41, %v1720_v40 }
0x1a84   : > { %v1722_v45 = vpack.c.bf16 %v1719_v43, %v1718_v42 }
0x1a86   : > { %5933 = vmatprep.subr.bf16.mxu0 %v1722_v45 }
0x1a87   : > { %5934 = vmatpush3.bf16.msra.mxu0 %v1722_v45 }
0x1a88   : > { %5935 = vmatprep.subr.bf16.mxu0 %v1723_v44 }
0x1a8b   : > { %5936 = vmatpush3.bf16.msra.mxu0 %v1723_v44 }
0x1a8c   : > { %5941 = vmatprep.subr.bf16.mxu0 %v7914_v11 }
0x1a8e   : > { %5938 = vmatmul.mubr.msk.bf16.vlgmr.msra.gmra.mrb[56].mxu0 %vm127_vm0, %v7912_v10 }
0x1a8f   : > { %5942 = vmatpush3.bf16.msra.mxu0 %v7914_v11 }
0x1a90   : > { %5943 = vmatprep.subr.bf16.mxu0 %v7916_v15 }
0x1a93   : > { %5944 = vmatpush3.bf16.msra.mxu0 %v7916_v15 }
0x1a94   : > { %5945 = vmatprep.subr.bf16.mxu0 %v7918_v19 }
0x1a97   : > { %5946 = vmatpush3.bf16.msra.mxu0 %v7918_v19 }
0x1a98   : > { %5947 = vmatprep.subr.bf16.mxu0 %v7920_v20 }
0x1a9b   : > { %5948 = vmatpush3.bf16.msra.mxu0 %v7920_v20 }
0x1a9c   : > { %5949 = vmatprep.subr.bf16.mxu0 %v7922_v24 }
0x1a9f   : > { %5950 = vmatpush3.bf16.msra.mxu0 %v7922_v24 }
0x1aa0   : > { %5951 = vmatprep.subr.bf16.mxu0 %v7926_v28 }
0x1aa3   : > { %5952 = vmatpush3.bf16.msra.mxu0 %v7926_v28 }
0x1aa4   : > { %5953 = vmatprep.subr.bf16.mxu0 %v7928_v29 }
0x1aa7   : > { %5954 = vmatpush3.bf16.msra.mxu0 %v7928_v29 }
0x1aa8   : > { %5955 = vmatprep.subr.bf16.mxu0 %v7936_v33 }
0x1aab   : > { %5956 = vmatpush3.bf16.msra.mxu0 %v7936_v33 }
0x1b61   : > { %v5939_v46 = vpop.f32.mrb[56].mxu0 }
0x1b62   : > { %v1758_v47 = vpop.f32.mrb[57].mxu0 }
0x1b63   : > { %v5940_v48 = vpop.f32.mrb[58].mxu0 }
0x1b64   : > { %v1774_v49 = vpack.c.bf16 %v5940_v48, %v5939_v46  ;;  %v1761_v50 = vpop.f32.mrb[59].mxu0 }
0x1b65   : > { %v1773_v51 = vpack.c.bf16 %v1761_v50, %v1758_v47 }
0x1b67   : > { %5957 = vmatprep.mubr.bf16.mxu0 %v1773_v51 }
0x1b68   : > { %5958 = vmatmul.mubr.bf16.vlgmr.msra.gmra.mrb[60].mxu0 %v1774_v49 }
0x1c3b   : > { %v5959_v52 = vpop.f32.mrb[60].mxu0 }
0x1c3c   : > { %v1818_v53 = vadd.f32 %v5959_v52, %v7932_v31  ;;  %v1809_v54 = vpop.f32.mrb[61].mxu0 }
0x1c3d   : > { %v1810_v55 = vadd.f32 %v1809_v54, %v7924_v27  ;;  %v5960_v56 = vpop.f32.mrb[62].mxu0 }
0x1c3e   : > { %v1826_v57 = vmax.f32 %v1818_v53, 0.0   ;;  %v1821_v58 = vadd.f32 %v5960_v56, %v7934_v32  ;;  %v1812_v59 = vpop.f32.mrb[63].mxu0 }
0x1c3f   : > { %v1824_v60 = vmax.f32 %v1810_v55, 0.0   ;;  %v1813_v61 = vadd.f32 %v1812_v59, %v7930_v30 }
0x1c40   : > { %v1830_v62 = vsub.f32 %v1826_v57, %v7742_v36  ;;  %v1827_v63 = vmax.f32 %v1821_v58, 0.0  }
0x1c41   : > { %v1828_v4 = vsub.f32 %v1824_v60, %v7750_v34  ;;  %v1825_v5 = vmax.f32 %v1813_v61, 0.0   ;;  %v8901_v34 = vmov %v1824_v60 }
0x1c42   : > { %v1831_v7 = vsub.f32 %v1827_v63, %v7738_v37  ;;  %v8898_v37 = vmov %v1827_v63 }
0x1c43   : > { %v1829_v8 = vsub.f32 %v1825_v5, %v7746_v35  ;;  %v8900_v35 = vmov %v1825_v5 }
0x1c44   : > { %7730 = vmaxabs.init.f32.vacc0 %v1830_v62, %v1831_v7 }
0x1c46   : > { %7731 = vmaxabs.f32.vacc0 %v1828_v4, %v1829_v8 }
0x1c48   : > { %v7732_v9 = vmovacc.low.even.vacc0 }
0x1c4a   : > { %1839 = vmax.xlane.f32.xlu0 %v7732_v9 }
0x1cd7   : > { %v1840_v12 = vpop.xlane.xlu0 %1839 }
0x1cd8   : > { %v1841_v13 = vrot.slane %v1840_v12, 4 }
0x1cda   : > { %v1842_v14 = vmax.f32 %v1840_v12, %v1841_v13 }
0x1cdc   : > { %v1843_v16 = vrot.slane %v1842_v14, 2 }
0x1cde   : > { %v1844_v17 = vmax.f32 %v1842_v14, %v1843_v16 }
0x1ce0   : > { %v1845_v18 = vrot.slane %v1844_v17, 1 }
0x1ce2   : > { %v1846_v36 = vmax.f32 %v1844_v17, %v1845_v18 }
0x1ce4   : > { %7433 = vpush %v1846_v36  ;;  %v8899_v36 = vmov %v1826_v57 }
0x1d15   : > { %s7434_s1 = spop %7433 }
0x1d16   : > { %p120_p5 = scmp.ge.f32.partialorder %s7434_s1, 0.005 }
0x1d18   : > { %p121_p6 = pnand %p120_p5, %p119_p4 }
0x1d19   :  { %p4729_p7 = scmp.lt.s32.totalorder (%p121_p6), %s1848_s12, 300  ;;  %v8903_v34 = vmov (%p121_p6), %v1827_v63  ;;  %v8904_v21 = vmov (%p121_p6), %v1826_v57  ;;  %v8905_v22 = vmov (%p121_p6), %v1825_v5  ;;  %v8906_v23 = vmov (%p121_p6), %v1824_v60 }
0x1d1a   :  { %124 = sbr.rel (!%p121_p6) target bundleno = 83 (0x53), region = 66 }
0x1d21   :  { %4732 = sbr.rel (!%p4729_p7) target bundleno = 14745 (0x3999), region = 71 }
0x1d28 LB: > { %5969 = vmatprep.mubr.msk.f32.mxu1 %vm127_vm0, %v7898_v0  ;;  %6021 = vmatprep.mubr.msk.f32.mxu0 %vm127_vm0, %v7898_v0  ;;  %v6793_v6 = vpack.c.bf16 %v7766_v5, %v7770_v60  ;;  %v6797_v10 = vpack.c.bf16 %v7758_v63, %v7762_v57  ;;  %s4679_s12 = sadd.s32 16, %s7774_s12   ;;  %s7774_s12 = sphi %s1848_s12, %s4679_s12   ;;  %v7770_v60 = vphi %v1824_v60, %v8910_v60   ;;  %v7766_v5 = vphi %v1825_v5, %v8909_v5   ;;  %v7762_v57 = vphi %v1826_v57, %v8908_v57   ;;  %v7758_v63 = vphi %v1827_v63, %v8907_v63  }
0x1d29   : > { %p1856_p8 = scmp.lt.s32.totalorder %s4679_s12, 300 }
0x1d2a   : > { %6794 = vmatprep.subr.bf16.mxu1 %v6793_v6 }
0x1d2b   : > { %6796 = vmatpush3.bf16.msra.mxu1 %v6793_v6 }
0x1d2c   : > { %6798 = vmatprep.subr.bf16.mxu1 %v6797_v10 }
0x1d2f   : > { %6800 = vmatpush3.bf16.msra.mxu1 %v6797_v10 }
0x1d30   : > { %6802 = vmatprep.subr.bf16.mxu1 %v7914_v11 }
0x1d32   : > { %5970 = vmatmul.mubr.msk.f32.vlgmr.msra.gmra.mrb[0].mxu1 %vm127_vm0, %v7900_v1 }
0x1d33   : > { %5972 = vmatprep.mubr.msk.f32.mxu1 %vm127_vm0, %v7902_v2  ;;  %6804 = vmatpush3.bf16.msra.mxu1 %v7914_v11 }
0x1d34   : > { %6806 = vmatprep.subr.bf16.mxu1 %v7916_v15 }
0x1d36   : > { %5973 = vmatmul.mubr.msk.f32.gmra.mrb[2].mxu1 %vm127_vm0, %v7904_v3 }
0x1d37   : > { %6808 = vmatpush3.bf16.msra.mxu1 %v7916_v15 }
0x1d38   : > { %6810 = vmatprep.subr.bf16.mxu1 %v7918_v19 }
0x1d3b   : > { %6812 = vmatpush3.bf16.msra.mxu1 %v7918_v19 }
0x1d3c   : > { %6814 = vmatprep.subr.bf16.mxu1 %v7920_v20 }
0x1d3f   : > { %6816 = vmatpush3.bf16.msra.mxu1 %v7920_v20 }
0x1d40   : > { %6818 = vmatprep.subr.bf16.mxu1 %v7922_v24 }
0x1d43   : > { %6820 = vmatpush3.bf16.msra.mxu1 %v7922_v24 }
0x1d44   : > { %6822 = vmatprep.subr.bf16.mxu1 %v7926_v28 }
0x1d47   : > { %6824 = vmatpush3.bf16.msra.mxu1 %v7926_v28 }
0x1d48   : > { %6826 = vmatprep.subr.bf16.mxu1 %v7928_v29 }
0x1d4b   : > { %6828 = vmatpush3.bf16.msra.mxu1 %v7928_v29 }
0x1d4c   : > { %6830 = vmatprep.subr.bf16.mxu1 %v7936_v33 }
0x1d4f   : > { %6832 = vmatpush3.bf16.msra.mxu1 %v7936_v33 }
0x1e05   : > { %v5971_v35 = vpop.f32.mrb[0].mxu1 }
0x1e06   : > { %v1941_v37 = vpop.f32.mrb[1].mxu1 }
0x1e07   : > { %6007 = vmatprep.mubr.f32.mxu1 %v1941_v37 }
0x1e08   : > { %6008 = vmatmul.mubr.f32.vlgmr.msra.gmra.mrb[4].mxu1 %v5971_v35 }
0x1e09   : > { %v5974_v25 = vpop.f32.mrb[2].mxu1 }
0x1e0a   : > { %v1951_v26 = vpop.f32.mrb[3].mxu1 }
0x1e0b   : > { %6010 = vmatprep.mubr.f32.mxu1 %v1951_v26 }
0x1e0c   : > { %6011 = vmatmul.mubr.f32.gmra.mrb[6].mxu1 %v5974_v25 }
0x1e0d   : > { %6073 = vmatprep.mubr.msk.f32.mxu1 %vm127_vm0, %v7898_v0 }
0x1edb   : > { %v6009_v38 = vpop.f32.mrb[4].mxu1 }
0x1edc   : > { %v2032_v39 = vadd.f32 %v6009_v38, %v7930_v30  ;;  %v2026_v40 = vpop.f32.mrb[5].mxu1 }
0x1edd   : > { %v2027_v41 = vadd.f32 %v2026_v40, %v7924_v27 }
0x1ede   : > { %v2046_v42 = vmax.f32 %v2032_v39, 0.0 }
0x1edf   : > { %v2045_v43 = vmax.f32 %v2027_v41, 0.0  ;;  %v6012_v44 = vpop.f32.mrb[6].mxu1 }
0x1ee0   : > { %v2042_v45 = vadd.f32 %v6012_v44, %v7934_v32  ;;  %v2036_v46 = vpop.f32.mrb[7].mxu1 }
0x1ee1   : > { %v2037_v47 = vadd.f32 %v2036_v46, %v7932_v31  ;;  %v6833_v48 = vpack.c.bf16 %v2046_v42, %v2045_v43 }
0x1ee2   : > { %v2048_v49 = vmax.f32 %v2042_v45, 0.0 }
0x1ee3   : > { %v2047_v50 = vmax.f32 %v2037_v47, 0.0  ;;  %6834 = vmatprep.subr.bf16.mxu0 %v6833_v48 }
0x1ee4   : > { %6836 = vmatpush3.bf16.msra.mxu0 %v6833_v48 }
0x1ee5   : > { %v6837_v51 = vpack.c.bf16 %v2048_v49, %v2047_v50 }
0x1ee7   : > { %6838 = vmatprep.subr.bf16.mxu0 %v6837_v51 }
0x1ee8   : > { %6840 = vmatpush3.bf16.msra.mxu0 %v6837_v51 }
0x1ee9   : > { %6842 = vmatprep.subr.bf16.mxu0 %v7914_v11 }
0x1eeb   : > { %6022 = vmatmul.mubr.msk.f32.vlgmr.msra.gmra.mrb[0].mxu0 %vm127_vm0, %v7900_v1 }
0x1eec   : > { %6024 = vmatprep.mubr.msk.f32.mxu0 %vm127_vm0, %v7902_v2  ;;  %6844 = vmatpush3.bf16.msra.mxu0 %v7914_v11 }
0x1eed   : > { %6846 = vmatprep.subr.bf16.mxu0 %v7916_v15 }
0x1eef   : > { %6025 = vmatmul.mubr.msk.f32.gmra.mrb[2].mxu0 %vm127_vm0, %v7904_v3 }
0x1ef0   : > { %6848 = vmatpush3.bf16.msra.mxu0 %v7916_v15 }
0x1ef1   : > { %6850 = vmatprep.subr.bf16.mxu0 %v7918_v19 }
0x1ef4   : > { %6852 = vmatpush3.bf16.msra.mxu0 %v7918_v19 }
0x1ef5   : > { %6854 = vmatprep.subr.bf16.mxu0 %v7920_v20 }
0x1ef8   : > { %6856 = vmatpush3.bf16.msra.mxu0 %v7920_v20 }
0x1ef9   : > { %6858 = vmatprep.subr.bf16.mxu0 %v7922_v24 }
0x1efc   : > { %6860 = vmatpush3.bf16.msra.mxu0 %v7922_v24 }
0x1efd   : > { %6862 = vmatprep.subr.bf16.mxu0 %v7926_v28 }
0x1f00   : > { %6864 = vmatpush3.bf16.msra.mxu0 %v7926_v28 }
0x1f01   : > { %6866 = vmatprep.subr.bf16.mxu0 %v7928_v29 }
0x1f04   : > { %6868 = vmatpush3.bf16.msra.mxu0 %v7928_v29 }
0x1f05   : > { %6870 = vmatprep.subr.bf16.mxu0 %v7936_v33 }
0x1f08   : > { %6872 = vmatpush3.bf16.msra.mxu0 %v7936_v33 }
0x1fbe   : > { %v6023_v52 = vpop.f32.mrb[0].mxu0 }
0x1fbf   : > { %v2115_v53 = vpop.f32.mrb[1].mxu0 }
0x1fc0   : > { %6059 = vmatprep.mubr.f32.mxu0 %v2115_v53 }
0x1fc1   : > { %6060 = vmatmul.mubr.f32.vlgmr.msra.gmra.mrb[4].mxu0 %v6023_v52 }
0x1fc2   : > { %v6026_v54 = vpop.f32.mrb[2].mxu0 }
0x1fc3   : > { %v2125_v55 = vpop.f32.mrb[3].mxu0 }
0x1fc4   : > { %6062 = vmatprep.mubr.f32.mxu0 %v2125_v55 }
0x1fc5   : > { %6063 = vmatmul.mubr.f32.gmra.mrb[6].mxu0 %v6026_v54 }
0x1fc6   : > { %6125 = vmatprep.mubr.msk.f32.mxu0 %vm127_vm0, %v7898_v0 }
0x2094   : > { %v6061_v56 = vpop.f32.mrb[4].mxu0 }
0x2095   : > { %v2206_v58 = vadd.f32 %v6061_v56, %v7930_v30  ;;  %v2200_v59 = vpop.f32.mrb[5].mxu0 }
0x2096   : > { %v2201_v61 = vadd.f32 %v2200_v59, %v7924_v27 }
0x2097   : > { %v2220_v62 = vmax.f32 %v2206_v58, 0.0 }
0x2098   : > { %v2219_v4 = vmax.f32 %v2201_v61, 0.0  ;;  %v6064_v7 = vpop.f32.mrb[6].mxu0 }
0x2099   : > { %v2216_v8 = vadd.f32 %v6064_v7, %v7934_v32  ;;  %v2210_v9 = vpop.f32.mrb[7].mxu0 }
0x209a   : > { %v6873_v12 = vpack.c.bf16 %v2220_v62, %v2219_v4  ;;  %v2211_v13 = vadd.f32 %v2210_v9, %v7932_v31 }
0x209b   : > { %v2222_v14 = vmax.f32 %v2216_v8, 0.0 }
0x209c   : > { %v2221_v16 = vmax.f32 %v2211_v13, 0.0  ;;  %6874 = vmatprep.subr.bf16.mxu1 %v6873_v12 }
0x209d   : > { %6876 = vmatpush3.bf16.msra.mxu1 %v6873_v12 }
0x209e   : > { %v6877_v17 = vpack.c.bf16 %v2222_v14, %v2221_v16 }
0x20a0   : > { %6878 = vmatprep.subr.bf16.mxu1 %v6877_v17 }
0x20a1   : > { %6880 = vmatpush3.bf16.msra.mxu1 %v6877_v17 }
0x20a2   : > { %6882 = vmatprep.subr.bf16.mxu1 %v7914_v11 }
0x20a4   : > { %6074 = vmatmul.mubr.msk.f32.vlgmr.msra.gmra.mrb[8].mxu1 %vm127_vm0, %v7900_v1 }
0x20a5   : > { %6076 = vmatprep.mubr.msk.f32.mxu1 %vm127_vm0, %v7902_v2  ;;  %6884 = vmatpush3.bf16.msra.mxu1 %v7914_v11 }
0x20a6   : > { %6886 = vmatprep.subr.bf16.mxu1 %v7916_v15 }
0x20a8   : > { %6077 = vmatmul.mubr.msk.f32.gmra.mrb[10].mxu1 %vm127_vm0, %v7904_v3 }
0x20a9   : > { %6888 = vmatpush3.bf16.msra.mxu1 %v7916_v15 }
0x20aa   : > { %6890 = vmatprep.subr.bf16.mxu1 %v7918_v19 }
0x20ad   : > { %6892 = vmatpush3.bf16.msra.mxu1 %v7918_v19 }
0x20ae   : > { %6894 = vmatprep.subr.bf16.mxu1 %v7920_v20 }
0x20b1   : > { %6896 = vmatpush3.bf16.msra.mxu1 %v7920_v20 }
0x20b2   : > { %6898 = vmatprep.subr.bf16.mxu1 %v7922_v24 }
0x20b5   : > { %6900 = vmatpush3.bf16.msra.mxu1 %v7922_v24 }
0x20b6   : > { %6902 = vmatprep.subr.bf16.mxu1 %v7926_v28 }
0x20b9   : > { %6904 = vmatpush3.bf16.msra.mxu1 %v7926_v28 }
0x20ba   : > { %6906 = vmatprep.subr.bf16.mxu1 %v7928_v29 }
0x20bd   : > { %6908 = vmatpush3.bf16.msra.mxu1 %v7928_v29 }
0x20be   : > { %6910 = vmatprep.subr.bf16.mxu1 %v7936_v33 }
0x20c1   : > { %6912 = vmatpush3.bf16.msra.mxu1 %v7936_v33 }
0x2177   : > { %v6075_v18 = vpop.f32.mrb[8].mxu1 }
0x2178   : > { %v2289_v36 = vpop.f32.mrb[9].mxu1 }
0x2179   : > { %6111 = vmatprep.mubr.f32.mxu1 %v2289_v36 }
0x217a   : > { %6112 = vmatmul.mubr.f32.vlgmr.msra.gmra.mrb[12].mxu1 %v6075_v18 }
0x217b   : > { %v6078_v34 = vpop.f32.mrb[10].mxu1 }
0x217c   : > { %v2299_v21 = vpop.f32.mrb[11].mxu1 }
0x217d   : > { %6114 = vmatprep.mubr.f32.mxu1 %v2299_v21 }
0x217e   : > { %6115 = vmatmul.mubr.f32.gmra.mrb[14].mxu1 %v6078_v34 }
0x217f   : > { %6177 = vmatprep.mubr.msk.f32.mxu1 %vm127_vm0, %v7898_v0 }
0x224d   : > { %v6113_v22 = vpop.f32.mrb[12].mxu1 }
0x224e   : > { %v2380_v23 = vadd.f32 %v6113_v22, %v7930_v30  ;;  %v2374_v6 = vpop.f32.mrb[13].mxu1 }
0x224f   : > { %v2375_v10 = vadd.f32 %v2374_v6, %v7924_v27 }
0x2250   : > { %v2394_v35 = vmax.f32 %v2380_v23, 0.0 }
0x2251   : > { %v2393_v37 = vmax.f32 %v2375_v10, 0.0  ;;  %v6116_v25 = vpop.f32.mrb[14].mxu1 }
0x2252   : > { %v2390_v26 = vadd.f32 %v6116_v25, %v7934_v32  ;;  %v2384_v38 = vpop.f32.mrb[15].mxu1 }
0x2253   : > { %v6913_v39 = vpack.c.bf16 %v2394_v35, %v2393_v37  ;;  %v2385_v40 = vadd.f32 %v2384_v38, %v7932_v31 }
0x2254   : > { %v2396_v41 = vmax.f32 %v2390_v26, 0.0 }
0x2255   : > { %v2395_v42 = vmax.f32 %v2385_v40, 0.0  ;;  %6914 = vmatprep.subr.bf16.mxu0 %v6913_v39 }
0x2256   : > { %6916 = vmatpush3.bf16.msra.mxu0 %v6913_v39 }
0x2257   : > { %v6917_v43 = vpack.c.bf16 %v2396_v41, %v2395_v42 }
0x2259   : > { %6918 = vmatprep.subr.bf16.mxu0 %v6917_v43 }
0x225a   : > { %6920 = vmatpush3.bf16.msra.mxu0 %v6917_v43 }
0x225b   : > { %6922 = vmatprep.subr.bf16.mxu0 %v7914_v11 }
0x225d   : > { %6126 = vmatmul.mubr.msk.f32.vlgmr.msra.gmra.mrb[8].mxu0 %vm127_vm0, %v7900_v1 }
0x225e   : > { %6128 = vmatprep.mubr.msk.f32.mxu0 %vm127_vm0, %v7902_v2  ;;  %6924 = vmatpush3.bf16.msra.mxu0 %v7914_v11 }
0x225f   : > { %6926 = vmatprep.subr.bf16.mxu0 %v7916_v15 }
0x2261   : > { %6129 = vmatmul.mubr.msk.f32.gmra.mrb[10].mxu0 %vm127_vm0, %v7904_v3 }
0x2262   : > { %6928 = vmatpush3.bf16.msra.mxu0 %v7916_v15 }
0x2263   : > { %6930 = vmatprep.subr.bf16.mxu0 %v7918_v19 }
0x2266   : > { %6932 = vmatpush3.bf16.msra.mxu0 %v7918_v19 }
0x2267   : > { %6934 = vmatprep.subr.bf16.mxu0 %v7920_v20 }
0x226a   : > { %6936 = vmatpush3.bf16.msra.mxu0 %v7920_v20 }
0x226b   : > { %6938 = vmatprep.subr.bf16.mxu0 %v7922_v24 }
0x226e   : > { %6940 = vmatpush3.bf16.msra.mxu0 %v7922_v24 }
0x226f   : > { %6942 = vmatprep.subr.bf16.mxu0 %v7926_v28 }
0x2272   : > { %6944 = vmatpush3.bf16.msra.mxu0 %v7926_v28 }
0x2273   : > { %6946 = vmatprep.subr.bf16.mxu0 %v7928_v29 }
0x2276   : > { %6948 = vmatpush3.bf16.msra.mxu0 %v7928_v29 }
0x2277   : > { %6950 = vmatprep.subr.bf16.mxu0 %v7936_v33 }
0x227a   : > { %6952 = vmatpush3.bf16.msra.mxu0 %v7936_v33 }
0x2330   : > { %v6127_v44 = vpop.f32.mrb[8].mxu0 }
0x2331   : > { %v2463_v45 = vpop.f32.mrb[9].mxu0 }
0x2332   : > { %6163 = vmatprep.mubr.f32.mxu0 %v2463_v45 }
0x2333   : > { %6164 = vmatmul.mubr.f32.vlgmr.msra.gmra.mrb[12].mxu0 %v6127_v44 }
0x2334   : > { %v6130_v46 = vpop.f32.mrb[10].mxu0 }
0x2335   : > { %v2473_v47 = vpop.f32.mrb[11].mxu0 }
0x2336   : > { %6166 = vmatprep.mubr.f32.mxu0 %v2473_v47 }
0x2337   : > { %6167 = vmatmul.mubr.f32.gmra.mrb[14].mxu0 %v6130_v46 }
0x2338   : > { %6229 = vmatprep.mubr.msk.f32.mxu0 %vm127_vm0, %v7898_v0 }
0x2406   : > { %v6165_v48 = vpop.f32.mrb[12].mxu0 }
0x2407   : > { %v2554_v49 = vadd.f32 %v6165_v48, %v7930_v30  ;;  %v2548_v50 = vpop.f32.mrb[13].mxu0 }
0x2408   : > { %v2549_v51 = vadd.f32 %v2548_v50, %v7924_v27 }
0x2409   : > { %v2568_v52 = vmax.f32 %v2554_v49, 0.0 }
0x240a   : > { %v2567_v53 = vmax.f32 %v2549_v51, 0.0  ;;  %v6168_v54 = vpop.f32.mrb[14].mxu0 }
0x240b   : > { %v2564_v55 = vadd.f32 %v6168_v54, %v7934_v32  ;;  %v2558_v56 = vpop.f32.mrb[15].mxu0 }
0x240c   : > { %v6953_v58 = vpack.c.bf16 %v2568_v52, %v2567_v53  ;;  %v2559_v59 = vadd.f32 %v2558_v56, %v7932_v31 }
0x240d   : > { %v2570_v61 = vmax.f32 %v2564_v55, 0.0 }
0x240e   : > { %v2569_v62 = vmax.f32 %v2559_v59, 0.0  ;;  %6954 = vmatprep.subr.bf16.mxu1 %v6953_v58 }
0x240f   : > { %6956 = vmatpush3.bf16.msra.mxu1 %v6953_v58 }
0x2410   : > { %v6957_v4 = vpack.c.bf16 %v2570_v61, %v2569_v62 }
0x2412   : > { %6958 = vmatprep.subr.bf16.mxu1 %v6957_v4 }
0x2413   : > { %6960 = vmatpush3.bf16.msra.mxu1 %v6957_v4 }
0x2414   : > { %6962 = vmatprep.subr.bf16.mxu1 %v7914_v11 }
0x2416   : > { %6178 = vmatmul.mubr.msk.f32.vlgmr.msra.gmra.mrb[16].mxu1 %vm127_vm0, %v7900_v1 }
0x2417   : > { %6180 = vmatprep.mubr.msk.f32.mxu1 %vm127_vm0, %v7902_v2  ;;  %6964 = vmatpush3.bf16.msra.mxu1 %v7914_v11 }
0x2418   : > { %6966 = vmatprep.subr.bf16.mxu1 %v7916_v15 }
0x241a   : > { %6181 = vmatmul.mubr.msk.f32.gmra.mrb[18].mxu1 %vm127_vm0, %v7904_v3 }
0x241b   : > { %6968 = vmatpush3.bf16.msra.mxu1 %v7916_v15 }
0x241c   : > { %6970 = vmatprep.subr.bf16.mxu1 %v7918_v19 }
0x241f   : > { %6972 = vmatpush3.bf16.msra.mxu1 %v7918_v19 }
0x2420   : > { %6974 = vmatprep.subr.bf16.mxu1 %v7920_v20 }
0x2423   : > { %6976 = vmatpush3.bf16.msra.mxu1 %v7920_v20 }
0x2424   : > { %6978 = vmatprep.subr.bf16.mxu1 %v7922_v24 }
0x2427   : > { %6980 = vmatpush3.bf16.msra.mxu1 %v7922_v24 }
0x2428   : > { %6982 = vmatprep.subr.bf16.mxu1 %v7926_v28 }
0x242b   : > { %6984 = vmatpush3.bf16.msra.mxu1 %v7926_v28 }
0x242c   : > { %6986 = vmatprep.subr.bf16.mxu1 %v7928_v29 }
0x242f   : > { %6988 = vmatpush3.bf16.msra.mxu1 %v7928_v29 }
0x2430   : > { %6990 = vmatprep.subr.bf16.mxu1 %v7936_v33 }
0x2433   : > { %6992 = vmatpush3.bf16.msra.mxu1 %v7936_v33 }
0x24e9   : > { %v6179_v7 = vpop.f32.mrb[16].mxu1 }
0x24ea   : > { %v2637_v8 = vpop.f32.mrb[17].mxu1 }
0x24eb   : > { %6215 = vmatprep.mubr.f32.mxu1 %v2637_v8 }
0x24ec   : > { %6216 = vmatmul.mubr.f32.vlgmr.msra.gmra.mrb[20].mxu1 %v6179_v7 }
0x24ed   : > { %v6182_v9 = vpop.f32.mrb[18].mxu1 }
0x24ee   : > { %v2647_v12 = vpop.f32.mrb[19].mxu1 }
0x24ef   : > { %6218 = vmatprep.mubr.f32.mxu1 %v2647_v12 }
0x24f0   : > { %6219 = vmatmul.mubr.f32.gmra.mrb[22].mxu1 %v6182_v9 }
0x24f1   : > { %6281 = vmatprep.mubr.msk.f32.mxu1 %vm127_vm0, %v7898_v0 }
0x25bf   : > { %v6217_v13 = vpop.f32.mrb[20].mxu1 }
0x25c0   : > { %v2728_v14 = vadd.f32 %v6217_v13, %v7930_v30  ;;  %v2722_v16 = vpop.f32.mrb[21].mxu1 }
0x25c1   : > { %v2723_v17 = vadd.f32 %v2722_v16, %v7924_v27 }
0x25c2   : > { %v2742_v18 = vmax.f32 %v2728_v14, 0.0 }
0x25c3   : > { %v2741_v36 = vmax.f32 %v2723_v17, 0.0  ;;  %v6220_v34 = vpop.f32.mrb[22].mxu1 }
0x25c4   : > { %v2738_v21 = vadd.f32 %v6220_v34, %v7934_v32  ;;  %v2732_v22 = vpop.f32.mrb[23].mxu1 }
0x25c5   : > { %v6993_v23 = vpack.c.bf16 %v2742_v18, %v2741_v36  ;;  %v2733_v6 = vadd.f32 %v2732_v22, %v7932_v31 }
0x25c6   : > { %v2744_v10 = vmax.f32 %v2738_v21, 0.0 }
0x25c7   : > { %v2743_v35 = vmax.f32 %v2733_v6, 0.0  ;;  %6994 = vmatprep.subr.bf16.mxu0 %v6993_v23 }
0x25c8   : > { %6996 = vmatpush3.bf16.msra.mxu0 %v6993_v23 }
0x25c9   : > { %v6997_v37 = vpack.c.bf16 %v2744_v10, %v2743_v35 }
0x25cb   : > { %6998 = vmatprep.subr.bf16.mxu0 %v6997_v37 }
0x25cc   : > { %7000 = vmatpush3.bf16.msra.mxu0 %v6997_v37 }
0x25cd   : > { %7002 = vmatprep.subr.bf16.mxu0 %v7914_v11 }
0x25cf   : > { %6230 = vmatmul.mubr.msk.f32.vlgmr.msra.gmra.mrb[16].mxu0 %vm127_vm0, %v7900_v1 }
0x25d0   : > { %6232 = vmatprep.mubr.msk.f32.mxu0 %vm127_vm0, %v7902_v2  ;;  %7004 = vmatpush3.bf16.msra.mxu0 %v7914_v11 }
0x25d1   : > { %7006 = vmatprep.subr.bf16.mxu0 %v7916_v15 }
0x25d3   : > { %6233 = vmatmul.mubr.msk.f32.gmra.mrb[18].mxu0 %vm127_vm0, %v7904_v3 }
0x25d4   : > { %7008 = vmatpush3.bf16.msra.mxu0 %v7916_v15 }
0x25d5   : > { %7010 = vmatprep.subr.bf16.mxu0 %v7918_v19 }
0x25d8   : > { %7012 = vmatpush3.bf16.msra.mxu0 %v7918_v19 }
0x25d9   : > { %7014 = vmatprep.subr.bf16.mxu0 %v7920_v20 }
0x25dc   : > { %7016 = vmatpush3.bf16.msra.mxu0 %v7920_v20 }
0x25dd   : > { %7018 = vmatprep.subr.bf16.mxu0 %v7922_v24 }
0x25e0   : > { %7020 = vmatpush3.bf16.msra.mxu0 %v7922_v24 }
0x25e1   : > { %7022 = vmatprep.subr.bf16.mxu0 %v7926_v28 }
0x25e4   : > { %7024 = vmatpush3.bf16.msra.mxu0 %v7926_v28 }
0x25e5   : > { %7026 = vmatprep.subr.bf16.mxu0 %v7928_v29 }
0x25e8   : > { %7028 = vmatpush3.bf16.msra.mxu0 %v7928_v29 }
0x25e9   : > { %7030 = vmatprep.subr.bf16.mxu0 %v7936_v33 }
0x25ec   : > { %7032 = vmatpush3.bf16.msra.mxu0 %v7936_v33 }
0x26a2   : > { %v6231_v25 = vpop.f32.mrb[16].mxu0 }
0x26a3   : > { %v2811_v26 = vpop.f32.mrb[17].mxu0 }
0x26a4   : > { %6267 = vmatprep.mubr.f32.mxu0 %v2811_v26 }
0x26a5   : > { %6268 = vmatmul.mubr.f32.vlgmr.msra.gmra.mrb[20].mxu0 %v6231_v25 }
0x26a6   : > { %v6234_v38 = vpop.f32.mrb[18].mxu0 }
0x26a7   : > { %v2821_v39 = vpop.f32.mrb[19].mxu0 }
0x26a8   : > { %6270 = vmatprep.mubr.f32.mxu0 %v2821_v39 }
0x26a9   : > { %6271 = vmatmul.mubr.f32.gmra.mrb[22].mxu0 %v6234_v38 }
0x26aa   : > { %6333 = vmatprep.mubr.msk.f32.mxu0 %vm127_vm0, %v7898_v0 }
0x2778   : > { %v6269_v40 = vpop.f32.mrb[20].mxu0 }
0x2779   : > { %v2902_v41 = vadd.f32 %v6269_v40, %v7930_v30  ;;  %v2896_v42 = vpop.f32.mrb[21].mxu0 }
0x277a   : > { %v2897_v43 = vadd.f32 %v2896_v42, %v7924_v27 }
0x277b   : > { %v2916_v44 = vmax.f32 %v2902_v41, 0.0 }
0x277c   : > { %v2915_v45 = vmax.f32 %v2897_v43, 0.0  ;;  %v6272_v46 = vpop.f32.mrb[22].mxu0 }
0x277d   : > { %v2912_v47 = vadd.f32 %v6272_v46, %v7934_v32  ;;  %v2906_v48 = vpop.f32.mrb[23].mxu0 }
0x277e   : > { %v7033_v49 = vpack.c.bf16 %v2916_v44, %v2915_v45  ;;  %v2907_v50 = vadd.f32 %v2906_v48, %v7932_v31 }
0x277f   : > { %v2918_v51 = vmax.f32 %v2912_v47, 0.0 }
0x2780   : > { %v2917_v52 = vmax.f32 %v2907_v50, 0.0  ;;  %7034 = vmatprep.subr.bf16.mxu1 %v7033_v49 }
0x2781   : > { %7036 = vmatpush3.bf16.msra.mxu1 %v7033_v49 }
0x2782   : > { %v7037_v53 = vpack.c.bf16 %v2918_v51, %v2917_v52 }
0x2784   : > { %7038 = vmatprep.subr.bf16.mxu1 %v7037_v53 }
0x2785   : > { %7040 = vmatpush3.bf16.msra.mxu1 %v7037_v53 }
0x2786   : > { %7042 = vmatprep.subr.bf16.mxu1 %v7914_v11 }
0x2788   : > { %6282 = vmatmul.mubr.msk.f32.vlgmr.msra.gmra.mrb[24].mxu1 %vm127_vm0, %v7900_v1 }
0x2789   : > { %6284 = vmatprep.mubr.msk.f32.mxu1 %vm127_vm0, %v7902_v2  ;;  %7044 = vmatpush3.bf16.msra.mxu1 %v7914_v11 }
0x278a   : > { %7046 = vmatprep.subr.bf16.mxu1 %v7916_v15 }
0x278c   : > { %6285 = vmatmul.mubr.msk.f32.gmra.mrb[26].mxu1 %vm127_vm0, %v7904_v3 }
0x278d   : > { %7048 = vmatpush3.bf16.msra.mxu1 %v7916_v15 }
0x278e   : > { %7050 = vmatprep.subr.bf16.mxu1 %v7918_v19 }
0x2791   : > { %7052 = vmatpush3.bf16.msra.mxu1 %v7918_v19 }
0x2792   : > { %7054 = vmatprep.subr.bf16.mxu1 %v7920_v20 }
0x2795   : > { %7056 = vmatpush3.bf16.msra.mxu1 %v7920_v20 }
0x2796   : > { %7058 = vmatprep.subr.bf16.mxu1 %v7922_v24 }
0x2799   : > { %7060 = vmatpush3.bf16.msra.mxu1 %v7922_v24 }
0x279a   : > { %7062 = vmatprep.subr.bf16.mxu1 %v7926_v28 }
0x279d   : > { %7064 = vmatpush3.bf16.msra.mxu1 %v7926_v28 }
0x279e   : > { %7066 = vmatprep.subr.bf16.mxu1 %v7928_v29 }
0x27a1   : > { %7068 = vmatpush3.bf16.msra.mxu1 %v7928_v29 }
0x27a2   : > { %7070 = vmatprep.subr.bf16.mxu1 %v7936_v33 }
0x27a5   : > { %7072 = vmatpush3.bf16.msra.mxu1 %v7936_v33 }
0x285b   : > { %v6283_v54 = vpop.f32.mrb[24].mxu1 }
0x285c   : > { %v2985_v55 = vpop.f32.mrb[25].mxu1 }
0x285d   : > { %6319 = vmatprep.mubr.f32.mxu1 %v2985_v55 }
0x285e   : > { %6320 = vmatmul.mubr.f32.vlgmr.msra.gmra.mrb[28].mxu1 %v6283_v54 }
0x285f   : > { %v6286_v56 = vpop.f32.mrb[26].mxu1 }
0x2860   : > { %v2995_v58 = vpop.f32.mrb[27].mxu1 }
0x2861   : > { %6322 = vmatprep.mubr.f32.mxu1 %v2995_v58 }
0x2862   : > { %6323 = vmatmul.mubr.f32.gmra.mrb[30].mxu1 %v6286_v56 }
0x2863   : > { %6385 = vmatprep.mubr.msk.f32.mxu1 %vm127_vm0, %v7898_v0 }
0x2931   : > { %v6321_v59 = vpop.f32.mrb[28].mxu1 }
0x2932   : > { %v3076_v61 = vadd.f32 %v6321_v59, %v7930_v30  ;;  %v3070_v62 = vpop.f32.mrb[29].mxu1 }
0x2933   : > { %v3071_v4 = vadd.f32 %v3070_v62, %v7924_v27 }
0x2934   : > { %v3090_v7 = vmax.f32 %v3076_v61, 0.0 }
0x2935   : > { %v3089_v8 = vmax.f32 %v3071_v4, 0.0  ;;  %v6324_v9 = vpop.f32.mrb[30].mxu1 }
0x2936   : > { %v3086_v12 = vadd.f32 %v6324_v9, %v7934_v32  ;;  %v3080_v13 = vpop.f32.mrb[31].mxu1 }
0x2937   : > { %v7073_v14 = vpack.c.bf16 %v3090_v7, %v3089_v8  ;;  %v3081_v16 = vadd.f32 %v3080_v13, %v7932_v31 }
0x2938   : > { %v3092_v17 = vmax.f32 %v3086_v12, 0.0 }
0x2939   : > { %v3091_v18 = vmax.f32 %v3081_v16, 0.0  ;;  %7074 = vmatprep.subr.bf16.mxu0 %v7073_v14 }
0x293a   : > { %7076 = vmatpush3.bf16.msra.mxu0 %v7073_v14 }
0x293b   : > { %v7077_v36 = vpack.c.bf16 %v3092_v17, %v3091_v18 }
0x293d   : > { %7078 = vmatprep.subr.bf16.mxu0 %v7077_v36 }
0x293e   : > { %7080 = vmatpush3.bf16.msra.mxu0 %v7077_v36 }
0x293f   : > { %7082 = vmatprep.subr.bf16.mxu0 %v7914_v11 }
0x2941   : > { %6334 = vmatmul.mubr.msk.f32.vlgmr.msra.gmra.mrb[24].mxu0 %vm127_vm0, %v7900_v1 }
0x2942   : > { %6336 = vmatprep.mubr.msk.f32.mxu0 %vm127_vm0, %v7902_v2  ;;  %7084 = vmatpush3.bf16.msra.mxu0 %v7914_v11 }
0x2943   : > { %7086 = vmatprep.subr.bf16.mxu0 %v7916_v15 }
0x2945   : > { %6337 = vmatmul.mubr.msk.f32.gmra.mrb[26].mxu0 %vm127_vm0, %v7904_v3 }
0x2946   : > { %7088 = vmatpush3.bf16.msra.mxu0 %v7916_v15 }
0x2947   : > { %7090 = vmatprep.subr.bf16.mxu0 %v7918_v19 }
0x294a   : > { %7092 = vmatpush3.bf16.msra.mxu0 %v7918_v19 }
0x294b   : > { %7094 = vmatprep.subr.bf16.mxu0 %v7920_v20 }
0x294e   : > { %7096 = vmatpush3.bf16.msra.mxu0 %v7920_v20 }
0x294f   : > { %7098 = vmatprep.subr.bf16.mxu0 %v7922_v24 }
0x2952   : > { %7100 = vmatpush3.bf16.msra.mxu0 %v7922_v24 }
0x2953   : > { %7102 = vmatprep.subr.bf16.mxu0 %v7926_v28 }
0x2956   : > { %7104 = vmatpush3.bf16.msra.mxu0 %v7926_v28 }
0x2957   : > { %7106 = vmatprep.subr.bf16.mxu0 %v7928_v29 }
0x295a   : > { %7108 = vmatpush3.bf16.msra.mxu0 %v7928_v29 }
0x295b   : > { %7110 = vmatprep.subr.bf16.mxu0 %v7936_v33 }
0x295e   : > { %7112 = vmatpush3.bf16.msra.mxu0 %v7936_v33 }
0x2a14   : > { %v6335_v34 = vpop.f32.mrb[24].mxu0 }
0x2a15   : > { %v3159_v21 = vpop.f32.mrb[25].mxu0 }
0x2a16   : > { %6371 = vmatprep.mubr.f32.mxu0 %v3159_v21 }
0x2a17   : > { %6372 = vmatmul.mubr.f32.vlgmr.msra.gmra.mrb[28].mxu0 %v6335_v34 }
0x2a18   : > { %v6338_v22 = vpop.f32.mrb[26].mxu0 }
0x2a19   : > { %v3169_v23 = vpop.f32.mrb[27].mxu0 }
0x2a1a   : > { %6374 = vmatprep.mubr.f32.mxu0 %v3169_v23 }
0x2a1b   : > { %6375 = vmatmul.mubr.f32.gmra.mrb[30].mxu0 %v6338_v22 }
0x2a1c   : > { %6437 = vmatprep.mubr.msk.f32.mxu0 %vm127_vm0, %v7898_v0 }
0x2aea   : > { %v6373_v6 = vpop.f32.mrb[28].mxu0 }
0x2aeb   : > { %v3250_v10 = vadd.f32 %v6373_v6, %v7930_v30  ;;  %v3244_v35 = vpop.f32.mrb[29].mxu0 }
0x2aec   : > { %v3245_v37 = vadd.f32 %v3244_v35, %v7924_v27 }
0x2aed   : > { %v3264_v25 = vmax.f32 %v3250_v10, 0.0 }
0x2aee   : > { %v3263_v26 = vmax.f32 %v3245_v37, 0.0  ;;  %v6376_v38 = vpop.f32.mrb[30].mxu0 }
0x2aef   : > { %v3260_v39 = vadd.f32 %v6376_v38, %v7934_v32  ;;  %v3254_v40 = vpop.f32.mrb[31].mxu0 }
0x2af0   : > { %v7113_v41 = vpack.c.bf16 %v3264_v25, %v3263_v26  ;;  %v3255_v42 = vadd.f32 %v3254_v40, %v7932_v31 }
0x2af1   : > { %v3266_v43 = vmax.f32 %v3260_v39, 0.0 }
0x2af2   : > { %v3265_v44 = vmax.f32 %v3255_v42, 0.0  ;;  %7114 = vmatprep.subr.bf16.mxu1 %v7113_v41 }
0x2af3   : > { %7116 = vmatpush3.bf16.msra.mxu1 %v7113_v41 }
0x2af4   : > { %v7117_v45 = vpack.c.bf16 %v3266_v43, %v3265_v44 }
0x2af6   : > { %7118 = vmatprep.subr.bf16.mxu1 %v7117_v45 }
0x2af7   : > { %7120 = vmatpush3.bf16.msra.mxu1 %v7117_v45 }
0x2af8   : > { %7122 = vmatprep.subr.bf16.mxu1 %v7914_v11 }
0x2afa   : > { %6386 = vmatmul.mubr.msk.f32.vlgmr.msra.gmra.mrb[32].mxu1 %vm127_vm0, %v7900_v1 }
0x2afb   : > { %6388 = vmatprep.mubr.msk.f32.mxu1 %vm127_vm0, %v7902_v2  ;;  %7124 = vmatpush3.bf16.msra.mxu1 %v7914_v11 }
0x2afc   : > { %7126 = vmatprep.subr.bf16.mxu1 %v7916_v15 }
0x2afe   : > { %6389 = vmatmul.mubr.msk.f32.gmra.mrb[34].mxu1 %vm127_vm0, %v7904_v3 }
0x2aff   : > { %7128 = vmatpush3.bf16.msra.mxu1 %v7916_v15 }
0x2b00   : > { %7130 = vmatprep.subr.bf16.mxu1 %v7918_v19 }
0x2b03   : > { %7132 = vmatpush3.bf16.msra.mxu1 %v7918_v19 }
0x2b04   : > { %7134 = vmatprep.subr.bf16.mxu1 %v7920_v20 }
0x2b07   : > { %7136 = vmatpush3.bf16.msra.mxu1 %v7920_v20 }
0x2b08   : > { %7138 = vmatprep.subr.bf16.mxu1 %v7922_v24 }
0x2b0b   : > { %7140 = vmatpush3.bf16.msra.mxu1 %v7922_v24 }
0x2b0c   : > { %7142 = vmatprep.subr.bf16.mxu1 %v7926_v28 }
0x2b0f   : > { %7144 = vmatpush3.bf16.msra.mxu1 %v7926_v28 }
0x2b10   : > { %7146 = vmatprep.subr.bf16.mxu1 %v7928_v29 }
0x2b13   : > { %7148 = vmatpush3.bf16.msra.mxu1 %v7928_v29 }
0x2b14   : > { %7150 = vmatprep.subr.bf16.mxu1 %v7936_v33 }
0x2b17   : > { %7152 = vmatpush3.bf16.msra.mxu1 %v7936_v33 }
0x2bcd   : > { %v6387_v46 = vpop.f32.mrb[32].mxu1 }
0x2bce   : > { %v3333_v47 = vpop.f32.mrb[33].mxu1 }
0x2bcf   : > { %6423 = vmatprep.mubr.f32.mxu1 %v3333_v47 }
0x2bd0   : > { %6424 = vmatmul.mubr.f32.vlgmr.msra.gmra.mrb[36].mxu1 %v6387_v46 }
0x2bd1   : > { %v6390_v48 = vpop.f32.mrb[34].mxu1 }
0x2bd2   : > { %v3343_v49 = vpop.f32.mrb[35].mxu1 }
0x2bd3   : > { %6426 = vmatprep.mubr.f32.mxu1 %v3343_v49 }
0x2bd4   : > { %6427 = vmatmul.mubr.f32.gmra.mrb[38].mxu1 %v6390_v48 }
0x2bd5   : > { %6489 = vmatprep.mubr.msk.f32.mxu1 %vm127_vm0, %v7898_v0 }
0x2ca3   : > { %v6425_v50 = vpop.f32.mrb[36].mxu1 }
0x2ca4   : > { %v3424_v51 = vadd.f32 %v6425_v50, %v7930_v30  ;;  %v3418_v52 = vpop.f32.mrb[37].mxu1 }
0x2ca5   : > { %v3419_v53 = vadd.f32 %v3418_v52, %v7924_v27 }
0x2ca6   : > { %v3438_v54 = vmax.f32 %v3424_v51, 0.0 }
0x2ca7   : > { %v3437_v55 = vmax.f32 %v3419_v53, 0.0  ;;  %v6428_v56 = vpop.f32.mrb[38].mxu1 }
0x2ca8   : > { %v3434_v58 = vadd.f32 %v6428_v56, %v7934_v32  ;;  %v3428_v59 = vpop.f32.mrb[39].mxu1 }
0x2ca9   : > { %v7153_v61 = vpack.c.bf16 %v3438_v54, %v3437_v55  ;;  %v3429_v62 = vadd.f32 %v3428_v59, %v7932_v31 }
0x2caa   : > { %v3440_v4 = vmax.f32 %v3434_v58, 0.0 }
0x2cab   : > { %v3439_v7 = vmax.f32 %v3429_v62, 0.0  ;;  %7154 = vmatprep.subr.bf16.mxu0 %v7153_v61 }
0x2cac   : > { %7156 = vmatpush3.bf16.msra.mxu0 %v7153_v61 }
0x2cad   : > { %v7157_v8 = vpack.c.bf16 %v3440_v4, %v3439_v7 }
0x2caf   : > { %7158 = vmatprep.subr.bf16.mxu0 %v7157_v8 }
0x2cb0   : > { %7160 = vmatpush3.bf16.msra.mxu0 %v7157_v8 }
0x2cb1   : > { %7162 = vmatprep.subr.bf16.mxu0 %v7914_v11 }
0x2cb3   : > { %6438 = vmatmul.mubr.msk.f32.vlgmr.msra.gmra.mrb[32].mxu0 %vm127_vm0, %v7900_v1 }
0x2cb4   : > { %6440 = vmatprep.mubr.msk.f32.mxu0 %vm127_vm0, %v7902_v2  ;;  %7164 = vmatpush3.bf16.msra.mxu0 %v7914_v11 }
0x2cb5   : > { %7166 = vmatprep.subr.bf16.mxu0 %v7916_v15 }
0x2cb7   : > { %6441 = vmatmul.mubr.msk.f32.gmra.mrb[34].mxu0 %vm127_vm0, %v7904_v3 }
0x2cb8   : > { %7168 = vmatpush3.bf16.msra.mxu0 %v7916_v15 }
0x2cb9   : > { %7170 = vmatprep.subr.bf16.mxu0 %v7918_v19 }
0x2cbc   : > { %7172 = vmatpush3.bf16.msra.mxu0 %v7918_v19 }
0x2cbd   : > { %7174 = vmatprep.subr.bf16.mxu0 %v7920_v20 }
0x2cc0   : > { %7176 = vmatpush3.bf16.msra.mxu0 %v7920_v20 }
0x2cc1   : > { %7178 = vmatprep.subr.bf16.mxu0 %v7922_v24 }
0x2cc4   : > { %7180 = vmatpush3.bf16.msra.mxu0 %v7922_v24 }
0x2cc5   : > { %7182 = vmatprep.subr.bf16.mxu0 %v7926_v28 }
0x2cc8   : > { %7184 = vmatpush3.bf16.msra.mxu0 %v7926_v28 }
0x2cc9   : > { %7186 = vmatprep.subr.bf16.mxu0 %v7928_v29 }
0x2ccc   : > { %7188 = vmatpush3.bf16.msra.mxu0 %v7928_v29 }
0x2ccd   : > { %7190 = vmatprep.subr.bf16.mxu0 %v7936_v33 }
0x2cd0   : > { %7192 = vmatpush3.bf16.msra.mxu0 %v7936_v33 }
0x2d86   : > { %v6439_v9 = vpop.f32.mrb[32].mxu0 }
0x2d87   : > { %v3507_v12 = vpop.f32.mrb[33].mxu0 }
0x2d88   : > { %6475 = vmatprep.mubr.f32.mxu0 %v3507_v12 }
0x2d89   : > { %6476 = vmatmul.mubr.f32.vlgmr.msra.gmra.mrb[36].mxu0 %v6439_v9 }
0x2d8a   : > { %v6442_v13 = vpop.f32.mrb[34].mxu0 }
0x2d8b   : > { %v3517_v14 = vpop.f32.mrb[35].mxu0 }
0x2d8c   : > { %6478 = vmatprep.mubr.f32.mxu0 %v3517_v14 }
0x2d8d   : > { %6479 = vmatmul.mubr.f32.gmra.mrb[38].mxu0 %v6442_v13 }
0x2d8e   : > { %6541 = vmatprep.mubr.msk.f32.mxu0 %vm127_vm0, %v7898_v0 }
0x2e5c   : > { %v6477_v16 = vpop.f32.mrb[36].mxu0 }
0x2e5d   : > { %v3598_v17 = vadd.f32 %v6477_v16, %v7930_v30  ;;  %v3592_v18 = vpop.f32.mrb[37].mxu0 }
0x2e5e   : > { %v3593_v36 = vadd.f32 %v3592_v18, %v7924_v27 }
0x2e5f   : > { %v3612_v34 = vmax.f32 %v3598_v17, 0.0 }
0x2e60   : > { %v3611_v21 = vmax.f32 %v3593_v36, 0.0  ;;  %v6480_v22 = vpop.f32.mrb[38].mxu0 }
0x2e61   : > { %v3608_v23 = vadd.f32 %v6480_v22, %v7934_v32  ;;  %v3602_v6 = vpop.f32.mrb[39].mxu0 }
0x2e62   : > { %v7193_v10 = vpack.c.bf16 %v3612_v34, %v3611_v21  ;;  %v3603_v35 = vadd.f32 %v3602_v6, %v7932_v31 }
0x2e63   : > { %v3614_v37 = vmax.f32 %v3608_v23, 0.0 }
0x2e64   : > { %v3613_v25 = vmax.f32 %v3603_v35, 0.0  ;;  %7194 = vmatprep.subr.bf16.mxu1 %v7193_v10 }
0x2e65   : > { %7196 = vmatpush3.bf16.msra.mxu1 %v7193_v10 }
0x2e66   : > { %v7197_v26 = vpack.c.bf16 %v3614_v37, %v3613_v25 }
0x2e68   : > { %7198 = vmatprep.subr.bf16.mxu1 %v7197_v26 }
0x2e69   : > { %7200 = vmatpush3.bf16.msra.mxu1 %v7197_v26 }
0x2e6a   : > { %7202 = vmatprep.subr.bf16.mxu1 %v7914_v11 }
0x2e6c   : > { %6490 = vmatmul.mubr.msk.f32.vlgmr.msra.gmra.mrb[40].mxu1 %vm127_vm0, %v7900_v1 }
0x2e6d   : > { %6492 = vmatprep.mubr.msk.f32.mxu1 %vm127_vm0, %v7902_v2  ;;  %7204 = vmatpush3.bf16.msra.mxu1 %v7914_v11 }
0x2e6e   : > { %7206 = vmatprep.subr.bf16.mxu1 %v7916_v15 }
0x2e70   : > { %6493 = vmatmul.mubr.msk.f32.gmra.mrb[42].mxu1 %vm127_vm0, %v7904_v3 }
0x2e71   : > { %7208 = vmatpush3.bf16.msra.mxu1 %v7916_v15 }
0x2e72   : > { %7210 = vmatprep.subr.bf16.mxu1 %v7918_v19 }
0x2e75   : > { %7212 = vmatpush3.bf16.msra.mxu1 %v7918_v19 }
0x2e76   : > { %7214 = vmatprep.subr.bf16.mxu1 %v7920_v20 }
0x2e79   : > { %7216 = vmatpush3.bf16.msra.mxu1 %v7920_v20 }
0x2e7a   : > { %7218 = vmatprep.subr.bf16.mxu1 %v7922_v24 }
0x2e7d   : > { %7220 = vmatpush3.bf16.msra.mxu1 %v7922_v24 }
0x2e7e   : > { %7222 = vmatprep.subr.bf16.mxu1 %v7926_v28 }
0x2e81   : > { %7224 = vmatpush3.bf16.msra.mxu1 %v7926_v28 }
0x2e82   : > { %7226 = vmatprep.subr.bf16.mxu1 %v7928_v29 }
0x2e85   : > { %7228 = vmatpush3.bf16.msra.mxu1 %v7928_v29 }
0x2e86   : > { %7230 = vmatprep.subr.bf16.mxu1 %v7936_v33 }
0x2e89   : > { %7232 = vmatpush3.bf16.msra.mxu1 %v7936_v33 }
0x2f3f   : > { %v6491_v38 = vpop.f32.mrb[40].mxu1 }
0x2f40   : > { %v3681_v39 = vpop.f32.mrb[41].mxu1 }
0x2f41   : > { %6527 = vmatprep.mubr.f32.mxu1 %v3681_v39 }
0x2f42   : > { %6528 = vmatmul.mubr.f32.vlgmr.msra.gmra.mrb[44].mxu1 %v6491_v38 }
0x2f43   : > { %v6494_v40 = vpop.f32.mrb[42].mxu1 }
0x2f44   : > { %v3691_v41 = vpop.f32.mrb[43].mxu1 }
0x2f45   : > { %6530 = vmatprep.mubr.f32.mxu1 %v3691_v41 }
0x2f46   : > { %6531 = vmatmul.mubr.f32.gmra.mrb[46].mxu1 %v6494_v40 }
0x2f47   : > { %6593 = vmatprep.mubr.msk.f32.mxu1 %vm127_vm0, %v7898_v0 }
0x3015   : > { %v6529_v42 = vpop.f32.mrb[44].mxu1 }
0x3016   : > { %v3772_v43 = vadd.f32 %v6529_v42, %v7930_v30  ;;  %v3766_v44 = vpop.f32.mrb[45].mxu1 }
0x3017   : > { %v3767_v45 = vadd.f32 %v3766_v44, %v7924_v27 }
0x3018   : > { %v3786_v46 = vmax.f32 %v3772_v43, 0.0 }
0x3019   : > { %v3785_v47 = vmax.f32 %v3767_v45, 0.0  ;;  %v6532_v48 = vpop.f32.mrb[46].mxu1 }
0x301a   : > { %v3782_v49 = vadd.f32 %v6532_v48, %v7934_v32  ;;  %v3776_v50 = vpop.f32.mrb[47].mxu1 }
0x301b   : > { %v7233_v51 = vpack.c.bf16 %v3786_v46, %v3785_v47  ;;  %v3777_v52 = vadd.f32 %v3776_v50, %v7932_v31 }
0x301c   : > { %v3788_v53 = vmax.f32 %v3782_v49, 0.0 }
0x301d   : > { %v3787_v54 = vmax.f32 %v3777_v52, 0.0  ;;  %7234 = vmatprep.subr.bf16.mxu0 %v7233_v51 }
0x301e   : > { %7236 = vmatpush3.bf16.msra.mxu0 %v7233_v51 }
0x301f   : > { %v7237_v55 = vpack.c.bf16 %v3788_v53, %v3787_v54 }
0x3021   : > { %7238 = vmatprep.subr.bf16.mxu0 %v7237_v55 }
0x3022   : > { %7240 = vmatpush3.bf16.msra.mxu0 %v7237_v55 }
0x3023   : > { %7242 = vmatprep.subr.bf16.mxu0 %v7914_v11 }
0x3025   : > { %6542 = vmatmul.mubr.msk.f32.vlgmr.msra.gmra.mrb[40].mxu0 %vm127_vm0, %v7900_v1 }
0x3026   : > { %6544 = vmatprep.mubr.msk.f32.mxu0 %vm127_vm0, %v7902_v2  ;;  %7244 = vmatpush3.bf16.msra.mxu0 %v7914_v11 }
0x3027   : > { %7246 = vmatprep.subr.bf16.mxu0 %v7916_v15 }
0x3029   : > { %6545 = vmatmul.mubr.msk.f32.gmra.mrb[42].mxu0 %vm127_vm0, %v7904_v3 }
0x302a   : > { %7248 = vmatpush3.bf16.msra.mxu0 %v7916_v15 }
0x302b   : > { %7250 = vmatprep.subr.bf16.mxu0 %v7918_v19 }
0x302e   : > { %7252 = vmatpush3.bf16.msra.mxu0 %v7918_v19 }
0x302f   : > { %7254 = vmatprep.subr.bf16.mxu0 %v7920_v20 }
0x3032   : > { %7256 = vmatpush3.bf16.msra.mxu0 %v7920_v20 }
0x3033   : > { %7258 = vmatprep.subr.bf16.mxu0 %v7922_v24 }
0x3036   : > { %7260 = vmatpush3.bf16.msra.mxu0 %v7922_v24 }
0x3037   : > { %7262 = vmatprep.subr.bf16.mxu0 %v7926_v28 }
0x303a   : > { %7264 = vmatpush3.bf16.msra.mxu0 %v7926_v28 }
0x303b   : > { %7266 = vmatprep.subr.bf16.mxu0 %v7928_v29 }
0x303e   : > { %7268 = vmatpush3.bf16.msra.mxu0 %v7928_v29 }
0x303f   : > { %7270 = vmatprep.subr.bf16.mxu0 %v7936_v33 }
0x3042   : > { %7272 = vmatpush3.bf16.msra.mxu0 %v7936_v33 }
0x30f8   : > { %v6543_v56 = vpop.f32.mrb[40].mxu0 }
0x30f9   : > { %v3855_v58 = vpop.f32.mrb[41].mxu0 }
0x30fa   : > { %6579 = vmatprep.mubr.f32.mxu0 %v3855_v58 }
0x30fb   : > { %6580 = vmatmul.mubr.f32.vlgmr.msra.gmra.mrb[44].mxu0 %v6543_v56 }
0x30fc   : > { %v6546_v59 = vpop.f32.mrb[42].mxu0 }
0x30fd   : > { %v3865_v61 = vpop.f32.mrb[43].mxu0 }
0x30fe   : > { %6582 = vmatprep.mubr.f32.mxu0 %v3865_v61 }
0x30ff   : > { %6583 = vmatmul.mubr.f32.gmra.mrb[46].mxu0 %v6546_v59 }
0x3100   : > { %6645 = vmatprep.mubr.msk.f32.mxu0 %vm127_vm0, %v7898_v0 }
0x31ce   : > { %v6581_v62 = vpop.f32.mrb[44].mxu0 }
0x31cf   : > { %v3946_v4 = vadd.f32 %v6581_v62, %v7930_v30  ;;  %v3940_v7 = vpop.f32.mrb[45].mxu0 }
0x31d0   : > { %v3941_v8 = vadd.f32 %v3940_v7, %v7924_v27 }
0x31d1   : > { %v3960_v9 = vmax.f32 %v3946_v4, 0.0 }
0x31d2   : > { %v3959_v12 = vmax.f32 %v3941_v8, 0.0  ;;  %v6584_v13 = vpop.f32.mrb[46].mxu0 }
0x31d3   : > { %v3956_v14 = vadd.f32 %v6584_v13, %v7934_v32  ;;  %v3950_v16 = vpop.f32.mrb[47].mxu0 }
0x31d4   : > { %v7273_v17 = vpack.c.bf16 %v3960_v9, %v3959_v12  ;;  %v3951_v18 = vadd.f32 %v3950_v16, %v7932_v31 }
0x31d5   : > { %v3962_v36 = vmax.f32 %v3956_v14, 0.0 }
0x31d6   : > { %v3961_v34 = vmax.f32 %v3951_v18, 0.0  ;;  %7274 = vmatprep.subr.bf16.mxu1 %v7273_v17 }
0x31d7   : > { %7276 = vmatpush3.bf16.msra.mxu1 %v7273_v17 }
0x31d8   : > { %v7277_v21 = vpack.c.bf16 %v3962_v36, %v3961_v34 }
0x31da   : > { %7278 = vmatprep.subr.bf16.mxu1 %v7277_v21 }
0x31db   : > { %7280 = vmatpush3.bf16.msra.mxu1 %v7277_v21 }
0x31dc   : > { %7282 = vmatprep.subr.bf16.mxu1 %v7914_v11 }
0x31de   : > { %6594 = vmatmul.mubr.msk.f32.vlgmr.msra.gmra.mrb[48].mxu1 %vm127_vm0, %v7900_v1 }
0x31df   : > { %6596 = vmatprep.mubr.msk.f32.mxu1 %vm127_vm0, %v7902_v2  ;;  %7284 = vmatpush3.bf16.msra.mxu1 %v7914_v11 }
0x31e0   : > { %7286 = vmatprep.subr.bf16.mxu1 %v7916_v15 }
0x31e2   : > { %6597 = vmatmul.mubr.msk.f32.gmra.mrb[50].mxu1 %vm127_vm0, %v7904_v3 }
0x31e3   : > { %7288 = vmatpush3.bf16.msra.mxu1 %v7916_v15 }
0x31e4   : > { %7290 = vmatprep.subr.bf16.mxu1 %v7918_v19 }
0x31e7   : > { %7292 = vmatpush3.bf16.msra.mxu1 %v7918_v19 }
0x31e8   : > { %7294 = vmatprep.subr.bf16.mxu1 %v7920_v20 }
0x31eb   : > { %7296 = vmatpush3.bf16.msra.mxu1 %v7920_v20 }
0x31ec   : > { %7298 = vmatprep.subr.bf16.mxu1 %v7922_v24 }
0x31ef   : > { %7300 = vmatpush3.bf16.msra.mxu1 %v7922_v24 }
0x31f0   : > { %7302 = vmatprep.subr.bf16.mxu1 %v7926_v28 }
0x31f3   : > { %7304 = vmatpush3.bf16.msra.mxu1 %v7926_v28 }
0x31f4   : > { %7306 = vmatprep.subr.bf16.mxu1 %v7928_v29 }
0x31f7   : > { %7308 = vmatpush3.bf16.msra.mxu1 %v7928_v29 }
0x31f8   : > { %7310 = vmatprep.subr.bf16.mxu1 %v7936_v33 }
0x31fb   : > { %7312 = vmatpush3.bf16.msra.mxu1 %v7936_v33 }
0x32b1   : > { %v6595_v22 = vpop.f32.mrb[48].mxu1 }
0x32b2   : > { %v4029_v23 = vpop.f32.mrb[49].mxu1 }
0x32b3   : > { %6631 = vmatprep.mubr.f32.mxu1 %v4029_v23 }
0x32b4   : > { %6632 = vmatmul.mubr.f32.vlgmr.msra.gmra.mrb[52].mxu1 %v6595_v22 }
0x32b5   : > { %v6598_v6 = vpop.f32.mrb[50].mxu1 }
0x32b6   : > { %v4039_v10 = vpop.f32.mrb[51].mxu1 }
0x32b7   : > { %6634 = vmatprep.mubr.f32.mxu1 %v4039_v10 }
0x32b8   : > { %6635 = vmatmul.mubr.f32.gmra.mrb[54].mxu1 %v6598_v6 }
0x32b9   : > { %6697 = vmatprep.mubr.msk.f32.mxu1 %vm127_vm0, %v7898_v0 }
0x3387   : > { %v6633_v35 = vpop.f32.mrb[52].mxu1 }
0x3388   : > { %v4120_v37 = vadd.f32 %v6633_v35, %v7930_v30  ;;  %v4114_v25 = vpop.f32.mrb[53].mxu1 }
0x3389   : > { %v4115_v26 = vadd.f32 %v4114_v25, %v7924_v27 }
0x338a   : > { %v4134_v38 = vmax.f32 %v4120_v37, 0.0 }
0x338b   : > { %v4133_v39 = vmax.f32 %v4115_v26, 0.0  ;;  %v6636_v40 = vpop.f32.mrb[54].mxu1 }
0x338c   : > { %v4130_v41 = vadd.f32 %v6636_v40, %v7934_v32  ;;  %v4124_v42 = vpop.f32.mrb[55].mxu1 }
0x338d   : > { %v7313_v43 = vpack.c.bf16 %v4134_v38, %v4133_v39  ;;  %v4125_v44 = vadd.f32 %v4124_v42, %v7932_v31 }
0x338e   : > { %v4136_v45 = vmax.f32 %v4130_v41, 0.0 }
0x338f   : > { %v4135_v46 = vmax.f32 %v4125_v44, 0.0  ;;  %7314 = vmatprep.subr.bf16.mxu0 %v7313_v43 }
0x3390   : > { %7316 = vmatpush3.bf16.msra.mxu0 %v7313_v43 }
0x3391   : > { %v7317_v47 = vpack.c.bf16 %v4136_v45, %v4135_v46 }
0x3393   : > { %7318 = vmatprep.subr.bf16.mxu0 %v7317_v47 }
0x3394   : > { %7320 = vmatpush3.bf16.msra.mxu0 %v7317_v47 }
0x3395   : > { %7322 = vmatprep.subr.bf16.mxu0 %v7914_v11 }
0x3397   : > { %6646 = vmatmul.mubr.msk.f32.vlgmr.msra.gmra.mrb[48].mxu0 %vm127_vm0, %v7900_v1 }
0x3398   : > { %6648 = vmatprep.mubr.msk.f32.mxu0 %vm127_vm0, %v7902_v2  ;;  %7324 = vmatpush3.bf16.msra.mxu0 %v7914_v11 }
0x3399   : > { %7326 = vmatprep.subr.bf16.mxu0 %v7916_v15 }
0x339b   : > { %6649 = vmatmul.mubr.msk.f32.gmra.mrb[50].mxu0 %vm127_vm0, %v7904_v3 }
0x339c   : > { %7328 = vmatpush3.bf16.msra.mxu0 %v7916_v15 }
0x339d   : > { %7330 = vmatprep.subr.bf16.mxu0 %v7918_v19 }
0x33a0   : > { %7332 = vmatpush3.bf16.msra.mxu0 %v7918_v19 }
0x33a1   : > { %7334 = vmatprep.subr.bf16.mxu0 %v7920_v20 }
0x33a4   : > { %7336 = vmatpush3.bf16.msra.mxu0 %v7920_v20 }
0x33a5   : > { %7338 = vmatprep.subr.bf16.mxu0 %v7922_v24 }
0x33a8   : > { %7340 = vmatpush3.bf16.msra.mxu0 %v7922_v24 }
0x33a9   : > { %7342 = vmatprep.subr.bf16.mxu0 %v7926_v28 }
0x33ac   : > { %7344 = vmatpush3.bf16.msra.mxu0 %v7926_v28 }
0x33ad   : > { %7346 = vmatprep.subr.bf16.mxu0 %v7928_v29 }
0x33b0   : > { %7348 = vmatpush3.bf16.msra.mxu0 %v7928_v29 }
0x33b1   : > { %7350 = vmatprep.subr.bf16.mxu0 %v7936_v33 }
0x33b4   : > { %7352 = vmatpush3.bf16.msra.mxu0 %v7936_v33 }
0x346a   : > { %v6647_v48 = vpop.f32.mrb[48].mxu0 }
0x346b   : > { %v4203_v49 = vpop.f32.mrb[49].mxu0 }
0x346c   : > { %6683 = vmatprep.mubr.f32.mxu0 %v4203_v49 }
0x346d   : > { %6684 = vmatmul.mubr.f32.vlgmr.msra.gmra.mrb[52].mxu0 %v6647_v48 }
0x346e   : > { %v6650_v50 = vpop.f32.mrb[50].mxu0 }
0x346f   : > { %v4213_v51 = vpop.f32.mrb[51].mxu0 }
0x3470   : > { %6686 = vmatprep.mubr.f32.mxu0 %v4213_v51 }
0x3471   : > { %6687 = vmatmul.mubr.f32.gmra.mrb[54].mxu0 %v6650_v50 }
0x3472   : > { %6749 = vmatprep.mubr.msk.f32.mxu0 %vm127_vm0, %v7898_v0 }
0x3540   : > { %v6685_v52 = vpop.f32.mrb[52].mxu0 }
0x3541   : > { %v4294_v53 = vadd.f32 %v6685_v52, %v7930_v30  ;;  %v4288_v54 = vpop.f32.mrb[53].mxu0 }
0x3542   : > { %v4289_v55 = vadd.f32 %v4288_v54, %v7924_v27 }
0x3543   : > { %v4308_v56 = vmax.f32 %v4294_v53, 0.0 }
0x3544   : > { %v4307_v58 = vmax.f32 %v4289_v55, 0.0  ;;  %v6688_v59 = vpop.f32.mrb[54].mxu0 }
0x3545   : > { %v4304_v61 = vadd.f32 %v6688_v59, %v7934_v32  ;;  %v4298_v62 = vpop.f32.mrb[55].mxu0 }
0x3546   : > { %v7353_v4 = vpack.c.bf16 %v4308_v56, %v4307_v58  ;;  %v4299_v7 = vadd.f32 %v4298_v62, %v7932_v31 }
0x3547   : > { %v4310_v8 = vmax.f32 %v4304_v61, 0.0 }
0x3548   : > { %v4309_v9 = vmax.f32 %v4299_v7, 0.0  ;;  %7354 = vmatprep.subr.bf16.mxu1 %v7353_v4 }
0x3549   : > { %7356 = vmatpush3.bf16.msra.mxu1 %v7353_v4 }
0x354a   : > { %v7357_v12 = vpack.c.bf16 %v4310_v8, %v4309_v9 }
0x354c   : > { %7358 = vmatprep.subr.bf16.mxu1 %v7357_v12 }
0x354d   : > { %7360 = vmatpush3.bf16.msra.mxu1 %v7357_v12 }
0x354e   : > { %7362 = vmatprep.subr.bf16.mxu1 %v7914_v11 }
0x3550   : > { %6698 = vmatmul.mubr.msk.f32.vlgmr.msra.gmra.mrb[56].mxu1 %vm127_vm0, %v7900_v1 }
0x3551   : > { %6700 = vmatprep.mubr.msk.f32.mxu1 %vm127_vm0, %v7902_v2  ;;  %7364 = vmatpush3.bf16.msra.mxu1 %v7914_v11 }
0x3552   : > { %7366 = vmatprep.subr.bf16.mxu1 %v7916_v15 }
0x3554   : > { %6701 = vmatmul.mubr.msk.f32.gmra.mrb[58].mxu1 %vm127_vm0, %v7904_v3 }
0x3555   : > { %7368 = vmatpush3.bf16.msra.mxu1 %v7916_v15 }
0x3556   : > { %7370 = vmatprep.subr.bf16.mxu1 %v7918_v19 }
0x3559   : > { %7372 = vmatpush3.bf16.msra.mxu1 %v7918_v19 }
0x355a   : > { %7374 = vmatprep.subr.bf16.mxu1 %v7920_v20 }
0x355d   : > { %7376 = vmatpush3.bf16.msra.mxu1 %v7920_v20 }
0x355e   : > { %7378 = vmatprep.subr.bf16.mxu1 %v7922_v24 }
0x3561   : > { %7380 = vmatpush3.bf16.msra.mxu1 %v7922_v24 }
0x3562   : > { %7382 = vmatprep.subr.bf16.mxu1 %v7926_v28 }
0x3565   : > { %7384 = vmatpush3.bf16.msra.mxu1 %v7926_v28 }
0x3566   : > { %7386 = vmatprep.subr.bf16.mxu1 %v7928_v29 }
0x3569   : > { %7388 = vmatpush3.bf16.msra.mxu1 %v7928_v29 }
0x356a   : > { %7390 = vmatprep.subr.bf16.mxu1 %v7936_v33 }
0x356d   : > { %7392 = vmatpush3.bf16.msra.mxu1 %v7936_v33 }
0x3623   : > { %v6699_v13 = vpop.f32.mrb[56].mxu1 }
0x3624   : > { %v4377_v14 = vpop.f32.mrb[57].mxu1 }
0x3625   : > { %6735 = vmatprep.mubr.f32.mxu1 %v4377_v14 }
0x3626   : > { %6736 = vmatmul.mubr.f32.vlgmr.msra.gmra.mrb[60].mxu1 %v6699_v13 }
0x3627   : > { %v6702_v16 = vpop.f32.mrb[58].mxu1 }
0x3628   : > { %v4387_v17 = vpop.f32.mrb[59].mxu1 }
0x3629   : > { %6738 = vmatprep.mubr.f32.mxu1 %v4387_v17 }
0x362a   : > { %6739 = vmatmul.mubr.f32.gmra.mrb[62].mxu1 %v6702_v16 }
0x36f9   : > { %v6737_v18 = vpop.f32.mrb[60].mxu1 }
0x36fa   : > { %v4468_v36 = vadd.f32 %v6737_v18, %v7930_v30  ;;  %v4462_v34 = vpop.f32.mrb[61].mxu1 }
0x36fb   : > { %v4463_v21 = vadd.f32 %v4462_v34, %v7924_v27 }
0x36fc   : > { %v4482_v22 = vmax.f32 %v4468_v36, 0.0 }
0x36fd   : > { %v4481_v23 = vmax.f32 %v4463_v21, 0.0  ;;  %v6740_v6 = vpop.f32.mrb[62].mxu1 }
0x36fe   : > { %v4478_v10 = vadd.f32 %v6740_v6, %v7934_v32  ;;  %v4472_v35 = vpop.f32.mrb[63].mxu1 }
0x36ff   : > { %v7393_v37 = vpack.c.bf16 %v4482_v22, %v4481_v23  ;;  %v4473_v25 = vadd.f32 %v4472_v35, %v7932_v31 }
0x3700   : > { %v4484_v26 = vmax.f32 %v4478_v10, 0.0 }
0x3701   : > { %v4483_v38 = vmax.f32 %v4473_v25, 0.0  ;;  %7394 = vmatprep.subr.bf16.mxu0 %v7393_v37 }
0x3702   : > { %7396 = vmatpush3.bf16.msra.mxu0 %v7393_v37 }
0x3703   : > { %v7397_v39 = vpack.c.bf16 %v4484_v26, %v4483_v38 }
0x3705   : > { %7398 = vmatprep.subr.bf16.mxu0 %v7397_v39 }
0x3706   : > { %7400 = vmatpush3.bf16.msra.mxu0 %v7397_v39 }
0x3707   : > { %7402 = vmatprep.subr.bf16.mxu0 %v7914_v11 }
0x3709   : > { %6750 = vmatmul.mubr.msk.f32.vlgmr.msra.gmra.mrb[56].mxu0 %vm127_vm0, %v7900_v1 }
0x370a   : > { %6752 = vmatprep.mubr.msk.f32.mxu0 %vm127_vm0, %v7902_v2  ;;  %7404 = vmatpush3.bf16.msra.mxu0 %v7914_v11 }
0x370b   : > { %7406 = vmatprep.subr.bf16.mxu0 %v7916_v15 }
0x370d   : > { %6753 = vmatmul.mubr.msk.f32.gmra.mrb[58].mxu0 %vm127_vm0, %v7904_v3 }
0x370e   : > { %7408 = vmatpush3.bf16.msra.mxu0 %v7916_v15 }
0x370f   : > { %7410 = vmatprep.subr.bf16.mxu0 %v7918_v19 }
0x3712   : > { %7412 = vmatpush3.bf16.msra.mxu0 %v7918_v19 }
0x3713   : > { %7414 = vmatprep.subr.bf16.mxu0 %v7920_v20 }
0x3716   : > { %7416 = vmatpush3.bf16.msra.mxu0 %v7920_v20 }
0x3717   : > { %7418 = vmatprep.subr.bf16.mxu0 %v7922_v24 }
0x371a   : > { %7420 = vmatpush3.bf16.msra.mxu0 %v7922_v24 }
0x371b   : > { %7422 = vmatprep.subr.bf16.mxu0 %v7926_v28 }
0x371e   : > { %7424 = vmatpush3.bf16.msra.mxu0 %v7926_v28 }
0x371f   : > { %7426 = vmatprep.subr.bf16.mxu0 %v7928_v29 }
0x3722   : > { %7428 = vmatpush3.bf16.msra.mxu0 %v7928_v29 }
0x3723   : > { %7430 = vmatprep.subr.bf16.mxu0 %v7936_v33 }
0x3726   : > { %7432 = vmatpush3.bf16.msra.mxu0 %v7936_v33 }
0x37dc   : > { %v6751_v40 = vpop.f32.mrb[56].mxu0 }
0x37dd   : > { %v4551_v41 = vpop.f32.mrb[57].mxu0 }
0x37de   : > { %6787 = vmatprep.mubr.f32.mxu0 %v4551_v41 }
0x37df   : > { %6788 = vmatmul.mubr.f32.vlgmr.msra.gmra.mrb[60].mxu0 %v6751_v40 }
0x37e0   : > { %v6754_v42 = vpop.f32.mrb[58].mxu0 }
0x37e1   : > { %v4561_v43 = vpop.f32.mrb[59].mxu0 }
0x37e2   : > { %6790 = vmatprep.mubr.f32.mxu0 %v4561_v43 }
0x37e3   : > { %6791 = vmatmul.mubr.f32.gmra.mrb[62].mxu0 %v6754_v42 }
0x38b2   : > { %v6789_v44 = vpop.f32.mrb[60].mxu0 }
0x38b3   : > { %v4642_v45 = vadd.f32 %v6789_v44, %v7930_v30  ;;  %v4636_v46 = vpop.f32.mrb[61].mxu0 }
0x38b4   : > { %v4637_v47 = vadd.f32 %v4636_v46, %v7924_v27 }
0x38b5   : > { %v4656_v48 = vmax.f32 %v4642_v45, 0.0  }
0x38b6   : > { %v4655_v49 = vmax.f32 %v4637_v47, 0.0   ;;  %v6792_v50 = vpop.f32.mrb[62].mxu0 }
0x38b7   : > { %v4660_v51 = vsub.f32 %v4656_v48, %v7766_v5  ;;  %v4652_v52 = vadd.f32 %v6792_v50, %v7934_v32  ;;  %v4646_v53 = vpop.f32.mrb[63].mxu0 }
0x38b8   : > { %v4659_v54 = vsub.f32 %v4655_v49, %v7770_v60  ;;  %v4647_v55 = vadd.f32 %v4646_v53, %v7932_v31 }
0x38b9   : > { %v4658_v56 = vmax.f32 %v4652_v52, 0.0  }
0x38ba   : > { %v4657_v58 = vmax.f32 %v4647_v55, 0.0   ;;  %7733 = vmaxabs.init.f32.vacc1 %v4660_v51, %v4659_v54 }
0x38bb   : > { %v4662_v59 = vsub.f32 %v4658_v56, %v7758_v63  ;;  %v8907_v63 = vmov %v4658_v56 }
0x38bc   : > { %v4661_v61 = vsub.f32 %v4657_v58, %v7762_v57  ;;  %v8908_v57 = vmov %v4657_v58 }
0x38be   : > { %7734 = vmaxabs.f32.vacc1 %v4662_v59, %v4661_v61 }
0x38c0   : > { %v7735_v62 = vmovacc.low.even.vacc1 }
0x38c2   : > { %4670 = vmax.xlane.f32.xlu0 %v7735_v62 }
0x394f   : > { %v4671_v4 = vpop.xlane.xlu0 %4670 }
0x3950   : > { %v4672_v5 = vrot.slane %v4671_v4, 4 }
0x3952   : > { %v4673_v7 = vmax.f32 %v4671_v4, %v4672_v5  ;;  %v8909_v5 = vmov %v4656_v48 }
0x3954   : > { %v4674_v8 = vrot.slane %v4673_v7, 2 }
0x3956   : > { %v4675_v9 = vmax.f32 %v4673_v7, %v4674_v8 }
0x3958   : > { %v4676_v12 = vrot.slane %v4675_v9, 1 }
0x395a   : > { %v4677_v60 = vmax.f32 %v4675_v9, %v4676_v12 }
0x395c   : > { %7435 = vpush %v4677_v60  ;;  %v8910_v60 = vmov %v4655_v49 }
0x398d   : > { %s7436_s13 = spop %7435 }
0x398e   : > { %p1857_p9 = scmp.ge.f32.partialorder %s7436_s13, 3e-06 }
0x3990   : > { %p1858_p10 = pnand %p1857_p9, %p1856_p8 }
0x3991   :  { %v8911_v34 = vmov (%p1858_p10), %v4658_v56  ;;  %v8912_v21 = vmov (%p1858_p10), %v4657_v58  ;;  %v8913_v22 = vmov (%p1858_p10), %v4656_v48  ;;  %v8914_v23 = vmov (%p1858_p10), %v4655_v49 }
0x3992   :  { %1861 = sbr.rel (!%p1858_p10) target bundleno = 7464 (0x1d28), region = 77 }
0x3999 PF:  { %4680 = vst [vmem:[#allocation10] sm:$0xff] %v7790_v23  ;;  %4681 = vst [vmem:[#allocation10 + $0x8] sm:$0xff] %v7786_v22  ;;  %s7798_s14 = smov [#allocation10]   ;;  %v7790_v23 = vphi %v8906_v23, %v8914_v23   ;;  %v7786_v22 = vphi %v8905_v22, %v8913_v22   ;;  %v7782_v21 = vphi %v8904_v21, %v8912_v21   ;;  %v7778_v34 = vphi %v8903_v34, %v8911_v34  }
0x399a   :  { %4682 = vst [vmem:[#allocation10 + $0x10] sm:$0xff] %v7782_v21  ;;  %4683 = vst [vmem:[#allocation10 + $0x18] sm:$0xff] %v7778_v34  ;;  %s4689_s15 = sshll.u32 %s7798_s14, 4  ;;  %s4690_s15 = int_to_ptr.vmem [resolvable:$true] %s4689_s15 }
0x399b   :  { %s7644_s16 = scalar_lea.vmem %s4690_s15, 512  ;;  %p7649_p12 = scmp.lt.s32.totalorder %s4690_s15, %s4690_s15 }
0x399c   :  { %p7645_p11 = scmp.ne.s32.totalorder %s4690_s15, %s7644_s16  ;;  %p7650_p13 = scmp.lt.s32.totalorder %s7644_s16, %s7644_s16 }
0x399e   :  { %p7651_p0 = por %p7650_p13, %p7649_p12 }
0x39a0   :  { %p7652_p1 = pnand %p7651_p0, %p7645_p11 }
0x39a2   :  { %7655 = shalt.err (!%p7652_p1)
}
0x39a3   :  { %s7656_s20 = scalar_lea.hbm %s8897_s4, 512 }
0x39a4   :  { %p7657_p2 = scmp.ne.s32.totalorder %s8897_s4, %s7656_s20  ;;  %p7660_p3 = scmp.lt.u32.totalorder %s7656_s20, %s8897_s4 }
0x39a6   :  { %p7662_p4 = pnand %p7660_p3, %p7657_p2 }
0x39a8   :  { %7665 = shalt.err (!%p7662_p4)
}
0x39a9   :  { %4695 = dma.vmem_to_hbm [thread:$0]  %s4690_s15, 512, %s8897_s4, [#allocation4], %s7794_s27, %s7794_s27, %s7795_s28  }
0x39aa   :  { %7728 = dma.done.wait [#allocation4], 512  }
0x39ab   :  { %7729 = vsyncadd [#allocation4], 4294966784 }
0x39ac   :  { %4699 = vsyncpa [#allocation3], 1 }
0x39ad   :  { %4700 = vsyncpa [#allocation6], 1 }
0x39ae   :  { %4701 = vsyncpa [#allocation9], 1 }
0x39af   :  { %4702 = vsyncpa [#allocation4], 1 }

</bundles_post_ra>
